<compile_context>
chip_gen: v6e
topology: v6e:2x2x1
jax: 0.10.0
libtpu: 0.0.40
codegen_flags: <defaults>
</compile_context>

<pallas_src>
import functools
import math

import jax
import jax.numpy as jnp
from jax import lax
from jax.experimental import pallas as pl
from jax.experimental.pallas import tpu as pltpu

_SQRT_HALF = 0.7071067811865476
_GELU_C = 0.7978845608028654  # sqrt(2/pi)


def _gelu_tanh(v):
    # tanh-form GELU: the transcendental goes to the EUP slot instead of a long
    # VPU erf polynomial; max abs deviation from exact erf-GELU ~3e-4.
    return 0.5 * v * (1.0 + jnp.tanh(_GELU_C * (v + 0.044715 * v * v * v)))


def _roll_lanes(x, shift):
    # Static roll along the last (lane) axis: out[:, j] = x[:, (j - shift) % L].
    # Concat-of-slices form works for any (non-128-aligned) lane width.
    L = x.shape[-1]
    s = shift % L
    if s == 0:
        return x
    return jnp.concatenate([x[:, L - s:], x[:, :L - s]], axis=-1)


def dwconv_bn_kernel(x_ref, w_ref, b_ref, gamma_ref, beta_ref,
                     y_ref, scale_ref, shift_ref, *, seq_len, kernel_size):
    """Depthwise 'same' Conv1d + bias on a (Ct, B*N) channel tile, then fold
    BatchNorm1d training-mode batch statistics into per-channel scale/shift."""
    pad = (kernel_size - 1) // 2          # odd kernel_size assumed ('same')
    x = x_ref[...]
    w = w_ref[...]
    # position within each length-seq_len segment of the flattened (b, n) lanes
    n_idx = lax.broadcasted_iota(jnp.int32, (1, x.shape[-1]), 1) % seq_len
    acc = jnp.zeros_like(x)
    for k in range(kernel_size):          # static unroll, single running acc
        d = k - pad
        tap = w[:, k:k + 1] * _roll_lanes(x, -d)
        if d != 0:
            valid = jnp.logical_and(n_idx + d >= 0, n_idx + d < seq_len)
            tap = jnp.where(valid, tap, 0.0)
        acc = acc + tap
    y = acc + b_ref[...]
    y_ref[...] = y
    # per-channel batch stats over (batch, seq) = lane axis; two-pass variance
    mean = jnp.mean(y, axis=1, keepdims=True)
    cen = y - mean
    var = jnp.mean(cen * cen, axis=1, keepdims=True)
    scale = gamma_ref[...] * lax.rsqrt(var + 1e-5)
    scale_ref[...] = scale
    shift_ref[...] = beta_ref[...] - mean * scale


def fused_ffn_kernel(y_ref, scale_ref, shift_ref,
                     w1a_ref, b1a_ref, w2a_ref, b2a_ref,
                     w1b_ref, b1b_ref, w2b_ref, b2b_ref,
                     o_ref, z_ref, *, m_groups, d_groups):
    """BN affine + grouped ConvFFN1 + (m d)->(d m) permute + grouped ConvFFN2.

    y_ref : (C, nt)    f32, channels in (m d) order, nt lanes = tile of B*N
    o_ref : (D, M, nt) f32, o_ref[d, m, :] = output channel (d*M + m)
    z_ref : (C, nt)    f32 VMEM scratch, ConvFFN1 output in (m d) order
    """
    M, D = m_groups, d_groups
    x = y_ref[...] * scale_ref[...] + shift_ref[...]            # BN applied, f32
    # ---- ConvFFN1: groups over m, per group (D -> r*D -> D) pointwise conv ----
    for m in range(M):
        xg = x[m * D:(m + 1) * D, :].astype(jnp.bfloat16)
        h = jnp.dot(w1a_ref[m], xg,
                    preferred_element_type=jnp.float32) + b1a_ref[m]
        g = _gelu_tanh(h).astype(jnp.bfloat16)
        z_ref[m * D:(m + 1) * D, :] = jnp.dot(
            w2a_ref[m], g, preferred_element_type=jnp.float32) + b2a_ref[m]
    # ---- ConvFFN2: groups over d, per group (M -> r*M -> M) pointwise conv ----
    # group d gathers channels {m*D + d}: stride-D sublane read of the VMEM
    # scratch == the 'b (m d) n -> b (d m) n' permute, no HBM round trip.
    for d in range(D):
        zg = z_ref[pl.ds(d, M, stride=D), :].astype(jnp.bfloat16)
        h2 = jnp.dot(w1b_ref[d], zg,
                     preferred_element_type=jnp.float32) + b1b_ref[d]
        g2 = _gelu_tanh(h2).astype(jnp.bfloat16)
        o_ref[d] = jnp.dot(w2b_ref[d], g2,
                           preferred_element_type=jnp.float32) + b2b_ref[d]


def _pick_channel_tile(C):
    for t in (256, 128, 64, 32, 16, 8):
        if t <= max(8, C // 2) and C % t == 0:
            return t
    return C


def _pick_lane_tile(L):
    for t in (512, 384, 256, 128):
        if L % t == 0:
            return t
    return L


def _dwconv_bn(x_cl, dw_w, dw_b, gamma, beta, seq_len):
    C, L = x_cl.shape
    K = dw_w.shape[1]
    ct = _pick_channel_tile(C)
    f32 = jnp.float32
    kern = functools.partial(dwconv_bn_kernel, seq_len=seq_len, kernel_size=K)
    return pl.pallas_call(
        kern,
        out_shape=(jax.ShapeDtypeStruct((C, L), f32),
                   jax.ShapeDtypeStruct((C, 1), f32),
                   jax.ShapeDtypeStruct((C, 1), f32)),
        grid=(C // ct,),
        in_specs=[pl.BlockSpec((ct, L), lambda i: (i, 0)),
                  pl.BlockSpec((ct, K), lambda i: (i, 0)),
                  pl.BlockSpec((ct, 1), lambda i: (i, 0)),
                  pl.BlockSpec((ct, 1), lambda i: (i, 0)),
                  pl.BlockSpec((ct, 1), lambda i: (i, 0))],
        out_specs=(pl.BlockSpec((ct, L), lambda i: (i, 0)),
                   pl.BlockSpec((ct, 1), lambda i: (i, 0)),
                   pl.BlockSpec((ct, 1), lambda i: (i, 0))),
        compiler_params=pltpu.CompilerParams(dimension_semantics=("parallel",)),
    )(x_cl, dw_w, dw_b, gamma, beta)


def _fused_ffn(y, scale, shift, w1a, b1a, w2a, b2a, w1b, b1b, w2b, b2b, M, D):
    C, L = y.shape
    rD = w1a.shape[1]
    rM = w1b.shape[1]
    nt = _pick_lane_tile(L)
    kern = functools.partial(fused_ffn_kernel, m_groups=M, d_groups=D)
    const3 = lambda j: (0, 0, 0)
    return pl.pallas_call(
        kern,
        out_shape=jax.ShapeDtypeStruct((D, M, L), jnp.float32),
        grid=(L // nt,),
        in_specs=[pl.BlockSpec((C, nt), lambda j: (0, j)),
                  pl.BlockSpec((C, 1), lambda j: (0, 0)),
                  pl.BlockSpec((C, 1), lambda j: (0, 0)),
                  pl.BlockSpec((M, rD, D), const3),
                  pl.BlockSpec((M, rD, 1), const3),
                  pl.BlockSpec((M, D, rD), const3),
                  pl.BlockSpec((M, D, 1), const3),
                  pl.BlockSpec((D, rM, M), const3),
                  pl.BlockSpec((D, rM, 1), const3),
                  pl.BlockSpec((D, M, rM), const3),
                  pl.BlockSpec((D, M, 1), const3)],
        out_specs=pl.BlockSpec((D, M, nt), lambda j: (0, 0, j)),
        scratch_shapes=[pltpu.VMEM((C, nt), jnp.float32)],
        compiler_params=pltpu.CompilerParams(dimension_semantics=("parallel",)),
    )(y, scale, shift, w1a, b1a, w2a, b2a, w1b, b1b, w2b, b2b)


def modern_tcn_block(x_emb, p):
    B, M, D, N = x_emb.shape
    C = M * D
    L = B * N
    bf16 = jnp.bfloat16
    # 'b m d n -> (m d) (b n)': channels on sublanes, batch*seq on lanes
    x_cl = x_emb.reshape(B, C, N).transpose(1, 0, 2).reshape(C, L)
    y, scale, shift = _dwconv_bn(x_cl, p['dw_w'], p['dw_b'],
                                 p['bn_gamma'], p['bn_beta'], N)
    o_dm = _fused_ffn(
        y, scale, shift,
        p['w1a'].astype(bf16), p['b1a'], p['w2a'].astype(bf16), p['b2a'],
        p['w1b'].astype(bf16), p['b1b'], p['w2b'].astype(bf16), p['b2b'],
        M, D)
    # '(d m) (b n) -> b m d n' + residual (fused transpose+add in XLA)
    return o_dm.reshape(D, M, B, N).transpose(2, 1, 0, 3) + x_emb


def reference(x_emb, p):
    """Pure-JAX reference matching the PyTorch forward (training-mode BN,
    exact erf GELU, HIGHEST matmul precision)."""
    B, M, D, N = x_emb.shape
    C = M * D
    K = p['dw_w'].shape[1]
    x = x_emb.reshape(B, C, N)
    y = lax.conv_general_dilated(x, p['dw_w'].reshape(C, 1, K), window_strides=(1,),
                                 padding='SAME', feature_group_count=C,
                                 dimension_numbers=('NCH', 'OIH', 'NCH'),
                                 precision=lax.Precision.HIGHEST)
    y = y + p['dw_b'].reshape(1, C, 1)
    mean = y.mean(axis=(0, 2), keepdims=True)
    var = ((y - mean) ** 2).mean(axis=(0, 2), keepdims=True)
    y = ((y - mean) * lax.rsqrt(var + 1e-5) * p['bn_gamma'].reshape(1, C, 1)
         + p['bn_beta'].reshape(1, C, 1))

    def gelu(v):
        return 0.5 * v * (1.0 + lax.erf(v * _SQRT_HALF))

    def gffn(v, w1, b1, w2, b2):
        G, O, I = w1.shape
        vg = v.reshape(B, G, I, N)
        h = gelu(jnp.einsum('goi,bgin->bgon', w1, vg,
                            precision=lax.Precision.HIGHEST) + b1[None])
        z = jnp.einsum('gio,bgon->bgin', w2, h,
                       precision=lax.Precision.HIGHEST) + b2[None]
        return z.reshape(B, C, N)

    z = gffn(y, p['w1a'], p['b1a'], p['w2a'], p['b2a'])
    z = z.reshape(B, M, D, N).transpose(0, 2, 1, 3).reshape(B, C, N)
    o = gffn(z, p['w1b'], p['b1b'], p['w2b'], p['b2b'])
    o = o.reshape(B, D, M, N).transpose(0, 2, 1, 3)
    return o + x_emb


if __name__ == "__main__":
    B, M, D, N, K, r = 2, 8, 16, 16, 5, 2
    C = M * D
    rD, rM = r * D, r * M
    f32 = jnp.float32
    ks = jax.random.split(jax.random.PRNGKey(0), 13)
    p = {
        'dw_w': 0.3 * jax.random.normal(ks[0], (C, K), f32),
        'dw_b': 0.1 * jax.random.normal(ks[1], (C, 1), f32),
        'bn_gamma': 1.0 + 0.1 * jax.random.normal(ks[2], (C, 1), f32),
        'bn_beta': 0.1 * jax.random.normal(ks[3], (C, 1), f32),
        # ConvFFN1 (groups=M): per-group (D -> r*D -> D) pointwise weights
        'w1a': jax.random.normal(ks[4], (M, rD, D), f32) / math.sqrt(D),
        'b1a': 0.05 * jax.random.normal(ks[5], (M, rD, 1), f32),
        'w2a': jax.random.normal(ks[6], (M, D, rD), f32) / math.sqrt(rD),
        'b2a': 0.05 * jax.random.normal(ks[7], (M, D, 1), f32),
        # ConvFFN2 (groups=D): per-group (M -> r*M -> M) pointwise weights
        'w1b': jax.random.normal(ks[8], (D, rM, M), f32) / math.sqrt(M),
        'b1b': 0.05 * jax.random.normal(ks[9], (D, rM, 1), f32),
        'w2b': jax.random.normal(ks[10], (D, M, rM), f32) / math.sqrt(rM),
        'b2b': 0.05 * jax.random.normal(ks[11], (D, M, 1), f32),
    }
    x_emb = jax.random.normal(ks[12], (B, M, D, N), f32)

    out = jax.block_until_ready(jax.jit(modern_tcn_block)(x_emb, p))
    ref = reference(x_emb, p)
    assert out.shape == x_emb.shape
    # tolerance reflects the bf16 MXU matmul path + tanh-GELU vs the f32
    # HIGHEST / erf-GELU reference (expected max abs err ~1e-2)
    if not jnp.allclose(out, ref, atol=2e-2, rtol=2e-2):
        raise AssertionError(
            f"mismatch vs reference, max abs err = {jnp.max(jnp.abs(out - ref))}")
    print("KERNEL_OK")
</pallas_src>

<mosaic_0001>
module attributes {stable_mosaic.version = 11 : i64} {
  func.func @dwconv_bn_kernel(%arg0: i32, %arg1: memref<64x32xf32, #tpu.memory_space<vmem>>, %arg2: memref<64x5xf32, #tpu.memory_space<vmem>>, %arg3: memref<64x1xf32, #tpu.memory_space<vmem>>, %arg4: memref<64x1xf32, #tpu.memory_space<vmem>>, %arg5: memref<64x1xf32, #tpu.memory_space<vmem>>, %arg6: memref<64x32xf32, #tpu.memory_space<vmem>>, %arg7: memref<64x1xf32, #tpu.memory_space<vmem>>, %arg8: memref<64x1xf32, #tpu.memory_space<vmem>>) attributes {dimension_semantics = [#tpu.dimension_semantics<parallel>], iteration_bounds = array<i64: 2>, scalar_prefetch = 0 : i64, scratch_operands = 0 : i64, tpu.core_type = #tpu.core_type<tc>, window_params = [{transform_indices = @transform_0, window_bounds = array<i64: 64, 32>}, {transform_indices = @transform_1, window_bounds = array<i64: 64, 5>}, {transform_indices = @transform_2, window_bounds = array<i64: 64, 1>}, {transform_indices = @transform_3, window_bounds = array<i64: 64, 1>}, {transform_indices = @transform_4, window_bounds = array<i64: 64, 1>}, {transform_indices = @transform_5, window_bounds = array<i64: 64, 32>}, {transform_indices = @transform_6, window_bounds = array<i64: 64, 1>}, {transform_indices = @transform_7, window_bounds = array<i64: 64, 1>}]} {
    %c0 = arith.constant 0 : index
    %c0_0 = arith.constant 0 : index
    %0 = vector.load %arg1[%c0, %c0_0] : memref<64x32xf32, #tpu.memory_space<vmem>>, vector<64x32xf32>
    %c0_1 = arith.constant 0 : index
    %c0_2 = arith.constant 0 : index
    %1 = vector.load %arg2[%c0_1, %c0_2] : memref<64x5xf32, #tpu.memory_space<vmem>>, vector<64x5xf32>
    %2 = tpu.iota {dimensions = array<i32: 1>} : vector<1x32xi32>
    %c16_i32 = arith.constant 16 : i32
    %c0_i32 = arith.constant 0 : i32
    %3 = arith.cmpi eq, %c16_i32, %c0_i32 : i32
    %c1_i32 = arith.constant 1 : i32
    %4 = arith.select %3, %c1_i32, %c16_i32 : i32
    %5 = vector.broadcast %4 : i32 to vector<1x32xi32>
    %6 = arith.remsi %2, %5 : vector<1x32xi32>
    %c0_i32_3 = arith.constant 0 : i32
    %7 = vector.broadcast %c0_i32_3 : i32 to vector<1x32xi32>
    %8 = arith.cmpi ne, %6, %7 : vector<1x32xi32>
    %c0_i32_4 = arith.constant 0 : i32
    %9 = vector.broadcast %c0_i32_4 : i32 to vector<1x32xi32>
    %10 = arith.cmpi slt, %6, %9 : vector<1x32xi32>
    %c0_i32_5 = arith.constant 0 : i32
    %11 = arith.cmpi slt, %4, %c0_i32_5 : i32
    %12 = vector.broadcast %11 : i1 to vector<1x32xi1>
    %13 = vector.broadcast %12 : vector<1x32xi1> to vector<1x32xi1>
    %14 = arith.xori %10, %13 : vector<1x32xi1>
    %15 = arith.andi %14, %8 : vector<1x32xi1>
    %16 = vector.broadcast %4 : i32 to vector<1x32xi32>
    %17 = arith.addi %6, %16 : vector<1x32xi32>
    %18 = arith.select %15, %17, %6 : vector<1x32xi1>, vector<1x32xi32>
    %cst = arith.constant 0.000000e+00 : f32
    %19 = vector.broadcast %cst : f32 to vector<64x32xf32>
    %20 = vector.extract_strided_slice %1 {offsets = [0, 0], sizes = [64, 1], strides = [1, 1]} : vector<64x5xf32> to vector<64x1xf32>
    %21 = vector.extract_strided_slice %0 {offsets = [0, 30], sizes = [64, 2], strides = [1, 1]} : vector<64x32xf32> to vector<64x2xf32>
    %22 = vector.extract_strided_slice %0 {offsets = [0, 0], sizes = [64, 30], strides = [1, 1]} : vector<64x32xf32> to vector<64x30xf32>
    %23 = tpu.concatenate %21, %22 in 1 : vector<64x2xf32>, vector<64x30xf32> -> vector<64x32xf32>
    %24 = vector.broadcast %20 : vector<64x1xf32> to vector<64x32xf32>
    %25 = arith.mulf %24, %23 : vector<64x32xf32>
    %c-2_i32 = arith.constant -2 : i32
    %26 = vector.broadcast %c-2_i32 : i32 to vector<1x32xi32>
    %27 = arith.addi %18, %26 : vector<1x32xi32>
    %c0_i32_6 = arith.constant 0 : i32
    %28 = vector.broadcast %c0_i32_6 : i32 to vector<1x32xi32>
    %29 = arith.cmpi sge, %27, %28 : vector<1x32xi32>
    %c-2_i32_7 = arith.constant -2 : i32
    %30 = vector.broadcast %c-2_i32_7 : i32 to vector<1x32xi32>
    %31 = arith.addi %18, %30 : vector<1x32xi32>
    %c16_i32_8 = arith.constant 16 : i32
    %32 = vector.broadcast %c16_i32_8 : i32 to vector<1x32xi32>
    %33 = arith.cmpi slt, %31, %32 : vector<1x32xi32>
    %34 = arith.andi %29, %33 : vector<1x32xi1>
    %cst_9 = arith.constant 0.000000e+00 : f32
    %35 = vector.shape_cast %34 : vector<1x32xi1> to vector<1x32xi1>
    %36 = vector.broadcast %35 : vector<1x32xi1> to vector<64x32xi1>
    %37 = vector.broadcast %cst_9 : f32 to vector<64x32xf32>
    %38 = arith.select %36, %25, %37 : vector<64x32xi1>, vector<64x32xf32>
    %39 = arith.addf %19, %38 : vector<64x32xf32>
    %40 = vector.extract_strided_slice %1 {offsets = [0, 1], sizes = [64, 1], strides = [1, 1]} : vector<64x5xf32> to vector<64x1xf32>
    %41 = vector.extract_strided_slice %0 {offsets = [0, 31], sizes = [64, 1], strides = [1, 1]} : vector<64x32xf32> to vector<64x1xf32>
    %42 = vector.extract_strided_slice %0 {offsets = [0, 0], sizes = [64, 31], strides = [1, 1]} : vector<64x32xf32> to vector<64x31xf32>
    %43 = tpu.concatenate %41, %42 in 1 : vector<64x1xf32>, vector<64x31xf32> -> vector<64x32xf32>
    %44 = vector.broadcast %40 : vector<64x1xf32> to vector<64x32xf32>
    %45 = arith.mulf %44, %43 : vector<64x32xf32>
    %c-1_i32 = arith.constant -1 : i32
    %46 = vector.broadcast %c-1_i32 : i32 to vector<1x32xi32>
    %47 = arith.addi %18, %46 : vector<1x32xi32>
    %c0_i32_10 = arith.constant 0 : i32
    %48 = vector.broadcast %c0_i32_10 : i32 to vector<1x32xi32>
    %49 = arith.cmpi sge, %47, %48 : vector<1x32xi32>
    %c-1_i32_11 = arith.constant -1 : i32
    %50 = vector.broadcast %c-1_i32_11 : i32 to vector<1x32xi32>
    %51 = arith.addi %18, %50 : vector<1x32xi32>
    %c16_i32_12 = arith.constant 16 : i32
    %52 = vector.broadcast %c16_i32_12 : i32 to vector<1x32xi32>
    %53 = arith.cmpi slt, %51, %52 : vector<1x32xi32>
    %54 = arith.andi %49, %53 : vector<1x32xi1>
    %cst_13 = arith.constant 0.000000e+00 : f32
    %55 = vector.shape_cast %54 : vector<1x32xi1> to vector<1x32xi1>
    %56 = vector.broadcast %55 : vector<1x32xi1> to vector<64x32xi1>
    %57 = vector.broadcast %cst_13 : f32 to vector<64x32xf32>
    %58 = arith.select %56, %45, %57 : vector<64x32xi1>, vector<64x32xf32>
    %59 = arith.addf %39, %58 : vector<64x32xf32>
    %60 = vector.extract_strided_slice %1 {offsets = [0, 2], sizes = [64, 1], strides = [1, 1]} : vector<64x5xf32> to vector<64x1xf32>
    %61 = vector.broadcast %60 : vector<64x1xf32> to vector<64x32xf32>
    %62 = arith.mulf %61, %0 : vector<64x32xf32>
    %63 = arith.addf %59, %62 : vector<64x32xf32>
    %64 = vector.extract_strided_slice %1 {offsets = [0, 3], sizes = [64, 1], strides = [1, 1]} : vector<64x5xf32> to vector<64x1xf32>
    %65 = vector.extract_strided_slice %0 {offsets = [0, 1], sizes = [64, 31], strides = [1, 1]} : vector<64x32xf32> to vector<64x31xf32>
    %66 = vector.extract_strided_slice %0 {offsets = [0, 0], sizes = [64, 1], strides = [1, 1]} : vector<64x32xf32> to vector<64x1xf32>
    %67 = tpu.concatenate %65, %66 in 1 : vector<64x31xf32>, vector<64x1xf32> -> vector<64x32xf32>
    %68 = vector.broadcast %64 : vector<64x1xf32> to vector<64x32xf32>
    %69 = arith.mulf %68, %67 : vector<64x32xf32>
    %c1_i32_14 = arith.constant 1 : i32
    %70 = vector.broadcast %c1_i32_14 : i32 to vector<1x32xi32>
    %71 = arith.addi %18, %70 : vector<1x32xi32>
    %c0_i32_15 = arith.constant 0 : i32
    %72 = vector.broadcast %c0_i32_15 : i32 to vector<1x32xi32>
    %73 = arith.cmpi sge, %71, %72 : vector<1x32xi32>
    %c1_i32_16 = arith.constant 1 : i32
    %74 = vector.broadcast %c1_i32_16 : i32 to vector<1x32xi32>
    %75 = arith.addi %18, %74 : vector<1x32xi32>
    %c16_i32_17 = arith.constant 16 : i32
    %76 = vector.broadcast %c16_i32_17 : i32 to vector<1x32xi32>
    %77 = arith.cmpi slt, %75, %76 : vector<1x32xi32>
    %78 = arith.andi %73, %77 : vector<1x32xi1>
    %cst_18 = arith.constant 0.000000e+00 : f32
    %79 = vector.shape_cast %78 : vector<1x32xi1> to vector<1x32xi1>
    %80 = vector.broadcast %79 : vector<1x32xi1> to vector<64x32xi1>
    %81 = vector.broadcast %cst_18 : f32 to vector<64x32xf32>
    %82 = arith.select %80, %69, %81 : vector<64x32xi1>, vector<64x32xf32>
    %83 = arith.addf %63, %82 : vector<64x32xf32>
    %84 = vector.extract_strided_slice %1 {offsets = [0, 4], sizes = [64, 1], strides = [1, 1]} : vector<64x5xf32> to vector<64x1xf32>
    %85 = vector.extract_strided_slice %0 {offsets = [0, 2], sizes = [64, 30], strides = [1, 1]} : vector<64x32xf32> to vector<64x30xf32>
    %86 = vector.extract_strided_slice %0 {offsets = [0, 0], sizes = [64, 2], strides = [1, 1]} : vector<64x32xf32> to vector<64x2xf32>
    %87 = tpu.concatenate %85, %86 in 1 : vector<64x30xf32>, vector<64x2xf32> -> vector<64x32xf32>
    %88 = vector.broadcast %84 : vector<64x1xf32> to vector<64x32xf32>
    %89 = arith.mulf %88, %87 : vector<64x32xf32>
    %c2_i32 = arith.constant 2 : i32
    %90 = vector.broadcast %c2_i32 : i32 to vector<1x32xi32>
    %91 = arith.addi %18, %90 : vector<1x32xi32>
    %c0_i32_19 = arith.constant 0 : i32
    %92 = vector.broadcast %c0_i32_19 : i32 to vector<1x32xi32>
    %93 = arith.cmpi sge, %91, %92 : vector<1x32xi32>
    %c2_i32_20 = arith.constant 2 : i32
    %94 = vector.broadcast %c2_i32_20 : i32 to vector<1x32xi32>
    %95 = arith.addi %18, %94 : vector<1x32xi32>
    %c16_i32_21 = arith.constant 16 : i32
    %96 = vector.broadcast %c16_i32_21 : i32 to vector<1x32xi32>
    %97 = arith.cmpi slt, %95, %96 : vector<1x32xi32>
    %98 = arith.andi %93, %97 : vector<1x32xi1>
    %cst_22 = arith.constant 0.000000e+00 : f32
    %99 = vector.shape_cast %98 : vector<1x32xi1> to vector<1x32xi1>
    %100 = vector.broadcast %99 : vector<1x32xi1> to vector<64x32xi1>
    %101 = vector.broadcast %cst_22 : f32 to vector<64x32xf32>
    %102 = arith.select %100, %89, %101 : vector<64x32xi1>, vector<64x32xf32>
    %103 = arith.addf %83, %102 : vector<64x32xf32>
    %c0_23 = arith.constant 0 : index
    %c0_24 = arith.constant 0 : index
    %104 = vector.load %arg3[%c0_23, %c0_24] : memref<64x1xf32, #tpu.memory_space<vmem>>, vector<64x1xf32>
    %105 = vector.broadcast %104 : vector<64x1xf32> to vector<64x32xf32>
    %106 = arith.addf %103, %105 : vector<64x32xf32>
    %c0_25 = arith.constant 0 : index
    %c0_26 = arith.constant 0 : index
    %107 = vector.load %arg6[%c0_25, %c0_26] : memref<64x32xf32, #tpu.memory_space<vmem>>, vector<64x32xf32>
    tpu.vector_store %arg6[%c0_25, %c0_26], %106 {strides = array<i32>} : memref<64x32xf32, #tpu.memory_space<vmem>>, vector<64x32xf32>,
    %cst_27 = arith.constant dense<0.000000e+00> : vector<64xf32>
    %108 = vector.multi_reduction <add>, %106, %cst_27 [1] : vector<64x32xf32> to vector<64xf32>
    %109 = vector.shape_cast %108 : vector<64xf32> to vector<64x1xf32>
    %cst_28 = arith.constant 3.200000e+01 : f32
    %110 = vector.broadcast %cst_28 : f32 to vector<64x1xf32>
    %111 = arith.divf %109, %110 : vector<64x1xf32>
    %112 = vector.broadcast %111 : vector<64x1xf32> to vector<64x32xf32>
    %113 = arith.subf %106, %112 : vector<64x32xf32>
    %114 = arith.mulf %113, %113 : vector<64x32xf32>
    %cst_29 = arith.constant dense<0.000000e+00> : vector<64xf32>
    %115 = vector.multi_reduction <add>, %114, %cst_29 [1] : vector<64x32xf32> to vector<64xf32>
    %116 = vector.shape_cast %115 : vector<64xf32> to vector<64x1xf32>
    %cst_30 = arith.constant 3.200000e+01 : f32
    %117 = vector.broadcast %cst_30 : f32 to vector<64x1xf32>
    %118 = arith.divf %116, %117 : vector<64x1xf32>
    %c0_31 = arith.constant 0 : index
    %c0_32 = arith.constant 0 : index
    %119 = vector.load %arg4[%c0_31, %c0_32] : memref<64x1xf32, #tpu.memory_space<vmem>>, vector<64x1xf32>
    %cst_33 = arith.constant 9.99999974E-6 : f32
    %120 = vector.broadcast %cst_33 : f32 to vector<64x1xf32>
    %121 = arith.addf %118, %120 : vector<64x1xf32>
    %122 = math.rsqrt %121 : vector<64x1xf32>
    %123 = arith.mulf %119, %122 : vector<64x1xf32>
    %c0_34 = arith.constant 0 : index
    %c0_35 = arith.constant 0 : index
    %124 = vector.load %arg7[%c0_34, %c0_35] : memref<64x1xf32, #tpu.memory_space<vmem>>, vector<64x1xf32>
    tpu.vector_store %arg7[%c0_34, %c0_35], %123 {strides = array<i32>} : memref<64x1xf32, #tpu.memory_space<vmem>>, vector<64x1xf32>,
    %c0_36 = arith.constant 0 : index
    %c0_37 = arith.constant 0 : index
    %125 = vector.load %arg5[%c0_36, %c0_37] : memref<64x1xf32, #tpu.memory_space<vmem>>, vector<64x1xf32>
    %126 = arith.mulf %111, %123 : vector<64x1xf32>
    %127 = arith.subf %125, %126 : vector<64x1xf32>
    %c0_38 = arith.constant 0 : index
    %c0_39 = arith.constant 0 : index
    %128 = vector.load %arg8[%c0_38, %c0_39] : memref<64x1xf32, #tpu.memory_space<vmem>>, vector<64x1xf32>
    tpu.vector_store %arg8[%c0_38, %c0_39], %127 {strides = array<i32>} : memref<64x1xf32, #tpu.memory_space<vmem>>, vector<64x1xf32>,
    return
  }
  func.func @transform_0(%arg0: i32) -> (i32, i32) {
    %c0_i32 = arith.constant 0 : i32
    %c0_i32_0 = arith.constant 0 : i32
    return %arg0, %c0_i32 : i32, i32
  }
  func.func @transform_1(%arg0: i32) -> (i32, i32) {
    %c0_i32 = arith.constant 0 : i32
    %c0_i32_0 = arith.constant 0 : i32
    return %arg0, %c0_i32 : i32, i32
  }
  func.func @transform_2(%arg0: i32) -> (i32, i32) {
    %c0_i32 = arith.constant 0 : i32
    %c0_i32_0 = arith.constant 0 : i32
    return %arg0, %c0_i32 : i32, i32
  }
  func.func @transform_3(%arg0: i32) -> (i32, i32) {
    %c0_i32 = arith.constant 0 : i32
    %c0_i32_0 = arith.constant 0 : i32
    return %arg0, %c0_i32 : i32, i32
  }
  func.func @transform_4(%arg0: i32) -> (i32, i32) {
    %c0_i32 = arith.constant 0 : i32
    %c0_i32_0 = arith.constant 0 : i32
    return %arg0, %c0_i32 : i32, i32
  }
  func.func @transform_5(%arg0: i32) -> (i32, i32) {
    %c0_i32 = arith.constant 0 : i32
    %c0_i32_0 = arith.constant 0 : i32
    return %arg0, %c0_i32 : i32, i32
  }
  func.func @transform_6(%arg0: i32) -> (i32, i32) {
    %c0_i32 = arith.constant 0 : i32
    %c0_i32_0 = arith.constant 0 : i32
    return %arg0, %c0_i32 : i32, i32
  }
  func.func @transform_7(%arg0: i32) -> (i32, i32) {
    %c0_i32 = arith.constant 0 : i32
    %c0_i32_0 = arith.constant 0 : i32
    return %arg0, %c0_i32 : i32, i32
  }
}

module attributes {stable_mosaic.version = 11 : i64} {
  func.func @fused_ffn_kernel(%arg0: i32, %arg1: memref<128x32xf32, #tpu.memory_space<vmem>>, %arg2: memref<128x1xf32, #tpu.memory_space<vmem>>, %arg3: memref<128x1xf32, #tpu.memory_space<vmem>>, %arg4: memref<8x32x16xbf16, #tpu.memory_space<vmem>>, %arg5: memref<8x32x1xf32, #tpu.memory_space<vmem>>, %arg6: memref<8x16x32xbf16, #tpu.memory_space<vmem>>, %arg7: memref<8x16x1xf32, #tpu.memory_space<vmem>>, %arg8: memref<16x16x8xbf16, #tpu.memory_space<vmem>>, %arg9: memref<16x16x1xf32, #tpu.memory_space<vmem>>, %arg10: memref<16x8x16xbf16, #tpu.memory_space<vmem>>, %arg11: memref<16x8x1xf32, #tpu.memory_space<vmem>>, %arg12: memref<16x8x32xf32, #tpu.memory_space<vmem>>, %arg13: memref<128x32xf32, #tpu.memory_space<vmem>>) attributes {dimension_semantics = [#tpu.dimension_semantics<parallel>], iteration_bounds = array<i64: 1>, scalar_prefetch = 0 : i64, scratch_operands = 1 : i64, tpu.core_type = #tpu.core_type<tc>, window_params = [{transform_indices = @transform_0, window_bounds = array<i64: 128, 32>}, {pipeline_mode = #tpu.pipeline_mode<synchronous>, transform_indices = @transform_1, window_bounds = array<i64: 128, 1>}, {pipeline_mode = #tpu.pipeline_mode<synchronous>, transform_indices = @transform_2, window_bounds = array<i64: 128, 1>}, {pipeline_mode = #tpu.pipeline_mode<synchronous>, transform_indices = @transform_3, window_bounds = array<i64: 8, 32, 16>}, {pipeline_mode = #tpu.pipeline_mode<synchronous>, transform_indices = @transform_4, window_bounds = array<i64: 8, 32, 1>}, {pipeline_mode = #tpu.pipeline_mode<synchronous>, transform_indices = @transform_5, window_bounds = array<i64: 8, 16, 32>}, {pipeline_mode = #tpu.pipeline_mode<synchronous>, transform_indices = @transform_6, window_bounds = array<i64: 8, 16, 1>}, {pipeline_mode = #tpu.pipeline_mode<synchronous>, transform_indices = @transform_7, window_bounds = array<i64: 16, 16, 8>}, {pipeline_mode = #tpu.pipeline_mode<synchronous>, transform_indices = @transform_8, window_bounds = array<i64: 16, 16, 1>}, {pipeline_mode = #tpu.pipeline_mode<synchronous>, transform_indices = @transform_9, window_bounds = array<i64: 16, 8, 16>}, {pipeline_mode = #tpu.pipeline_mode<synchronous>, transform_indices = @transform_10, window_bounds = array<i64: 16, 8, 1>}, {transform_indices = @transform_11, window_bounds = array<i64: 16, 8, 32>}]} {
    %c0 = arith.constant 0 : index
    %c0_0 = arith.constant 0 : index
    %0 = vector.load %arg1[%c0, %c0_0] : memref<128x32xf32, #tpu.memory_space<vmem>>, vector<128x32xf32>
    %c0_1 = arith.constant 0 : index
    %c0_2 = arith.constant 0 : index
    %1 = vector.load %arg2[%c0_1, %c0_2] : memref<128x1xf32, #tpu.memory_space<vmem>>, vector<128x1xf32>
    %2 = vector.broadcast %1 : vector<128x1xf32> to vector<128x32xf32>
    %3 = arith.mulf %0, %2 : vector<128x32xf32>
    %c0_3 = arith.constant 0 : index
    %c0_4 = arith.constant 0 : index
    %4 = vector.load %arg3[%c0_3, %c0_4] : memref<128x1xf32, #tpu.memory_space<vmem>>, vector<128x1xf32>
    %5 = vector.broadcast %4 : vector<128x1xf32> to vector<128x32xf32>
    %6 = arith.addf %3, %5 : vector<128x32xf32>
    %7 = vector.extract_strided_slice %6 {offsets = [0, 0], sizes = [16, 32], strides = [1, 1]} : vector<128x32xf32> to vector<16x32xf32>
    %8 = arith.truncf %7 : vector<16x32xf32> to vector<16x32xbf16>
    %c0_5 = arith.constant 0 : index
    %c0_6 = arith.constant 0 : index
    %c0_7 = arith.constant 0 : index
    %9 = vector.load %arg4[%c0_5, %c0_6, %c0_7] : memref<8x32x16xbf16, #tpu.memory_space<vmem>>, vector<1x32x16xbf16>
    %10 = vector.shape_cast %9 : vector<1x32x16xbf16> to vector<32x16xbf16>
    %cst = arith.constant dense<0.000000e+00> : vector<32x32xf32>
    %11 = tpu.matmul %10, %8, %cst {dimension_numbers = #tpu.dot_dimension_numbers<[1], [0], [0], [1], [0, 0, 1, 1], [], []>} : vector<32x16xbf16>, vector<16x32xbf16>, vector<32x32xf32> -> vector<32x32xf32>
    %c0_8 = arith.constant 0 : index
    %c0_9 = arith.constant 0 : index
    %c0_10 = arith.constant 0 : index
    %12 = vector.load %arg5[%c0_8, %c0_9, %c0_10] : memref<8x32x1xf32, #tpu.memory_space<vmem>>, vector<1x32x1xf32>
    %13 = vector.shape_cast %12 : vector<1x32x1xf32> to vector<32x1xf32>
    %14 = vector.broadcast %13 : vector<32x1xf32> to vector<32x32xf32>
    %15 = arith.addf %11, %14 : vector<32x32xf32>
    %cst_11 = arith.constant 5.000000e-01 : f32
    %16 = vector.broadcast %cst_11 : f32 to vector<32x32xf32>
    %17 = arith.mulf %16, %15 : vector<32x32xf32>
    %cst_12 = arith.constant 4.471500e-02 : f32
    %18 = vector.broadcast %cst_12 : f32 to vector<32x32xf32>
    %19 = arith.mulf %18, %15 : vector<32x32xf32>
    %20 = arith.mulf %19, %15 : vector<32x32xf32>
    %21 = arith.mulf %20, %15 : vector<32x32xf32>
    %22 = arith.addf %15, %21 : vector<32x32xf32>
    %cst_13 = arith.constant 0.797884583 : f32
    %23 = vector.broadcast %cst_13 : f32 to vector<32x32xf32>
    %24 = arith.mulf %23, %22 : vector<32x32xf32>
    %25 = math.tanh %24 : vector<32x32xf32>
    %cst_14 = arith.constant 1.000000e+00 : f32
    %26 = vector.broadcast %cst_14 : f32 to vector<32x32xf32>
    %27 = arith.addf %26, %25 : vector<32x32xf32>
    %28 = arith.mulf %17, %27 : vector<32x32xf32>
    %29 = arith.truncf %28 : vector<32x32xf32> to vector<32x32xbf16>
    %c0_15 = arith.constant 0 : index
    %c0_16 = arith.constant 0 : index
    %c0_17 = arith.constant 0 : index
    %30 = vector.load %arg6[%c0_15, %c0_16, %c0_17] : memref<8x16x32xbf16, #tpu.memory_space<vmem>>, vector<1x16x32xbf16>
    %31 = vector.shape_cast %30 : vector<1x16x32xbf16> to vector<16x32xbf16>
    %cst_18 = arith.constant dense<0.000000e+00> : vector<16x32xf32>
    %32 = tpu.matmul %31, %29, %cst_18 {dimension_numbers = #tpu.dot_dimension_numbers<[1], [0], [0], [1], [0, 0, 1, 1], [], []>} : vector<16x32xbf16>, vector<32x32xbf16>, vector<16x32xf32> -> vector<16x32xf32>
    %c0_19 = arith.constant 0 : index
    %c0_20 = arith.constant 0 : index
    %c0_21 = arith.constant 0 : index
    %33 = vector.load %arg7[%c0_19, %c0_20, %c0_21] : memref<8x16x1xf32, #tpu.memory_space<vmem>>, vector<1x16x1xf32>
    %34 = vector.shape_cast %33 : vector<1x16x1xf32> to vector<16x1xf32>
    %35 = vector.broadcast %34 : vector<16x1xf32> to vector<16x32xf32>
    %36 = arith.addf %32, %35 : vector<16x32xf32>
    %c0_22 = arith.constant 0 : index
    %c0_23 = arith.constant 0 : index
    %37 = vector.load %arg13[%c0_22, %c0_23] : memref<128x32xf32, #tpu.memory_space<vmem>>, vector<16x32xf32>
    tpu.vector_store %arg13[%c0_22, %c0_23], %36 {strides = array<i32>} : memref<128x32xf32, #tpu.memory_space<vmem>>, vector<16x32xf32>,
    %38 = vector.extract_strided_slice %6 {offsets = [16, 0], sizes = [16, 32], strides = [1, 1]} : vector<128x32xf32> to vector<16x32xf32>
    %39 = arith.truncf %38 : vector<16x32xf32> to vector<16x32xbf16>
    %c1 = arith.constant 1 : index
    %c0_24 = arith.constant 0 : index
    %c0_25 = arith.constant 0 : index
    %40 = vector.load %arg4[%c1, %c0_24, %c0_25] : memref<8x32x16xbf16, #tpu.memory_space<vmem>>, vector<1x32x16xbf16>
    %41 = vector.shape_cast %40 : vector<1x32x16xbf16> to vector<32x16xbf16>
    %cst_26 = arith.constant dense<0.000000e+00> : vector<32x32xf32>
    %42 = tpu.matmul %41, %39, %cst_26 {dimension_numbers = #tpu.dot_dimension_numbers<[1], [0], [0], [1], [0, 0, 1, 1], [], []>} : vector<32x16xbf16>, vector<16x32xbf16>, vector<32x32xf32> -> vector<32x32xf32>
    %c1_27 = arith.constant 1 : index
    %c0_28 = arith.constant 0 : index
    %c0_29 = arith.constant 0 : index
    %43 = vector.load %arg5[%c1_27, %c0_28, %c0_29] : memref<8x32x1xf32, #tpu.memory_space<vmem>>, vector<1x32x1xf32>
    %44 = vector.shape_cast %43 : vector<1x32x1xf32> to vector<32x1xf32>
    %45 = vector.broadcast %44 : vector<32x1xf32> to vector<32x32xf32>
    %46 = arith.addf %42, %45 : vector<32x32xf32>
    %cst_30 = arith.constant 5.000000e-01 : f32
    %47 = vector.broadcast %cst_30 : f32 to vector<32x32xf32>
    %48 = arith.mulf %47, %46 : vector<32x32xf32>
    %cst_31 = arith.constant 4.471500e-02 : f32
    %49 = vector.broadcast %cst_31 : f32 to vector<32x32xf32>
    %50 = arith.mulf %49, %46 : vector<32x32xf32>
    %51 = arith.mulf %50, %46 : vector<32x32xf32>
    %52 = arith.mulf %51, %46 : vector<32x32xf32>
    %53 = arith.addf %46, %52 : vector<32x32xf32>
    %cst_32 = arith.constant 0.797884583 : f32
    %54 = vector.broadcast %cst_32 : f32 to vector<32x32xf32>
    %55 = arith.mulf %54, %53 : vector<32x32xf32>
    %56 = math.tanh %55 : vector<32x32xf32>
    %cst_33 = arith.constant 1.000000e+00 : f32
    %57 = vector.broadcast %cst_33 : f32 to vector<32x32xf32>
    %58 = arith.addf %57, %56 : vector<32x32xf32>
    %59 = arith.mulf %48, %58 : vector<32x32xf32>
    %60 = arith.truncf %59 : vector<32x32xf32> to vector<32x32xbf16>
    %c1_34 = arith.constant 1 : index
    %c0_35 = arith.constant 0 : index
    %c0_36 = arith.constant 0 : index
    %61 = vector.load %arg6[%c1_34, %c0_35, %c0_36] : memref<8x16x32xbf16, #tpu.memory_space<vmem>>, vector<1x16x32xbf16>
    %62 = vector.shape_cast %61 : vector<1x16x32xbf16> to vector<16x32xbf16>
    %cst_37 = arith.constant dense<0.000000e+00> : vector<16x32xf32>
    %63 = tpu.matmul %62, %60, %cst_37 {dimension_numbers = #tpu.dot_dimension_numbers<[1], [0], [0], [1], [0, 0, 1, 1], [], []>} : vector<16x32xbf16>, vector<32x32xbf16>, vector<16x32xf32> -> vector<16x32xf32>
    %c1_38 = arith.constant 1 : index
    %c0_39 = arith.constant 0 : index
    %c0_40 = arith.constant 0 : index
    %64 = vector.load %arg7[%c1_38, %c0_39, %c0_40] : memref<8x16x1xf32, #tpu.memory_space<vmem>>, vector<1x16x1xf32>
    %65 = vector.shape_cast %64 : vector<1x16x1xf32> to vector<16x1xf32>
    %66 = vector.broadcast %65 : vector<16x1xf32> to vector<16x32xf32>
    %67 = arith.addf %63, %66 : vector<16x32xf32>
    %c16 = arith.constant 16 : index
    %c0_41 = arith.constant 0 : index
    %68 = vector.load %arg13[%c16, %c0_41] : memref<128x32xf32, #tpu.memory_space<vmem>>, vector<16x32xf32>
    tpu.vector_store %arg13[%c16, %c0_41], %67 {strides = array<i32>} : memref<128x32xf32, #tpu.memory_space<vmem>>, vector<16x32xf32>,
    %69 = vector.extract_strided_slice %6 {offsets = [32, 0], sizes = [16, 32], strides = [1, 1]} : vector<128x32xf32> to vector<16x32xf32>
    %70 = arith.truncf %69 : vector<16x32xf32> to vector<16x32xbf16>
    %c2 = arith.constant 2 : index
    %c0_42 = arith.constant 0 : index
    %c0_43 = arith.constant 0 : index
    %71 = vector.load %arg4[%c2, %c0_42, %c0_43] : memref<8x32x16xbf16, #tpu.memory_space<vmem>>, vector<1x32x16xbf16>
    %72 = vector.shape_cast %71 : vector<1x32x16xbf16> to vector<32x16xbf16>
    %cst_44 = arith.constant dense<0.000000e+00> : vector<32x32xf32>
    %73 = tpu.matmul %72, %70, %cst_44 {dimension_numbers = #tpu.dot_dimension_numbers<[1], [0], [0], [1], [0, 0, 1, 1], [], []>} : vector<32x16xbf16>, vector<16x32xbf16>, vector<32x32xf32> -> vector<32x32xf32>
    %c2_45 = arith.constant 2 : index
    %c0_46 = arith.constant 0 : index
    %c0_47 = arith.constant 0 : index
    %74 = vector.load %arg5[%c2_45, %c0_46, %c0_47] : memref<8x32x1xf32, #tpu.memory_space<vmem>>, vector<1x32x1xf32>
    %75 = vector.shape_cast %74 : vector<1x32x1xf32> to vector<32x1xf32>
    %76 = vector.broadcast %75 : vector<32x1xf32> to vector<32x32xf32>
    %77 = arith.addf %73, %76 : vector<32x32xf32>
    %cst_48 = arith.constant 5.000000e-01 : f32
    %78 = vector.broadcast %cst_48 : f32 to vector<32x32xf32>
    %79 = arith.mulf %78, %77 : vector<32x32xf32>
    %cst_49 = arith.constant 4.471500e-02 : f32
    %80 = vector.broadcast %cst_49 : f32 to vector<32x32xf32>
    %81 = arith.mulf %80, %77 : vector<32x32xf32>
    %82 = arith.mulf %81, %77 : vector<32x32xf32>
    %83 = arith.mulf %82, %77 : vector<32x32xf32>
    %84 = arith.addf %77, %83 : vector<32x32xf32>
    %cst_50 = arith.constant 0.797884583 : f32
    %85 = vector.broadcast %cst_50 : f32 to vector<32x32xf32>
    %86 = arith.mulf %85, %84 : vector<32x32xf32>
    %87 = math.tanh %86 : vector<32x32xf32>
    %cst_51 = arith.constant 1.000000e+00 : f32
    %88 = vector.broadcast %cst_51 : f32 to vector<32x32xf32>
    %89 = arith.addf %88, %87 : vector<32x32xf32>
    %90 = arith.mulf %79, %89 : vector<32x32xf32>
    %91 = arith.truncf %90 : vector<32x32xf32> to vector<32x32xbf16>
    %c2_52 = arith.constant 2 : index
    %c0_53 = arith.constant 0 : index
    %c0_54 = arith.constant 0 : index
    %92 = vector.load %arg6[%c2_52, %c0_53, %c0_54] : memref<8x16x32xbf16, #tpu.memory_space<vmem>>, vector<1x16x32xbf16>
    %93 = vector.shape_cast %92 : vector<1x16x32xbf16> to vector<16x32xbf16>
    %cst_55 = arith.constant dense<0.000000e+00> : vector<16x32xf32>
    %94 = tpu.matmul %93, %91, %cst_55 {dimension_numbers = #tpu.dot_dimension_numbers<[1], [0], [0], [1], [0, 0, 1, 1], [], []>} : vector<16x32xbf16>, vector<32x32xbf16>, vector<16x32xf32> -> vector<16x32xf32>
    %c2_56 = arith.constant 2 : index
    %c0_57 = arith.constant 0 : index
    %c0_58 = arith.constant 0 : index
    %95 = vector.load %arg7[%c2_56, %c0_57, %c0_58] : memref<8x16x1xf32, #tpu.memory_space<vmem>>, vector<1x16x1xf32>
    %96 = vector.shape_cast %95 : vector<1x16x1xf32> to vector<16x1xf32>
    %97 = vector.broadcast %96 : vector<16x1xf32> to vector<16x32xf32>
    %98 = arith.addf %94, %97 : vector<16x32xf32>
    %c32 = arith.constant 32 : index
    %c0_59 = arith.constant 0 : index
    %99 = vector.load %arg13[%c32, %c0_59] : memref<128x32xf32, #tpu.memory_space<vmem>>, vector<16x32xf32>
    tpu.vector_store %arg13[%c32, %c0_59], %98 {strides = array<i32>} : memref<128x32xf32, #tpu.memory_space<vmem>>, vector<16x32xf32>,
    %100 = vector.extract_strided_slice %6 {offsets = [48, 0], sizes = [16, 32], strides = [1, 1]} : vector<128x32xf32> to vector<16x32xf32>
    %101 = arith.truncf %100 : vector<16x32xf32> to vector<16x32xbf16>
    %c3 = arith.constant 3 : index
    %c0_60 = arith.constant 0 : index
    %c0_61 = arith.constant 0 : index
    %102 = vector.load %arg4[%c3, %c0_60, %c0_61] : memref<8x32x16xbf16, #tpu.memory_space<vmem>>, vector<1x32x16xbf16>
    %103 = vector.shape_cast %102 : vector<1x32x16xbf16> to vector<32x16xbf16>
    %cst_62 = arith.constant dense<0.000000e+00> : vector<32x32xf32>
    %104 = tpu.matmul %103, %101, %cst_62 {dimension_numbers = #tpu.dot_dimension_numbers<[1], [0], [0], [1], [0, 0, 1, 1], [], []>} : vector<32x16xbf16>, vector<16x32xbf16>, vector<32x32xf32> -> vector<32x32xf32>
    %c3_63 = arith.constant 3 : index
    %c0_64 = arith.constant 0 : index
    %c0_65 = arith.constant 0 : index
    %105 = vector.load %arg5[%c3_63, %c0_64, %c0_65] : memref<8x32x1xf32, #tpu.memory_space<vmem>>, vector<1x32x1xf32>
    %106 = vector.shape_cast %105 : vector<1x32x1xf32> to vector<32x1xf32>
    %107 = vector.broadcast %106 : vector<32x1xf32> to vector<32x32xf32>
    %108 = arith.addf %104, %107 : vector<32x32xf32>
    %cst_66 = arith.constant 5.000000e-01 : f32
    %109 = vector.broadcast %cst_66 : f32 to vector<32x32xf32>
    %110 = arith.mulf %109, %108 : vector<32x32xf32>
    %cst_67 = arith.constant 4.471500e-02 : f32
    %111 = vector.broadcast %cst_67 : f32 to vector<32x32xf32>
    %112 = arith.mulf %111, %108 : vector<32x32xf32>
    %113 = arith.mulf %112, %108 : vector<32x32xf32>
    %114 = arith.mulf %113, %108 : vector<32x32xf32>
    %115 = arith.addf %108, %114 : vector<32x32xf32>
    %cst_68 = arith.constant 0.797884583 : f32
    %116 = vector.broadcast %cst_68 : f32 to vector<32x32xf32>
    %117 = arith.mulf %116, %115 : vector<32x32xf32>
    %118 = math.tanh %117 : vector<32x32xf32>
    %cst_69 = arith.constant 1.000000e+00 : f32
    %119 = vector.broadcast %cst_69 : f32 to vector<32x32xf32>
    %120 = arith.addf %119, %118 : vector<32x32xf32>
    %121 = arith.mulf %110, %120 : vector<32x32xf32>
    %122 = arith.truncf %121 : vector<32x32xf32> to vector<32x32xbf16>
    %c3_70 = arith.constant 3 : index
    %c0_71 = arith.constant 0 : index
    %c0_72 = arith.constant 0 : index
    %123 = vector.load %arg6[%c3_70, %c0_71, %c0_72] : memref<8x16x32xbf16, #tpu.memory_space<vmem>>, vector<1x16x32xbf16>
    %124 = vector.shape_cast %123 : vector<1x16x32xbf16> to vector<16x32xbf16>
    %cst_73 = arith.constant dense<0.000000e+00> : vector<16x32xf32>
    %125 = tpu.matmul %124, %122, %cst_73 {dimension_numbers = #tpu.dot_dimension_numbers<[1], [0], [0], [1], [0, 0, 1, 1], [], []>} : vector<16x32xbf16>, vector<32x32xbf16>, vector<16x32xf32> -> vector<16x32xf32>
    %c3_74 = arith.constant 3 : index
    %c0_75 = arith.constant 0 : index
    %c0_76 = arith.constant 0 : index
    %126 = vector.load %arg7[%c3_74, %c0_75, %c0_76] : memref<8x16x1xf32, #tpu.memory_space<vmem>>, vector<1x16x1xf32>
    %127 = vector.shape_cast %126 : vector<1x16x1xf32> to vector<16x1xf32>
    %128 = vector.broadcast %127 : vector<16x1xf32> to vector<16x32xf32>
    %129 = arith.addf %125, %128 : vector<16x32xf32>
    %c48 = arith.constant 48 : index
    %c0_77 = arith.constant 0 : index
    %130 = vector.load %arg13[%c48, %c0_77] : memref<128x32xf32, #tpu.memory_space<vmem>>, vector<16x32xf32>
    tpu.vector_store %arg13[%c48, %c0_77], %129 {strides = array<i32>} : memref<128x32xf32, #tpu.memory_space<vmem>>, vector<16x32xf32>,
    %131 = vector.extract_strided_slice %6 {offsets = [64, 0], sizes = [16, 32], strides = [1, 1]} : vector<128x32xf32> to vector<16x32xf32>
    %132 = arith.truncf %131 : vector<16x32xf32> to vector<16x32xbf16>
    %c4 = arith.constant 4 : index
    %c0_78 = arith.constant 0 : index
    %c0_79 = arith.constant 0 : index
    %133 = vector.load %arg4[%c4, %c0_78, %c0_79] : memref<8x32x16xbf16, #tpu.memory_space<vmem>>, vector<1x32x16xbf16>
    %134 = vector.shape_cast %133 : vector<1x32x16xbf16> to vector<32x16xbf16>
    %cst_80 = arith.constant dense<0.000000e+00> : vector<32x32xf32>
    %135 = tpu.matmul %134, %132, %cst_80 {dimension_numbers = #tpu.dot_dimension_numbers<[1], [0], [0], [1], [0, 0, 1, 1], [], []>} : vector<32x16xbf16>, vector<16x32xbf16>, vector<32x32xf32> -> vector<32x32xf32>
    %c4_81 = arith.constant 4 : index
    %c0_82 = arith.constant 0 : index
    %c0_83 = arith.constant 0 : index
    %136 = vector.load %arg5[%c4_81, %c0_82, %c0_83] : memref<8x32x1xf32, #tpu.memory_space<vmem>>, vector<1x32x1xf32>
    %137 = vector.shape_cast %136 : vector<1x32x1xf32> to vector<32x1xf32>
    %138 = vector.broadcast %137 : vector<32x1xf32> to vector<32x32xf32>
    %139 = arith.addf %135, %138 : vector<32x32xf32>
    %cst_84 = arith.constant 5.000000e-01 : f32
    %140 = vector.broadcast %cst_84 : f32 to vector<32x32xf32>
    %141 = arith.mulf %140, %139 : vector<32x32xf32>
    %cst_85 = arith.constant 4.471500e-02 : f32
    %142 = vector.broadcast %cst_85 : f32 to vector<32x32xf32>
    %143 = arith.mulf %142, %139 : vector<32x32xf32>
    %144 = arith.mulf %143, %139 : vector<32x32xf32>
    %145 = arith.mulf %144, %139 : vector<32x32xf32>
    %146 = arith.addf %139, %145 : vector<32x32xf32>
    %cst_86 = arith.constant 0.797884583 : f32
    %147 = vector.broadcast %cst_86 : f32 to vector<32x32xf32>
    %148 = arith.mulf %147, %146 : vector<32x32xf32>
    %149 = math.tanh %148 : vector<32x32xf32>
    %cst_87 = arith.constant 1.000000e+00 : f32
    %150 = vector.broadcast %cst_87 : f32 to vector<32x32xf32>
    %151 = arith.addf %150, %149 : vector<32x32xf32>
    %152 = arith.mulf %141, %151 : vector<32x32xf32>
    %153 = arith.truncf %152 : vector<32x32xf32> to vector<32x32xbf16>
    %c4_88 = arith.constant 4 : index
    %c0_89 = arith.constant 0 : index
    %c0_90 = arith.constant 0 : index
    %154 = vector.load %arg6[%c4_88, %c0_89, %c0_90] : memref<8x16x32xbf16, #tpu.memory_space<vmem>>, vector<1x16x32xbf16>
    %155 = vector.shape_cast %154 : vector<1x16x32xbf16> to vector<16x32xbf16>
    %cst_91 = arith.constant dense<0.000000e+00> : vector<16x32xf32>
    %156 = tpu.matmul %155, %153, %cst_91 {dimension_numbers = #tpu.dot_dimension_numbers<[1], [0], [0], [1], [0, 0, 1, 1], [], []>} : vector<16x32xbf16>, vector<32x32xbf16>, vector<16x32xf32> -> vector<16x32xf32>
    %c4_92 = arith.constant 4 : index
    %c0_93 = arith.constant 0 : index
    %c0_94 = arith.constant 0 : index
    %157 = vector.load %arg7[%c4_92, %c0_93, %c0_94] : memref<8x16x1xf32, #tpu.memory_space<vmem>>, vector<1x16x1xf32>
    %158 = vector.shape_cast %157 : vector<1x16x1xf32> to vector<16x1xf32>
    %159 = vector.broadcast %158 : vector<16x1xf32> to vector<16x32xf32>
    %160 = arith.addf %156, %159 : vector<16x32xf32>
    %c64 = arith.constant 64 : index
    %c0_95 = arith.constant 0 : index
    %161 = vector.load %arg13[%c64, %c0_95] : memref<128x32xf32, #tpu.memory_space<vmem>>, vector<16x32xf32>
    tpu.vector_store %arg13[%c64, %c0_95], %160 {strides = array<i32>} : memref<128x32xf32, #tpu.memory_space<vmem>>, vector<16x32xf32>,
    %162 = vector.extract_strided_slice %6 {offsets = [80, 0], sizes = [16, 32], strides = [1, 1]} : vector<128x32xf32> to vector<16x32xf32>
    %163 = arith.truncf %162 : vector<16x32xf32> to vector<16x32xbf16>
    %c5 = arith.constant 5 : index
    %c0_96 = arith.constant 0 : index
    %c0_97 = arith.constant 0 : index
    %164 = vector.load %arg4[%c5, %c0_96, %c0_97] : memref<8x32x16xbf16, #tpu.memory_space<vmem>>, vector<1x32x16xbf16>
    %165 = vector.shape_cast %164 : vector<1x32x16xbf16> to vector<32x16xbf16>
    %cst_98 = arith.constant dense<0.000000e+00> : vector<32x32xf32>
    %166 = tpu.matmul %165, %163, %cst_98 {dimension_numbers = #tpu.dot_dimension_numbers<[1], [0], [0], [1], [0, 0, 1, 1], [], []>} : vector<32x16xbf16>, vector<16x32xbf16>, vector<32x32xf32> -> vector<32x32xf32>
    %c5_99 = arith.constant 5 : index
    %c0_100 = arith.constant 0 : index
    %c0_101 = arith.constant 0 : index
    %167 = vector.load %arg5[%c5_99, %c0_100, %c0_101] : memref<8x32x1xf32, #tpu.memory_space<vmem>>, vector<1x32x1xf32>
    %168 = vector.shape_cast %167 : vector<1x32x1xf32> to vector<32x1xf32>
    %169 = vector.broadcast %168 : vector<32x1xf32> to vector<32x32xf32>
    %170 = arith.addf %166, %169 : vector<32x32xf32>
    %cst_102 = arith.constant 5.000000e-01 : f32
    %171 = vector.broadcast %cst_102 : f32 to vector<32x32xf32>
    %172 = arith.mulf %171, %170 : vector<32x32xf32>
    %cst_103 = arith.constant 4.471500e-02 : f32
    %173 = vector.broadcast %cst_103 : f32 to vector<32x32xf32>
    %174 = arith.mulf %173, %170 : vector<32x32xf32>
    %175 = arith.mulf %174, %170 : vector<32x32xf32>
    %176 = arith.mulf %175, %170 : vector<32x32xf32>
    %177 = arith.addf %170, %176 : vector<32x32xf32>
    %cst_104 = arith.constant 0.797884583 : f32
    %178 = vector.broadcast %cst_104 : f32 to vector<32x32xf32>
    %179 = arith.mulf %178, %177 : vector<32x32xf32>
    %180 = math.tanh %179 : vector<32x32xf32>
    %cst_105 = arith.constant 1.000000e+00 : f32
    %181 = vector.broadcast %cst_105 : f32 to vector<32x32xf32>
    %182 = arith.addf %181, %180 : vector<32x32xf32>
    %183 = arith.mulf %172, %182 : vector<32x32xf32>
    %184 = arith.truncf %183 : vector<32x32xf32> to vector<32x32xbf16>
    %c5_106 = arith.constant 5 : index
    %c0_107 = arith.constant 0 : index
    %c0_108 = arith.constant 0 : index
    %185 = vector.load %arg6[%c5_106, %c0_107, %c0_108] : memref<8x16x32xbf16, #tpu.memory_space<vmem>>, vector<1x16x32xbf16>
    %186 = vector.shape_cast %185 : vector<1x16x32xbf16> to vector<16x32xbf16>
    %cst_109 = arith.constant dense<0.000000e+00> : vector<16x32xf32>
    %187 = tpu.matmul %186, %184, %cst_109 {dimension_numbers = #tpu.dot_dimension_numbers<[1], [0], [0], [1], [0, 0, 1, 1], [], []>} : vector<16x32xbf16>, vector<32x32xbf16>, vector<16x32xf32> -> vector<16x32xf32>
    %c5_110 = arith.constant 5 : index
    %c0_111 = arith.constant 0 : index
    %c0_112 = arith.constant 0 : index
    %188 = vector.load %arg7[%c5_110, %c0_111, %c0_112] : memref<8x16x1xf32, #tpu.memory_space<vmem>>, vector<1x16x1xf32>
    %189 = vector.shape_cast %188 : vector<1x16x1xf32> to vector<16x1xf32>
    %190 = vector.broadcast %189 : vector<16x1xf32> to vector<16x32xf32>
    %191 = arith.addf %187, %190 : vector<16x32xf32>
    %c80 = arith.constant 80 : index
    %c0_113 = arith.constant 0 : index
    %192 = vector.load %arg13[%c80, %c0_113] : memref<128x32xf32, #tpu.memory_space<vmem>>, vector<16x32xf32>
    tpu.vector_store %arg13[%c80, %c0_113], %191 {strides = array<i32>} : memref<128x32xf32, #tpu.memory_space<vmem>>, vector<16x32xf32>,
    %193 = vector.extract_strided_slice %6 {offsets = [96, 0], sizes = [16, 32], strides = [1, 1]} : vector<128x32xf32> to vector<16x32xf32>
    %194 = arith.truncf %193 : vector<16x32xf32> to vector<16x32xbf16>
    %c6 = arith.constant 6 : index
    %c0_114 = arith.constant 0 : index
    %c0_115 = arith.constant 0 : index
    %195 = vector.load %arg4[%c6, %c0_114, %c0_115] : memref<8x32x16xbf16, #tpu.memory_space<vmem>>, vector<1x32x16xbf16>
    %196 = vector.shape_cast %195 : vector<1x32x16xbf16> to vector<32x16xbf16>
    %cst_116 = arith.constant dense<0.000000e+00> : vector<32x32xf32>
    %197 = tpu.matmul %196, %194, %cst_116 {dimension_numbers = #tpu.dot_dimension_numbers<[1], [0], [0], [1], [0, 0, 1, 1], [], []>} : vector<32x16xbf16>, vector<16x32xbf16>, vector<32x32xf32> -> vector<32x32xf32>
    %c6_117 = arith.constant 6 : index
    %c0_118 = arith.constant 0 : index
    %c0_119 = arith.constant 0 : index
    %198 = vector.load %arg5[%c6_117, %c0_118, %c0_119] : memref<8x32x1xf32, #tpu.memory_space<vmem>>, vector<1x32x1xf32>
    %199 = vector.shape_cast %198 : vector<1x32x1xf32> to vector<32x1xf32>
    %200 = vector.broadcast %199 : vector<32x1xf32> to vector<32x32xf32>
    %201 = arith.addf %197, %200 : vector<32x32xf32>
    %cst_120 = arith.constant 5.000000e-01 : f32
    %202 = vector.broadcast %cst_120 : f32 to vector<32x32xf32>
    %203 = arith.mulf %202, %201 : vector<32x32xf32>
    %cst_121 = arith.constant 4.471500e-02 : f32
    %204 = vector.broadcast %cst_121 : f32 to vector<32x32xf32>
    %205 = arith.mulf %204, %201 : vector<32x32xf32>
    %206 = arith.mulf %205, %201 : vector<32x32xf32>
    %207 = arith.mulf %206, %201 : vector<32x32xf32>
    %208 = arith.addf %201, %207 : vector<32x32xf32>
    %cst_122 = arith.constant 0.797884583 : f32
    %209 = vector.broadcast %cst_122 : f32 to vector<32x32xf32>
    %210 = arith.mulf %209, %208 : vector<32x32xf32>
    %211 = math.tanh %210 : vector<32x32xf32>
    %cst_123 = arith.constant 1.000000e+00 : f32
    %212 = vector.broadcast %cst_123 : f32 to vector<32x32xf32>
    %213 = arith.addf %212, %211 : vector<32x32xf32>
    %214 = arith.mulf %203, %213 : vector<32x32xf32>
    %215 = arith.truncf %214 : vector<32x32xf32> to vector<32x32xbf16>
    %c6_124 = arith.constant 6 : index
    %c0_125 = arith.constant 0 : index
    %c0_126 = arith.constant 0 : index
    %216 = vector.load %arg6[%c6_124, %c0_125, %c0_126] : memref<8x16x32xbf16, #tpu.memory_space<vmem>>, vector<1x16x32xbf16>
    %217 = vector.shape_cast %216 : vector<1x16x32xbf16> to vector<16x32xbf16>
    %cst_127 = arith.constant dense<0.000000e+00> : vector<16x32xf32>
    %218 = tpu.matmul %217, %215, %cst_127 {dimension_numbers = #tpu.dot_dimension_numbers<[1], [0], [0], [1], [0, 0, 1, 1], [], []>} : vector<16x32xbf16>, vector<32x32xbf16>, vector<16x32xf32> -> vector<16x32xf32>
    %c6_128 = arith.constant 6 : index
    %c0_129 = arith.constant 0 : index
    %c0_130 = arith.constant 0 : index
    %219 = vector.load %arg7[%c6_128, %c0_129, %c0_130] : memref<8x16x1xf32, #tpu.memory_space<vmem>>, vector<1x16x1xf32>
    %220 = vector.shape_cast %219 : vector<1x16x1xf32> to vector<16x1xf32>
    %221 = vector.broadcast %220 : vector<16x1xf32> to vector<16x32xf32>
    %222 = arith.addf %218, %221 : vector<16x32xf32>
    %c96 = arith.constant 96 : index
    %c0_131 = arith.constant 0 : index
    %223 = vector.load %arg13[%c96, %c0_131] : memref<128x32xf32, #tpu.memory_space<vmem>>, vector<16x32xf32>
    tpu.vector_store %arg13[%c96, %c0_131], %222 {strides = array<i32>} : memref<128x32xf32, #tpu.memory_space<vmem>>, vector<16x32xf32>,
    %224 = vector.extract_strided_slice %6 {offsets = [112, 0], sizes = [16, 32], strides = [1, 1]} : vector<128x32xf32> to vector<16x32xf32>
    %225 = arith.truncf %224 : vector<16x32xf32> to vector<16x32xbf16>
    %c7 = arith.constant 7 : index
    %c0_132 = arith.constant 0 : index
    %c0_133 = arith.constant 0 : index
    %226 = vector.load %arg4[%c7, %c0_132, %c0_133] : memref<8x32x16xbf16, #tpu.memory_space<vmem>>, vector<1x32x16xbf16>
    %227 = vector.shape_cast %226 : vector<1x32x16xbf16> to vector<32x16xbf16>
    %cst_134 = arith.constant dense<0.000000e+00> : vector<32x32xf32>
    %228 = tpu.matmul %227, %225, %cst_134 {dimension_numbers = #tpu.dot_dimension_numbers<[1], [0], [0], [1], [0, 0, 1, 1], [], []>} : vector<32x16xbf16>, vector<16x32xbf16>, vector<32x32xf32> -> vector<32x32xf32>
    %c7_135 = arith.constant 7 : index
    %c0_136 = arith.constant 0 : index
    %c0_137 = arith.constant 0 : index
    %229 = vector.load %arg5[%c7_135, %c0_136, %c0_137] : memref<8x32x1xf32, #tpu.memory_space<vmem>>, vector<1x32x1xf32>
    %230 = vector.shape_cast %229 : vector<1x32x1xf32> to vector<32x1xf32>
    %231 = vector.broadcast %230 : vector<32x1xf32> to vector<32x32xf32>
    %232 = arith.addf %228, %231 : vector<32x32xf32>
    %cst_138 = arith.constant 5.000000e-01 : f32
    %233 = vector.broadcast %cst_138 : f32 to vector<32x32xf32>
    %234 = arith.mulf %233, %232 : vector<32x32xf32>
    %cst_139 = arith.constant 4.471500e-02 : f32
    %235 = vector.broadcast %cst_139 : f32 to vector<32x32xf32>
    %236 = arith.mulf %235, %232 : vector<32x32xf32>
    %237 = arith.mulf %236, %232 : vector<32x32xf32>
    %238 = arith.mulf %237, %232 : vector<32x32xf32>
    %239 = arith.addf %232, %238 : vector<32x32xf32>
    %cst_140 = arith.constant 0.797884583 : f32
    %240 = vector.broadcast %cst_140 : f32 to vector<32x32xf32>
    %241 = arith.mulf %240, %239 : vector<32x32xf32>
    %242 = math.tanh %241 : vector<32x32xf32>
    %cst_141 = arith.constant 1.000000e+00 : f32
    %243 = vector.broadcast %cst_141 : f32 to vector<32x32xf32>
    %244 = arith.addf %243, %242 : vector<32x32xf32>
    %245 = arith.mulf %234, %244 : vector<32x32xf32>
    %246 = arith.truncf %245 : vector<32x32xf32> to vector<32x32xbf16>
    %c7_142 = arith.constant 7 : index
    %c0_143 = arith.constant 0 : index
    %c0_144 = arith.constant 0 : index
    %247 = vector.load %arg6[%c7_142, %c0_143, %c0_144] : memref<8x16x32xbf16, #tpu.memory_space<vmem>>, vector<1x16x32xbf16>
    %248 = vector.shape_cast %247 : vector<1x16x32xbf16> to vector<16x32xbf16>
    %cst_145 = arith.constant dense<0.000000e+00> : vector<16x32xf32>
    %249 = tpu.matmul %248, %246, %cst_145 {dimension_numbers = #tpu.dot_dimension_numbers<[1], [0], [0], [1], [0, 0, 1, 1], [], []>} : vector<16x32xbf16>, vector<32x32xbf16>, vector<16x32xf32> -> vector<16x32xf32>
    %c7_146 = arith.constant 7 : index
    %c0_147 = arith.constant 0 : index
    %c0_148 = arith.constant 0 : index
    %250 = vector.load %arg7[%c7_146, %c0_147, %c0_148] : memref<8x16x1xf32, #tpu.memory_space<vmem>>, vector<1x16x1xf32>
    %251 = vector.shape_cast %250 : vector<1x16x1xf32> to vector<16x1xf32>
    %252 = vector.broadcast %251 : vector<16x1xf32> to vector<16x32xf32>
    %253 = arith.addf %249, %252 : vector<16x32xf32>
    %c112 = arith.constant 112 : index
    %c0_149 = arith.constant 0 : index
    %254 = vector.load %arg13[%c112, %c0_149] : memref<128x32xf32, #tpu.memory_space<vmem>>, vector<16x32xf32>
    tpu.vector_store %arg13[%c112, %c0_149], %253 {strides = array<i32>} : memref<128x32xf32, #tpu.memory_space<vmem>>, vector<16x32xf32>,
    %c0_150 = arith.constant 0 : index
    %c0_151 = arith.constant 0 : index
    %255 = tpu.strided_load %arg13[%c0_150, %c0_151] {strides = array<i32: 16, 1>} : memref<128x32xf32, #tpu.memory_space<vmem>>, vector<8x32xf32>
    %256 = arith.truncf %255 : vector<8x32xf32> to vector<8x32xbf16>
    %c0_152 = arith.constant 0 : index
    %c0_153 = arith.constant 0 : index
    %c0_154 = arith.constant 0 : index
    %257 = vector.load %arg8[%c0_152, %c0_153, %c0_154] : memref<16x16x8xbf16, #tpu.memory_space<vmem>>, vector<1x16x8xbf16>
    %258 = vector.shape_cast %257 : vector<1x16x8xbf16> to vector<16x8xbf16>
    %cst_155 = arith.constant dense<0.000000e+00> : vector<16x32xf32>
    %259 = tpu.matmul %258, %256, %cst_155 {dimension_numbers = #tpu.dot_dimension_numbers<[1], [0], [0], [1], [0, 0, 1, 1], [], []>} : vector<16x8xbf16>, vector<8x32xbf16>, vector<16x32xf32> -> vector<16x32xf32>
    %c0_156 = arith.constant 0 : index
    %c0_157 = arith.constant 0 : index
    %c0_158 = arith.constant 0 : index
    %260 = vector.load %arg9[%c0_156, %c0_157, %c0_158] : memref<16x16x1xf32, #tpu.memory_space<vmem>>, vector<1x16x1xf32>
    %261 = vector.shape_cast %260 : vector<1x16x1xf32> to vector<16x1xf32>
    %262 = vector.broadcast %261 : vector<16x1xf32> to vector<16x32xf32>
    %263 = arith.addf %259, %262 : vector<16x32xf32>
    %cst_159 = arith.constant 5.000000e-01 : f32
    %264 = vector.broadcast %cst_159 : f32 to vector<16x32xf32>
    %265 = arith.mulf %264, %263 : vector<16x32xf32>
    %cst_160 = arith.constant 4.471500e-02 : f32
    %266 = vector.broadcast %cst_160 : f32 to vector<16x32xf32>
    %267 = arith.mulf %266, %263 : vector<16x32xf32>
    %268 = arith.mulf %267, %263 : vector<16x32xf32>
    %269 = arith.mulf %268, %263 : vector<16x32xf32>
    %270 = arith.addf %263, %269 : vector<16x32xf32>
    %cst_161 = arith.constant 0.797884583 : f32
    %271 = vector.broadcast %cst_161 : f32 to vector<16x32xf32>
    %272 = arith.mulf %271, %270 : vector<16x32xf32>
    %273 = math.tanh %272 : vector<16x32xf32>
    %cst_162 = arith.constant 1.000000e+00 : f32
    %274 = vector.broadcast %cst_162 : f32 to vector<16x32xf32>
    %275 = arith.addf %274, %273 : vector<16x32xf32>
    %276 = arith.mulf %265, %275 : vector<16x32xf32>
    %277 = arith.truncf %276 : vector<16x32xf32> to vector<16x32xbf16>
    %c0_163 = arith.constant 0 : index
    %c0_164 = arith.constant 0 : index
    %c0_165 = arith.constant 0 : index
    %278 = vector.load %arg10[%c0_163, %c0_164, %c0_165] : memref<16x8x16xbf16, #tpu.memory_space<vmem>>, vector<1x8x16xbf16>
    %279 = vector.shape_cast %278 : vector<1x8x16xbf16> to vector<8x16xbf16>
    %cst_166 = arith.constant dense<0.000000e+00> : vector<8x32xf32>
    %280 = tpu.matmul %279, %277, %cst_166 {dimension_numbers = #tpu.dot_dimension_numbers<[1], [0], [0], [1], [0, 0, 1, 1], [], []>} : vector<8x16xbf16>, vector<16x32xbf16>, vector<8x32xf32> -> vector<8x32xf32>
    %c0_167 = arith.constant 0 : index
    %c0_168 = arith.constant 0 : index
    %c0_169 = arith.constant 0 : index
    %281 = vector.load %arg11[%c0_167, %c0_168, %c0_169] : memref<16x8x1xf32, #tpu.memory_space<vmem>>, vector<1x8x1xf32>
    %282 = vector.shape_cast %281 : vector<1x8x1xf32> to vector<8x1xf32>
    %283 = vector.broadcast %282 : vector<8x1xf32> to vector<8x32xf32>
    %284 = arith.addf %280, %283 : vector<8x32xf32>
    %c0_170 = arith.constant 0 : index
    %c0_171 = arith.constant 0 : index
    %c0_172 = arith.constant 0 : index
    %285 = vector.load %arg12[%c0_170, %c0_171, %c0_172] : memref<16x8x32xf32, #tpu.memory_space<vmem>>, vector<1x8x32xf32>
    %286 = vector.shape_cast %285 : vector<1x8x32xf32> to vector<8x32xf32>
    %287 = vector.shape_cast %284 : vector<8x32xf32> to vector<1x8x32xf32>
    tpu.vector_store %arg12[%c0_170, %c0_171, %c0_172], %287 {strides = array<i32>} : memref<16x8x32xf32, #tpu.memory_space<vmem>>, vector<1x8x32xf32>,
    %c1_173 = arith.constant 1 : index
    %c0_174 = arith.constant 0 : index
    %288 = tpu.strided_load %arg13[%c1_173, %c0_174] {strides = array<i32: 16, 1>} : memref<128x32xf32, #tpu.memory_space<vmem>>, vector<8x32xf32>
    %289 = arith.truncf %288 : vector<8x32xf32> to vector<8x32xbf16>
    %c1_175 = arith.constant 1 : index
    %c0_176 = arith.constant 0 : index
    %c0_177 = arith.constant 0 : index
    %290 = vector.load %arg8[%c1_175, %c0_176, %c0_177] : memref<16x16x8xbf16, #tpu.memory_space<vmem>>, vector<1x16x8xbf16>
    %291 = vector.shape_cast %290 : vector<1x16x8xbf16> to vector<16x8xbf16>
    %cst_178 = arith.constant dense<0.000000e+00> : vector<16x32xf32>
    %292 = tpu.matmul %291, %289, %cst_178 {dimension_numbers = #tpu.dot_dimension_numbers<[1], [0], [0], [1], [0, 0, 1, 1], [], []>} : vector<16x8xbf16>, vector<8x32xbf16>, vector<16x32xf32> -> vector<16x32xf32>
    %c1_179 = arith.constant 1 : index
    %c0_180 = arith.constant 0 : index
    %c0_181 = arith.constant 0 : index
    %293 = vector.load %arg9[%c1_179, %c0_180, %c0_181] : memref<16x16x1xf32, #tpu.memory_space<vmem>>, vector<1x16x1xf32>
    %294 = vector.shape_cast %293 : vector<1x16x1xf32> to vector<16x1xf32>
    %295 = vector.broadcast %294 : vector<16x1xf32> to vector<16x32xf32>
    %296 = arith.addf %292, %295 : vector<16x32xf32>
    %cst_182 = arith.constant 5.000000e-01 : f32
    %297 = vector.broadcast %cst_182 : f32 to vector<16x32xf32>
    %298 = arith.mulf %297, %296 : vector<16x32xf32>
    %cst_183 = arith.constant 4.471500e-02 : f32
    %299 = vector.broadcast %cst_183 : f32 to vector<16x32xf32>
    %300 = arith.mulf %299, %296 : vector<16x32xf32>
    %301 = arith.mulf %300, %296 : vector<16x32xf32>
    %302 = arith.mulf %301, %296 : vector<16x32xf32>
    %303 = arith.addf %296, %302 : vector<16x32xf32>
    %cst_184 = arith.constant 0.797884583 : f32
    %304 = vector.broadcast %cst_184 : f32 to vector<16x32xf32>
    %305 = arith.mulf %304, %303 : vector<16x32xf32>
    %306 = math.tanh %305 : vector<16x32xf32>
    %cst_185 = arith.constant 1.000000e+00 : f32
    %307 = vector.broadcast %cst_185 : f32 to vector<16x32xf32>
    %308 = arith.addf %307, %306 : vector<16x32xf32>
    %309 = arith.mulf %298, %308 : vector<16x32xf32>
    %310 = arith.truncf %309 : vector<16x32xf32> to vector<16x32xbf16>
    %c1_186 = arith.constant 1 : index
    %c0_187 = arith.constant 0 : index
    %c0_188 = arith.constant 0 : index
    %311 = vector.load %arg10[%c1_186, %c0_187, %c0_188] : memref<16x8x16xbf16, #tpu.memory_space<vmem>>, vector<1x8x16xbf16>
    %312 = vector.shape_cast %311 : vector<1x8x16xbf16> to vector<8x16xbf16>
    %cst_189 = arith.constant dense<0.000000e+00> : vector<8x32xf32>
    %313 = tpu.matmul %312, %310, %cst_189 {dimension_numbers = #tpu.dot_dimension_numbers<[1], [0], [0], [1], [0, 0, 1, 1], [], []>} : vector<8x16xbf16>, vector<16x32xbf16>, vector<8x32xf32> -> vector<8x32xf32>
    %c1_190 = arith.constant 1 : index
    %c0_191 = arith.constant 0 : index
    %c0_192 = arith.constant 0 : index
    %314 = vector.load %arg11[%c1_190, %c0_191, %c0_192] : memref<16x8x1xf32, #tpu.memory_space<vmem>>, vector<1x8x1xf32>
    %315 = vector.shape_cast %314 : vector<1x8x1xf32> to vector<8x1xf32>
    %316 = vector.broadcast %315 : vector<8x1xf32> to vector<8x32xf32>
    %317 = arith.addf %313, %316 : vector<8x32xf32>
    %c1_193 = arith.constant 1 : index
    %c0_194 = arith.constant 0 : index
    %c0_195 = arith.constant 0 : index
    %318 = vector.load %arg12[%c1_193, %c0_194, %c0_195] : memref<16x8x32xf32, #tpu.memory_space<vmem>>, vector<1x8x32xf32>
    %319 = vector.shape_cast %318 : vector<1x8x32xf32> to vector<8x32xf32>
    %320 = vector.shape_cast %317 : vector<8x32xf32> to vector<1x8x32xf32>
    tpu.vector_store %arg12[%c1_193, %c0_194, %c0_195], %320 {strides = array<i32>} : memref<16x8x32xf32, #tpu.memory_space<vmem>>, vector<1x8x32xf32>,
    %c2_196 = arith.constant 2 : index
    %c0_197 = arith.constant 0 : index
    %321 = tpu.strided_load %arg13[%c2_196, %c0_197] {strides = array<i32: 16, 1>} : memref<128x32xf32, #tpu.memory_space<vmem>>, vector<8x32xf32>
    %322 = arith.truncf %321 : vector<8x32xf32> to vector<8x32xbf16>
    %c2_198 = arith.constant 2 : index
    %c0_199 = arith.constant 0 : index
    %c0_200 = arith.constant 0 : index
    %323 = vector.load %arg8[%c2_198, %c0_199, %c0_200] : memref<16x16x8xbf16, #tpu.memory_space<vmem>>, vector<1x16x8xbf16>
    %324 = vector.shape_cast %323 : vector<1x16x8xbf16> to vector<16x8xbf16>
    %cst_201 = arith.constant dense<0.000000e+00> : vector<16x32xf32>
    %325 = tpu.matmul %324, %322, %cst_201 {dimension_numbers = #tpu.dot_dimension_numbers<[1], [0], [0], [1], [0, 0, 1, 1], [], []>} : vector<16x8xbf16>, vector<8x32xbf16>, vector<16x32xf32> -> vector<16x32xf32>
    %c2_202 = arith.constant 2 : index
    %c0_203 = arith.constant 0 : index
    %c0_204 = arith.constant 0 : index
    %326 = vector.load %arg9[%c2_202, %c0_203, %c0_204] : memref<16x16x1xf32, #tpu.memory_space<vmem>>, vector<1x16x1xf32>
    %327 = vector.shape_cast %326 : vector<1x16x1xf32> to vector<16x1xf32>
    %328 = vector.broadcast %327 : vector<16x1xf32> to vector<16x32xf32>
    %329 = arith.addf %325, %328 : vector<16x32xf32>
    %cst_205 = arith.constant 5.000000e-01 : f32
    %330 = vector.broadcast %cst_205 : f32 to vector<16x32xf32>
    %331 = arith.mulf %330, %329 : vector<16x32xf32>
    %cst_206 = arith.constant 4.471500e-02 : f32
    %332 = vector.broadcast %cst_206 : f32 to vector<16x32xf32>
    %333 = arith.mulf %332, %329 : vector<16x32xf32>
    %334 = arith.mulf %333, %329 : vector<16x32xf32>
    %335 = arith.mulf %334, %329 : vector<16x32xf32>
    %336 = arith.addf %329, %335 : vector<16x32xf32>
    %cst_207 = arith.constant 0.797884583 : f32
    %337 = vector.broadcast %cst_207 : f32 to vector<16x32xf32>
    %338 = arith.mulf %337, %336 : vector<16x32xf32>
    %339 = math.tanh %338 : vector<16x32xf32>
    %cst_208 = arith.constant 1.000000e+00 : f32
    %340 = vector.broadcast %cst_208 : f32 to vector<16x32xf32>
    %341 = arith.addf %340, %339 : vector<16x32xf32>
    %342 = arith.mulf %331, %341 : vector<16x32xf32>
    %343 = arith.truncf %342 : vector<16x32xf32> to vector<16x32xbf16>
    %c2_209 = arith.constant 2 : index
    %c0_210 = arith.constant 0 : index
    %c0_211 = arith.constant 0 : index
    %344 = vector.load %arg10[%c2_209, %c0_210, %c0_211] : memref<16x8x16xbf16, #tpu.memory_space<vmem>>, vector<1x8x16xbf16>
    %345 = vector.shape_cast %344 : vector<1x8x16xbf16> to vector<8x16xbf16>
    %cst_212 = arith.constant dense<0.000000e+00> : vector<8x32xf32>
    %346 = tpu.matmul %345, %343, %cst_212 {dimension_numbers = #tpu.dot_dimension_numbers<[1], [0], [0], [1], [0, 0, 1, 1], [], []>} : vector<8x16xbf16>, vector<16x32xbf16>, vector<8x32xf32> -> vector<8x32xf32>
    %c2_213 = arith.constant 2 : index
    %c0_214 = arith.constant 0 : index
    %c0_215 = arith.constant 0 : index
    %347 = vector.load %arg11[%c2_213, %c0_214, %c0_215] : memref<16x8x1xf32, #tpu.memory_space<vmem>>, vector<1x8x1xf32>
    %348 = vector.shape_cast %347 : vector<1x8x1xf32> to vector<8x1xf32>
    %349 = vector.broadcast %348 : vector<8x1xf32> to vector<8x32xf32>
    %350 = arith.addf %346, %349 : vector<8x32xf32>
    %c2_216 = arith.constant 2 : index
    %c0_217 = arith.constant 0 : index
    %c0_218 = arith.constant 0 : index
    %351 = vector.load %arg12[%c2_216, %c0_217, %c0_218] : memref<16x8x32xf32, #tpu.memory_space<vmem>>, vector<1x8x32xf32>
    %352 = vector.shape_cast %351 : vector<1x8x32xf32> to vector<8x32xf32>
    %353 = vector.shape_cast %350 : vector<8x32xf32> to vector<1x8x32xf32>
    tpu.vector_store %arg12[%c2_216, %c0_217, %c0_218], %353 {strides = array<i32>} : memref<16x8x32xf32, #tpu.memory_space<vmem>>, vector<1x8x32xf32>,
    %c3_219 = arith.constant 3 : index
    %c0_220 = arith.constant 0 : index
    %354 = tpu.strided_load %arg13[%c3_219, %c0_220] {strides = array<i32: 16, 1>} : memref<128x32xf32, #tpu.memory_space<vmem>>, vector<8x32xf32>
    %355 = arith.truncf %354 : vector<8x32xf32> to vector<8x32xbf16>
    %c3_221 = arith.constant 3 : index
    %c0_222 = arith.constant 0 : index
    %c0_223 = arith.constant 0 : index
    %356 = vector.load %arg8[%c3_221, %c0_222, %c0_223] : memref<16x16x8xbf16, #tpu.memory_space<vmem>>, vector<1x16x8xbf16>
    %357 = vector.shape_cast %356 : vector<1x16x8xbf16> to vector<16x8xbf16>
    %cst_224 = arith.constant dense<0.000000e+00> : vector<16x32xf32>
    %358 = tpu.matmul %357, %355, %cst_224 {dimension_numbers = #tpu.dot_dimension_numbers<[1], [0], [0], [1], [0, 0, 1, 1], [], []>} : vector<16x8xbf16>, vector<8x32xbf16>, vector<16x32xf32> -> vector<16x32xf32>
    %c3_225 = arith.constant 3 : index
    %c0_226 = arith.constant 0 : index
    %c0_227 = arith.constant 0 : index
    %359 = vector.load %arg9[%c3_225, %c0_226, %c0_227] : memref<16x16x1xf32, #tpu.memory_space<vmem>>, vector<1x16x1xf32>
    %360 = vector.shape_cast %359 : vector<1x16x1xf32> to vector<16x1xf32>
    %361 = vector.broadcast %360 : vector<16x1xf32> to vector<16x32xf32>
    %362 = arith.addf %358, %361 : vector<16x32xf32>
    %cst_228 = arith.constant 5.000000e-01 : f32
    %363 = vector.broadcast %cst_228 : f32 to vector<16x32xf32>
    %364 = arith.mulf %363, %362 : vector<16x32xf32>
    %cst_229 = arith.constant 4.471500e-02 : f32
    %365 = vector.broadcast %cst_229 : f32 to vector<16x32xf32>
    %366 = arith.mulf %365, %362 : vector<16x32xf32>
    %367 = arith.mulf %366, %362 : vector<16x32xf32>
    %368 = arith.mulf %367, %362 : vector<16x32xf32>
    %369 = arith.addf %362, %368 : vector<16x32xf32>
    %cst_230 = arith.constant 0.797884583 : f32
    %370 = vector.broadcast %cst_230 : f32 to vector<16x32xf32>
    %371 = arith.mulf %370, %369 : vector<16x32xf32>
    %372 = math.tanh %371 : vector<16x32xf32>
    %cst_231 = arith.constant 1.000000e+00 : f32
    %373 = vector.broadcast %cst_231 : f32 to vector<16x32xf32>
    %374 = arith.addf %373, %372 : vector<16x32xf32>
    %375 = arith.mulf %364, %374 : vector<16x32xf32>
    %376 = arith.truncf %375 : vector<16x32xf32> to vector<16x32xbf16>
    %c3_232 = arith.constant 3 : index
    %c0_233 = arith.constant 0 : index
    %c0_234 = arith.constant 0 : index
    %377 = vector.load %arg10[%c3_232, %c0_233, %c0_234] : memref<16x8x16xbf16, #tpu.memory_space<vmem>>, vector<1x8x16xbf16>
    %378 = vector.shape_cast %377 : vector<1x8x16xbf16> to vector<8x16xbf16>
    %cst_235 = arith.constant dense<0.000000e+00> : vector<8x32xf32>
    %379 = tpu.matmul %378, %376, %cst_235 {dimension_numbers = #tpu.dot_dimension_numbers<[1], [0], [0], [1], [0, 0, 1, 1], [], []>} : vector<8x16xbf16>, vector<16x32xbf16>, vector<8x32xf32> -> vector<8x32xf32>
    %c3_236 = arith.constant 3 : index
    %c0_237 = arith.constant 0 : index
    %c0_238 = arith.constant 0 : index
    %380 = vector.load %arg11[%c3_236, %c0_237, %c0_238] : memref<16x8x1xf32, #tpu.memory_space<vmem>>, vector<1x8x1xf32>
    %381 = vector.shape_cast %380 : vector<1x8x1xf32> to vector<8x1xf32>
    %382 = vector.broadcast %381 : vector<8x1xf32> to vector<8x32xf32>
    %383 = arith.addf %379, %382 : vector<8x32xf32>
    %c3_239 = arith.constant 3 : index
    %c0_240 = arith.constant 0 : index
    %c0_241 = arith.constant 0 : index
    %384 = vector.load %arg12[%c3_239, %c0_240, %c0_241] : memref<16x8x32xf32, #tpu.memory_space<vmem>>, vector<1x8x32xf32>
    %385 = vector.shape_cast %384 : vector<1x8x32xf32> to vector<8x32xf32>
    %386 = vector.shape_cast %383 : vector<8x32xf32> to vector<1x8x32xf32>
    tpu.vector_store %arg12[%c3_239, %c0_240, %c0_241], %386 {strides = array<i32>} : memref<16x8x32xf32, #tpu.memory_space<vmem>>, vector<1x8x32xf32>,
    %c4_242 = arith.constant 4 : index
    %c0_243 = arith.constant 0 : index
    %387 = tpu.strided_load %arg13[%c4_242, %c0_243] {strides = array<i32: 16, 1>} : memref<128x32xf32, #tpu.memory_space<vmem>>, vector<8x32xf32>
    %388 = arith.truncf %387 : vector<8x32xf32> to vector<8x32xbf16>
    %c4_244 = arith.constant 4 : index
    %c0_245 = arith.constant 0 : index
    %c0_246 = arith.constant 0 : index
    %389 = vector.load %arg8[%c4_244, %c0_245, %c0_246] : memref<16x16x8xbf16, #tpu.memory_space<vmem>>, vector<1x16x8xbf16>
    %390 = vector.shape_cast %389 : vector<1x16x8xbf16> to vector<16x8xbf16>
    %cst_247 = arith.constant dense<0.000000e+00> : vector<16x32xf32>
    %391 = tpu.matmul %390, %388, %cst_247 {dimension_numbers = #tpu.dot_dimension_numbers<[1], [0], [0], [1], [0, 0, 1, 1], [], []>} : vector<16x8xbf16>, vector<8x32xbf16>, vector<16x32xf32> -> vector<16x32xf32>
    %c4_248 = arith.constant 4 : index
    %c0_249 = arith.constant 0 : index
    %c0_250 = arith.constant 0 : index
    %392 = vector.load %arg9[%c4_248, %c0_249, %c0_250] : memref<16x16x1xf32, #tpu.memory_space<vmem>>, vector<1x16x1xf32>
    %393 = vector.shape_cast %392 : vector<1x16x1xf32> to vector<16x1xf32>
    %394 = vector.broadcast %393 : vector<16x1xf32> to vector<16x32xf32>
    %395 = arith.addf %391, %394 : vector<16x32xf32>
    %cst_251 = arith.constant 5.000000e-01 : f32
    %396 = vector.broadcast %cst_251 : f32 to vector<16x32xf32>
    %397 = arith.mulf %396, %395 : vector<16x32xf32>
    %cst_252 = arith.constant 4.471500e-02 : f32
    %398 = vector.broadcast %cst_252 : f32 to vector<16x32xf32>
    %399 = arith.mulf %398, %395 : vector<16x32xf32>
    %400 = arith.mulf %399, %395 : vector<16x32xf32>
    %401 = arith.mulf %400, %395 : vector<16x32xf32>
    %402 = arith.addf %395, %401 : vector<16x32xf32>
    %cst_253 = arith.constant 0.797884583 : f32
    %403 = vector.broadcast %cst_253 : f32 to vector<16x32xf32>
    %404 = arith.mulf %403, %402 : vector<16x32xf32>
    %405 = math.tanh %404 : vector<16x32xf32>
    %cst_254 = arith.constant 1.000000e+00 : f32
    %406 = vector.broadcast %cst_254 : f32 to vector<16x32xf32>
    %407 = arith.addf %406, %405 : vector<16x32xf32>
    %408 = arith.mulf %397, %407 : vector<16x32xf32>
    %409 = arith.truncf %408 : vector<16x32xf32> to vector<16x32xbf16>
    %c4_255 = arith.constant 4 : index
    %c0_256 = arith.constant 0 : index
    %c0_257 = arith.constant 0 : index
    %410 = vector.load %arg10[%c4_255, %c0_256, %c0_257] : memref<16x8x16xbf16, #tpu.memory_space<vmem>>, vector<1x8x16xbf16>
    %411 = vector.shape_cast %410 : vector<1x8x16xbf16> to vector<8x16xbf16>
    %cst_258 = arith.constant dense<0.000000e+00> : vector<8x32xf32>
    %412 = tpu.matmul %411, %409, %cst_258 {dimension_numbers = #tpu.dot_dimension_numbers<[1], [0], [0], [1], [0, 0, 1, 1], [], []>} : vector<8x16xbf16>, vector<16x32xbf16>, vector<8x32xf32> -> vector<8x32xf32>
    %c4_259 = arith.constant 4 : index
    %c0_260 = arith.constant 0 : index
    %c0_261 = arith.constant 0 : index
    %413 = vector.load %arg11[%c4_259, %c0_260, %c0_261] : memref<16x8x1xf32, #tpu.memory_space<vmem>>, vector<1x8x1xf32>
    %414 = vector.shape_cast %413 : vector<1x8x1xf32> to vector<8x1xf32>
    %415 = vector.broadcast %414 : vector<8x1xf32> to vector<8x32xf32>
    %416 = arith.addf %412, %415 : vector<8x32xf32>
    %c4_262 = arith.constant 4 : index
    %c0_263 = arith.constant 0 : index
    %c0_264 = arith.constant 0 : index
    %417 = vector.load %arg12[%c4_262, %c0_263, %c0_264] : memref<16x8x32xf32, #tpu.memory_space<vmem>>, vector<1x8x32xf32>
    %418 = vector.shape_cast %417 : vector<1x8x32xf32> to vector<8x32xf32>
    %419 = vector.shape_cast %416 : vector<8x32xf32> to vector<1x8x32xf32>
    tpu.vector_store %arg12[%c4_262, %c0_263, %c0_264], %419 {strides = array<i32>} : memref<16x8x32xf32, #tpu.memory_space<vmem>>, vector<1x8x32xf32>,
    %c5_265 = arith.constant 5 : index
    %c0_266 = arith.constant 0 : index
    %420 = tpu.strided_load %arg13[%c5_265, %c0_266] {strides = array<i32: 16, 1>} : memref<128x32xf32, #tpu.memory_space<vmem>>, vector<8x32xf32>
    %421 = arith.truncf %420 : vector<8x32xf32> to vector<8x32xbf16>
    %c5_267 = arith.constant 5 : index
    %c0_268 = arith.constant 0 : index
    %c0_269 = arith.constant 0 : index
    %422 = vector.load %arg8[%c5_267, %c0_268, %c0_269] : memref<16x16x8xbf16, #tpu.memory_space<vmem>>, vector<1x16x8xbf16>
    %423 = vector.shape_cast %422 : vector<1x16x8xbf16> to vector<16x8xbf16>
    %cst_270 = arith.constant dense<0.000000e+00> : vector<16x32xf32>
    %424 = tpu.matmul %423, %421, %cst_270 {dimension_numbers = #tpu.dot_dimension_numbers<[1], [0], [0], [1], [0, 0, 1, 1], [], []>} : vector<16x8xbf16>, vector<8x32xbf16>, vector<16x32xf32> -> vector<16x32xf32>
    %c5_271 = arith.constant 5 : index
    %c0_272 = arith.constant 0 : index
    %c0_273 = arith.constant 0 : index
    %425 = vector.load %arg9[%c5_271, %c0_272, %c0_273] : memref<16x16x1xf32, #tpu.memory_space<vmem>>, vector<1x16x1xf32>
    %426 = vector.shape_cast %425 : vector<1x16x1xf32> to vector<16x1xf32>
    %427 = vector.broadcast %426 : vector<16x1xf32> to vector<16x32xf32>
    %428 = arith.addf %424, %427 : vector<16x32xf32>
    %cst_274 = arith.constant 5.000000e-01 : f32
    %429 = vector.broadcast %cst_274 : f32 to vector<16x32xf32>
    %430 = arith.mulf %429, %428 : vector<16x32xf32>
    %cst_275 = arith.constant 4.471500e-02 : f32
    %431 = vector.broadcast %cst_275 : f32 to vector<16x32xf32>
    %432 = arith.mulf %431, %428 : vector<16x32xf32>
    %433 = arith.mulf %432, %428 : vector<16x32xf32>
    %434 = arith.mulf %433, %428 : vector<16x32xf32>
    %435 = arith.addf %428, %434 : vector<16x32xf32>
    %cst_276 = arith.constant 0.797884583 : f32
    %436 = vector.broadcast %cst_276 : f32 to vector<16x32xf32>
    %437 = arith.mulf %436, %435 : vector<16x32xf32>
    %438 = math.tanh %437 : vector<16x32xf32>
    %cst_277 = arith.constant 1.000000e+00 : f32
    %439 = vector.broadcast %cst_277 : f32 to vector<16x32xf32>
    %440 = arith.addf %439, %438 : vector<16x32xf32>
    %441 = arith.mulf %430, %440 : vector<16x32xf32>
    %442 = arith.truncf %441 : vector<16x32xf32> to vector<16x32xbf16>
    %c5_278 = arith.constant 5 : index
    %c0_279 = arith.constant 0 : index
    %c0_280 = arith.constant 0 : index
    %443 = vector.load %arg10[%c5_278, %c0_279, %c0_280] : memref<16x8x16xbf16, #tpu.memory_space<vmem>>, vector<1x8x16xbf16>
    %444 = vector.shape_cast %443 : vector<1x8x16xbf16> to vector<8x16xbf16>
    %cst_281 = arith.constant dense<0.000000e+00> : vector<8x32xf32>
    %445 = tpu.matmul %444, %442, %cst_281 {dimension_numbers = #tpu.dot_dimension_numbers<[1], [0], [0], [1], [0, 0, 1, 1], [], []>} : vector<8x16xbf16>, vector<16x32xbf16>, vector<8x32xf32> -> vector<8x32xf32>
    %c5_282 = arith.constant 5 : index
    %c0_283 = arith.constant 0 : index
    %c0_284 = arith.constant 0 : index
    %446 = vector.load %arg11[%c5_282, %c0_283, %c0_284] : memref<16x8x1xf32, #tpu.memory_space<vmem>>, vector<1x8x1xf32>
    %447 = vector.shape_cast %446 : vector<1x8x1xf32> to vector<8x1xf32>
    %448 = vector.broadcast %447 : vector<8x1xf32> to vector<8x32xf32>
    %449 = arith.addf %445, %448 : vector<8x32xf32>
    %c5_285 = arith.constant 5 : index
    %c0_286 = arith.constant 0 : index
    %c0_287 = arith.constant 0 : index
    %450 = vector.load %arg12[%c5_285, %c0_286, %c0_287] : memref<16x8x32xf32, #tpu.memory_space<vmem>>, vector<1x8x32xf32>
    %451 = vector.shape_cast %450 : vector<1x8x32xf32> to vector<8x32xf32>
    %452 = vector.shape_cast %449 : vector<8x32xf32> to vector<1x8x32xf32>
    tpu.vector_store %arg12[%c5_285, %c0_286, %c0_287], %452 {strides = array<i32>} : memref<16x8x32xf32, #tpu.memory_space<vmem>>, vector<1x8x32xf32>,
    %c6_288 = arith.constant 6 : index
    %c0_289 = arith.constant 0 : index
    %453 = tpu.strided_load %arg13[%c6_288, %c0_289] {strides = array<i32: 16, 1>} : memref<128x32xf32, #tpu.memory_space<vmem>>, vector<8x32xf32>
    %454 = arith.truncf %453 : vector<8x32xf32> to vector<8x32xbf16>
    %c6_290 = arith.constant 6 : index
    %c0_291 = arith.constant 0 : index
    %c0_292 = arith.constant 0 : index
    %455 = vector.load %arg8[%c6_290, %c0_291, %c0_292] : memref<16x16x8xbf16, #tpu.memory_space<vmem>>, vector<1x16x8xbf16>
    %456 = vector.shape_cast %455 : vector<1x16x8xbf16> to vector<16x8xbf16>
    %cst_293 = arith.constant dense<0.000000e+00> : vector<16x32xf32>
    %457 = tpu.matmul %456, %454, %cst_293 {dimension_numbers = #tpu.dot_dimension_numbers<[1], [0], [0], [1], [0, 0, 1, 1], [], []>} : vector<16x8xbf16>, vector<8x32xbf16>, vector<16x32xf32> -> vector<16x32xf32>
    %c6_294 = arith.constant 6 : index
    %c0_295 = arith.constant 0 : index
    %c0_296 = arith.constant 0 : index
    %458 = vector.load %arg9[%c6_294, %c0_295, %c0_296] : memref<16x16x1xf32, #tpu.memory_space<vmem>>, vector<1x16x1xf32>
    %459 = vector.shape_cast %458 : vector<1x16x1xf32> to vector<16x1xf32>
    %460 = vector.broadcast %459 : vector<16x1xf32> to vector<16x32xf32>
    %461 = arith.addf %457, %460 : vector<16x32xf32>
    %cst_297 = arith.constant 5.000000e-01 : f32
    %462 = vector.broadcast %cst_297 : f32 to vector<16x32xf32>
    %463 = arith.mulf %462, %461 : vector<16x32xf32>
    %cst_298 = arith.constant 4.471500e-02 : f32
    %464 = vector.broadcast %cst_298 : f32 to vector<16x32xf32>
    %465 = arith.mulf %464, %461 : vector<16x32xf32>
    %466 = arith.mulf %465, %461 : vector<16x32xf32>
    %467 = arith.mulf %466, %461 : vector<16x32xf32>
    %468 = arith.addf %461, %467 : vector<16x32xf32>
    %cst_299 = arith.constant 0.797884583 : f32
    %469 = vector.broadcast %cst_299 : f32 to vector<16x32xf32>
    %470 = arith.mulf %469, %468 : vector<16x32xf32>
    %471 = math.tanh %470 : vector<16x32xf32>
    %cst_300 = arith.constant 1.000000e+00 : f32
    %472 = vector.broadcast %cst_300 : f32 to vector<16x32xf32>
    %473 = arith.addf %472, %471 : vector<16x32xf32>
    %474 = arith.mulf %463, %473 : vector<16x32xf32>
    %475 = arith.truncf %474 : vector<16x32xf32> to vector<16x32xbf16>
    %c6_301 = arith.constant 6 : index
    %c0_302 = arith.constant 0 : index
    %c0_303 = arith.constant 0 : index
    %476 = vector.load %arg10[%c6_301, %c0_302, %c0_303] : memref<16x8x16xbf16, #tpu.memory_space<vmem>>, vector<1x8x16xbf16>
    %477 = vector.shape_cast %476 : vector<1x8x16xbf16> to vector<8x16xbf16>
    %cst_304 = arith.constant dense<0.000000e+00> : vector<8x32xf32>
    %478 = tpu.matmul %477, %475, %cst_304 {dimension_numbers = #tpu.dot_dimension_numbers<[1], [0], [0], [1], [0, 0, 1, 1], [], []>} : vector<8x16xbf16>, vector<16x32xbf16>, vector<8x32xf32> -> vector<8x32xf32>
    %c6_305 = arith.constant 6 : index
    %c0_306 = arith.constant 0 : index
    %c0_307 = arith.constant 0 : index
    %479 = vector.load %arg11[%c6_305, %c0_306, %c0_307] : memref<16x8x1xf32, #tpu.memory_space<vmem>>, vector<1x8x1xf32>
    %480 = vector.shape_cast %479 : vector<1x8x1xf32> to vector<8x1xf32>
    %481 = vector.broadcast %480 : vector<8x1xf32> to vector<8x32xf32>
    %482 = arith.addf %478, %481 : vector<8x32xf32>
    %c6_308 = arith.constant 6 : index
    %c0_309 = arith.constant 0 : index
    %c0_310 = arith.constant 0 : index
    %483 = vector.load %arg12[%c6_308, %c0_309, %c0_310] : memref<16x8x32xf32, #tpu.memory_space<vmem>>, vector<1x8x32xf32>
    %484 = vector.shape_cast %483 : vector<1x8x32xf32> to vector<8x32xf32>
    %485 = vector.shape_cast %482 : vector<8x32xf32> to vector<1x8x32xf32>
    tpu.vector_store %arg12[%c6_308, %c0_309, %c0_310], %485 {strides = array<i32>} : memref<16x8x32xf32, #tpu.memory_space<vmem>>, vector<1x8x32xf32>,
    %c7_311 = arith.constant 7 : index
    %c0_312 = arith.constant 0 : index
    %486 = tpu.strided_load %arg13[%c7_311, %c0_312] {strides = array<i32: 16, 1>} : memref<128x32xf32, #tpu.memory_space<vmem>>, vector<8x32xf32>
    %487 = arith.truncf %486 : vector<8x32xf32> to vector<8x32xbf16>
    %c7_313 = arith.constant 7 : index
    %c0_314 = arith.constant 0 : index
    %c0_315 = arith.constant 0 : index
    %488 = vector.load %arg8[%c7_313, %c0_314, %c0_315] : memref<16x16x8xbf16, #tpu.memory_space<vmem>>, vector<1x16x8xbf16>
    %489 = vector.shape_cast %488 : vector<1x16x8xbf16> to vector<16x8xbf16>
    %cst_316 = arith.constant dense<0.000000e+00> : vector<16x32xf32>
    %490 = tpu.matmul %489, %487, %cst_316 {dimension_numbers = #tpu.dot_dimension_numbers<[1], [0], [0], [1], [0, 0, 1, 1], [], []>} : vector<16x8xbf16>, vector<8x32xbf16>, vector<16x32xf32> -> vector<16x32xf32>
    %c7_317 = arith.constant 7 : index
    %c0_318 = arith.constant 0 : index
    %c0_319 = arith.constant 0 : index
    %491 = vector.load %arg9[%c7_317, %c0_318, %c0_319] : memref<16x16x1xf32, #tpu.memory_space<vmem>>, vector<1x16x1xf32>
    %492 = vector.shape_cast %491 : vector<1x16x1xf32> to vector<16x1xf32>
    %493 = vector.broadcast %492 : vector<16x1xf32> to vector<16x32xf32>
    %494 = arith.addf %490, %493 : vector<16x32xf32>
    %cst_320 = arith.constant 5.000000e-01 : f32
    %495 = vector.broadcast %cst_320 : f32 to vector<16x32xf32>
    %496 = arith.mulf %495, %494 : vector<16x32xf32>
    %cst_321 = arith.constant 4.471500e-02 : f32
    %497 = vector.broadcast %cst_321 : f32 to vector<16x32xf32>
    %498 = arith.mulf %497, %494 : vector<16x32xf32>
    %499 = arith.mulf %498, %494 : vector<16x32xf32>
    %500 = arith.mulf %499, %494 : vector<16x32xf32>
    %501 = arith.addf %494, %500 : vector<16x32xf32>
    %cst_322 = arith.constant 0.797884583 : f32
    %502 = vector.broadcast %cst_322 : f32 to vector<16x32xf32>
    %503 = arith.mulf %502, %501 : vector<16x32xf32>
    %504 = math.tanh %503 : vector<16x32xf32>
    %cst_323 = arith.constant 1.000000e+00 : f32
    %505 = vector.broadcast %cst_323 : f32 to vector<16x32xf32>
    %506 = arith.addf %505, %504 : vector<16x32xf32>
    %507 = arith.mulf %496, %506 : vector<16x32xf32>
    %508 = arith.truncf %507 : vector<16x32xf32> to vector<16x32xbf16>
    %c7_324 = arith.constant 7 : index
    %c0_325 = arith.constant 0 : index
    %c0_326 = arith.constant 0 : index
    %509 = vector.load %arg10[%c7_324, %c0_325, %c0_326] : memref<16x8x16xbf16, #tpu.memory_space<vmem>>, vector<1x8x16xbf16>
    %510 = vector.shape_cast %509 : vector<1x8x16xbf16> to vector<8x16xbf16>
    %cst_327 = arith.constant dense<0.000000e+00> : vector<8x32xf32>
    %511 = tpu.matmul %510, %508, %cst_327 {dimension_numbers = #tpu.dot_dimension_numbers<[1], [0], [0], [1], [0, 0, 1, 1], [], []>} : vector<8x16xbf16>, vector<16x32xbf16>, vector<8x32xf32> -> vector<8x32xf32>
    %c7_328 = arith.constant 7 : index
    %c0_329 = arith.constant 0 : index
    %c0_330 = arith.constant 0 : index
    %512 = vector.load %arg11[%c7_328, %c0_329, %c0_330] : memref<16x8x1xf32, #tpu.memory_space<vmem>>, vector<1x8x1xf32>
    %513 = vector.shape_cast %512 : vector<1x8x1xf32> to vector<8x1xf32>
    %514 = vector.broadcast %513 : vector<8x1xf32> to vector<8x32xf32>
    %515 = arith.addf %511, %514 : vector<8x32xf32>
    %c7_331 = arith.constant 7 : index
    %c0_332 = arith.constant 0 : index
    %c0_333 = arith.constant 0 : index
    %516 = vector.load %arg12[%c7_331, %c0_332, %c0_333] : memref<16x8x32xf32, #tpu.memory_space<vmem>>, vector<1x8x32xf32>
    %517 = vector.shape_cast %516 : vector<1x8x32xf32> to vector<8x32xf32>
    %518 = vector.shape_cast %515 : vector<8x32xf32> to vector<1x8x32xf32>
    tpu.vector_store %arg12[%c7_331, %c0_332, %c0_333], %518 {strides = array<i32>} : memref<16x8x32xf32, #tpu.memory_space<vmem>>, vector<1x8x32xf32>,
    %c8 = arith.constant 8 : index
    %c0_334 = arith.constant 0 : index
    %519 = tpu.strided_load %arg13[%c8, %c0_334] {strides = array<i32: 16, 1>} : memref<128x32xf32, #tpu.memory_space<vmem>>, vector<8x32xf32>
    %520 = arith.truncf %519 : vector<8x32xf32> to vector<8x32xbf16>
    %c8_335 = arith.constant 8 : index
    %c0_336 = arith.constant 0 : index
    %c0_337 = arith.constant 0 : index
    %521 = vector.load %arg8[%c8_335, %c0_336, %c0_337] : memref<16x16x8xbf16, #tpu.memory_space<vmem>>, vector<1x16x8xbf16>
    %522 = vector.shape_cast %521 : vector<1x16x8xbf16> to vector<16x8xbf16>
    %cst_338 = arith.constant dense<0.000000e+00> : vector<16x32xf32>
    %523 = tpu.matmul %522, %520, %cst_338 {dimension_numbers = #tpu.dot_dimension_numbers<[1], [0], [0], [1], [0, 0, 1, 1], [], []>} : vector<16x8xbf16>, vector<8x32xbf16>, vector<16x32xf32> -> vector<16x32xf32>
    %c8_339 = arith.constant 8 : index
    %c0_340 = arith.constant 0 : index
    %c0_341 = arith.constant 0 : index
    %524 = vector.load %arg9[%c8_339, %c0_340, %c0_341] : memref<16x16x1xf32, #tpu.memory_space<vmem>>, vector<1x16x1xf32>
    %525 = vector.shape_cast %524 : vector<1x16x1xf32> to vector<16x1xf32>
    %526 = vector.broadcast %525 : vector<16x1xf32> to vector<16x32xf32>
    %527 = arith.addf %523, %526 : vector<16x32xf32>
    %cst_342 = arith.constant 5.000000e-01 : f32
    %528 = vector.broadcast %cst_342 : f32 to vector<16x32xf32>
    %529 = arith.mulf %528, %527 : vector<16x32xf32>
    %cst_343 = arith.constant 4.471500e-02 : f32
    %530 = vector.broadcast %cst_343 : f32 to vector<16x32xf32>
    %531 = arith.mulf %530, %527 : vector<16x32xf32>
    %532 = arith.mulf %531, %527 : vector<16x32xf32>
    %533 = arith.mulf %532, %527 : vector<16x32xf32>
    %534 = arith.addf %527, %533 : vector<16x32xf32>
    %cst_344 = arith.constant 0.797884583 : f32
    %535 = vector.broadcast %cst_344 : f32 to vector<16x32xf32>
    %536 = arith.mulf %535, %534 : vector<16x32xf32>
    %537 = math.tanh %536 : vector<16x32xf32>
    %cst_345 = arith.constant 1.000000e+00 : f32
    %538 = vector.broadcast %cst_345 : f32 to vector<16x32xf32>
    %539 = arith.addf %538, %537 : vector<16x32xf32>
    %540 = arith.mulf %529, %539 : vector<16x32xf32>
    %541 = arith.truncf %540 : vector<16x32xf32> to vector<16x32xbf16>
    %c8_346 = arith.constant 8 : index
    %c0_347 = arith.constant 0 : index
    %c0_348 = arith.constant 0 : index
    %542 = vector.load %arg10[%c8_346, %c0_347, %c0_348] : memref<16x8x16xbf16, #tpu.memory_space<vmem>>, vector<1x8x16xbf16>
    %543 = vector.shape_cast %542 : vector<1x8x16xbf16> to vector<8x16xbf16>
    %cst_349 = arith.constant dense<0.000000e+00> : vector<8x32xf32>
    %544 = tpu.matmul %543, %541, %cst_349 {dimension_numbers = #tpu.dot_dimension_numbers<[1], [0], [0], [1], [0, 0, 1, 1], [], []>} : vector<8x16xbf16>, vector<16x32xbf16>, vector<8x32xf32> -> vector<8x32xf32>
    %c8_350 = arith.constant 8 : index
    %c0_351 = arith.constant 0 : index
    %c0_352 = arith.constant 0 : index
    %545 = vector.load %arg11[%c8_350, %c0_351, %c0_352] : memref<16x8x1xf32, #tpu.memory_space<vmem>>, vector<1x8x1xf32>
    %546 = vector.shape_cast %545 : vector<1x8x1xf32> to vector<8x1xf32>
    %547 = vector.broadcast %546 : vector<8x1xf32> to vector<8x32xf32>
    %548 = arith.addf %544, %547 : vector<8x32xf32>
    %c8_353 = arith.constant 8 : index
    %c0_354 = arith.constant 0 : index
    %c0_355 = arith.constant 0 : index
    %549 = vector.load %arg12[%c8_353, %c0_354, %c0_355] : memref<16x8x32xf32, #tpu.memory_space<vmem>>, vector<1x8x32xf32>
    %550 = vector.shape_cast %549 : vector<1x8x32xf32> to vector<8x32xf32>
    %551 = vector.shape_cast %548 : vector<8x32xf32> to vector<1x8x32xf32>
    tpu.vector_store %arg12[%c8_353, %c0_354, %c0_355], %551 {strides = array<i32>} : memref<16x8x32xf32, #tpu.memory_space<vmem>>, vector<1x8x32xf32>,
    %c9 = arith.constant 9 : index
    %c0_356 = arith.constant 0 : index
    %552 = tpu.strided_load %arg13[%c9, %c0_356] {strides = array<i32: 16, 1>} : memref<128x32xf32, #tpu.memory_space<vmem>>, vector<8x32xf32>
    %553 = arith.truncf %552 : vector<8x32xf32> to vector<8x32xbf16>
    %c9_357 = arith.constant 9 : index
    %c0_358 = arith.constant 0 : index
    %c0_359 = arith.constant 0 : index
    %554 = vector.load %arg8[%c9_357, %c0_358, %c0_359] : memref<16x16x8xbf16, #tpu.memory_space<vmem>>, vector<1x16x8xbf16>
    %555 = vector.shape_cast %554 : vector<1x16x8xbf16> to vector<16x8xbf16>
    %cst_360 = arith.constant dense<0.000000e+00> : vector<16x32xf32>
    %556 = tpu.matmul %555, %553, %cst_360 {dimension_numbers = #tpu.dot_dimension_numbers<[1], [0], [0], [1], [0, 0, 1, 1], [], []>} : vector<16x8xbf16>, vector<8x32xbf16>, vector<16x32xf32> -> vector<16x32xf32>
    %c9_361 = arith.constant 9 : index
    %c0_362 = arith.constant 0 : index
    %c0_363 = arith.constant 0 : index
    %557 = vector.load %arg9[%c9_361, %c0_362, %c0_363] : memref<16x16x1xf32, #tpu.memory_space<vmem>>, vector<1x16x1xf32>
    %558 = vector.shape_cast %557 : vector<1x16x1xf32> to vector<16x1xf32>
    %559 = vector.broadcast %558 : vector<16x1xf32> to vector<16x32xf32>
    %560 = arith.addf %556, %559 : vector<16x32xf32>
    %cst_364 = arith.constant 5.000000e-01 : f32
    %561 = vector.broadcast %cst_364 : f32 to vector<16x32xf32>
    %562 = arith.mulf %561, %560 : vector<16x32xf32>
    %cst_365 = arith.constant 4.471500e-02 : f32
    %563 = vector.broadcast %cst_365 : f32 to vector<16x32xf32>
    %564 = arith.mulf %563, %560 : vector<16x32xf32>
    %565 = arith.mulf %564, %560 : vector<16x32xf32>
    %566 = arith.mulf %565, %560 : vector<16x32xf32>
    %567 = arith.addf %560, %566 : vector<16x32xf32>
    %cst_366 = arith.constant 0.797884583 : f32
    %568 = vector.broadcast %cst_366 : f32 to vector<16x32xf32>
    %569 = arith.mulf %568, %567 : vector<16x32xf32>
    %570 = math.tanh %569 : vector<16x32xf32>
    %cst_367 = arith.constant 1.000000e+00 : f32
    %571 = vector.broadcast %cst_367 : f32 to vector<16x32xf32>
    %572 = arith.addf %571, %570 : vector<16x32xf32>
    %573 = arith.mulf %562, %572 : vector<16x32xf32>
    %574 = arith.truncf %573 : vector<16x32xf32> to vector<16x32xbf16>
    %c9_368 = arith.constant 9 : index
    %c0_369 = arith.constant 0 : index
    %c0_370 = arith.constant 0 : index
    %575 = vector.load %arg10[%c9_368, %c0_369, %c0_370] : memref<16x8x16xbf16, #tpu.memory_space<vmem>>, vector<1x8x16xbf16>
    %576 = vector.shape_cast %575 : vector<1x8x16xbf16> to vector<8x16xbf16>
    %cst_371 = arith.constant dense<0.000000e+00> : vector<8x32xf32>
    %577 = tpu.matmul %576, %574, %cst_371 {dimension_numbers = #tpu.dot_dimension_numbers<[1], [0], [0], [1], [0, 0, 1, 1], [], []>} : vector<8x16xbf16>, vector<16x32xbf16>, vector<8x32xf32> -> vector<8x32xf32>
    %c9_372 = arith.constant 9 : index
    %c0_373 = arith.constant 0 : index
    %c0_374 = arith.constant 0 : index
    %578 = vector.load %arg11[%c9_372, %c0_373, %c0_374] : memref<16x8x1xf32, #tpu.memory_space<vmem>>, vector<1x8x1xf32>
    %579 = vector.shape_cast %578 : vector<1x8x1xf32> to vector<8x1xf32>
    %580 = vector.broadcast %579 : vector<8x1xf32> to vector<8x32xf32>
    %581 = arith.addf %577, %580 : vector<8x32xf32>
    %c9_375 = arith.constant 9 : index
    %c0_376 = arith.constant 0 : index
    %c0_377 = arith.constant 0 : index
    %582 = vector.load %arg12[%c9_375, %c0_376, %c0_377] : memref<16x8x32xf32, #tpu.memory_space<vmem>>, vector<1x8x32xf32>
    %583 = vector.shape_cast %582 : vector<1x8x32xf32> to vector<8x32xf32>
    %584 = vector.shape_cast %581 : vector<8x32xf32> to vector<1x8x32xf32>
    tpu.vector_store %arg12[%c9_375, %c0_376, %c0_377], %584 {strides = array<i32>} : memref<16x8x32xf32, #tpu.memory_space<vmem>>, vector<1x8x32xf32>,
    %c10 = arith.constant 10 : index
    %c0_378 = arith.constant 0 : index
    %585 = tpu.strided_load %arg13[%c10, %c0_378] {strides = array<i32: 16, 1>} : memref<128x32xf32, #tpu.memory_space<vmem>>, vector<8x32xf32>
    %586 = arith.truncf %585 : vector<8x32xf32> to vector<8x32xbf16>
    %c10_379 = arith.constant 10 : index
    %c0_380 = arith.constant 0 : index
    %c0_381 = arith.constant 0 : index
    %587 = vector.load %arg8[%c10_379, %c0_380, %c0_381] : memref<16x16x8xbf16, #tpu.memory_space<vmem>>, vector<1x16x8xbf16>
    %588 = vector.shape_cast %587 : vector<1x16x8xbf16> to vector<16x8xbf16>
    %cst_382 = arith.constant dense<0.000000e+00> : vector<16x32xf32>
    %589 = tpu.matmul %588, %586, %cst_382 {dimension_numbers = #tpu.dot_dimension_numbers<[1], [0], [0], [1], [0, 0, 1, 1], [], []>} : vector<16x8xbf16>, vector<8x32xbf16>, vector<16x32xf32> -> vector<16x32xf32>
    %c10_383 = arith.constant 10 : index
    %c0_384 = arith.constant 0 : index
    %c0_385 = arith.constant 0 : index
    %590 = vector.load %arg9[%c10_383, %c0_384, %c0_385] : memref<16x16x1xf32, #tpu.memory_space<vmem>>, vector<1x16x1xf32>
    %591 = vector.shape_cast %590 : vector<1x16x1xf32> to vector<16x1xf32>
    %592 = vector.broadcast %591 : vector<16x1xf32> to vector<16x32xf32>
    %593 = arith.addf %589, %592 : vector<16x32xf32>
    %cst_386 = arith.constant 5.000000e-01 : f32
    %594 = vector.broadcast %cst_386 : f32 to vector<16x32xf32>
    %595 = arith.mulf %594, %593 : vector<16x32xf32>
    %cst_387 = arith.constant 4.471500e-02 : f32
    %596 = vector.broadcast %cst_387 : f32 to vector<16x32xf32>
    %597 = arith.mulf %596, %593 : vector<16x32xf32>
    %598 = arith.mulf %597, %593 : vector<16x32xf32>
    %599 = arith.mulf %598, %593 : vector<16x32xf32>
    %600 = arith.addf %593, %599 : vector<16x32xf32>
    %cst_388 = arith.constant 0.797884583 : f32
    %601 = vector.broadcast %cst_388 : f32 to vector<16x32xf32>
    %602 = arith.mulf %601, %600 : vector<16x32xf32>
    %603 = math.tanh %602 : vector<16x32xf32>
    %cst_389 = arith.constant 1.000000e+00 : f32
    %604 = vector.broadcast %cst_389 : f32 to vector<16x32xf32>
    %605 = arith.addf %604, %603 : vector<16x32xf32>
    %606 = arith.mulf %595, %605 : vector<16x32xf32>
    %607 = arith.truncf %606 : vector<16x32xf32> to vector<16x32xbf16>
    %c10_390 = arith.constant 10 : index
    %c0_391 = arith.constant 0 : index
    %c0_392 = arith.constant 0 : index
    %608 = vector.load %arg10[%c10_390, %c0_391, %c0_392] : memref<16x8x16xbf16, #tpu.memory_space<vmem>>, vector<1x8x16xbf16>
    %609 = vector.shape_cast %608 : vector<1x8x16xbf16> to vector<8x16xbf16>
    %cst_393 = arith.constant dense<0.000000e+00> : vector<8x32xf32>
    %610 = tpu.matmul %609, %607, %cst_393 {dimension_numbers = #tpu.dot_dimension_numbers<[1], [0], [0], [1], [0, 0, 1, 1], [], []>} : vector<8x16xbf16>, vector<16x32xbf16>, vector<8x32xf32> -> vector<8x32xf32>
    %c10_394 = arith.constant 10 : index
    %c0_395 = arith.constant 0 : index
    %c0_396 = arith.constant 0 : index
    %611 = vector.load %arg11[%c10_394, %c0_395, %c0_396] : memref<16x8x1xf32, #tpu.memory_space<vmem>>, vector<1x8x1xf32>
    %612 = vector.shape_cast %611 : vector<1x8x1xf32> to vector<8x1xf32>
    %613 = vector.broadcast %612 : vector<8x1xf32> to vector<8x32xf32>
    %614 = arith.addf %610, %613 : vector<8x32xf32>
    %c10_397 = arith.constant 10 : index
    %c0_398 = arith.constant 0 : index
    %c0_399 = arith.constant 0 : index
    %615 = vector.load %arg12[%c10_397, %c0_398, %c0_399] : memref<16x8x32xf32, #tpu.memory_space<vmem>>, vector<1x8x32xf32>
    %616 = vector.shape_cast %615 : vector<1x8x32xf32> to vector<8x32xf32>
    %617 = vector.shape_cast %614 : vector<8x32xf32> to vector<1x8x32xf32>
    tpu.vector_store %arg12[%c10_397, %c0_398, %c0_399], %617 {strides = array<i32>} : memref<16x8x32xf32, #tpu.memory_space<vmem>>, vector<1x8x32xf32>,
    %c11 = arith.constant 11 : index
    %c0_400 = arith.constant 0 : index
    %618 = tpu.strided_load %arg13[%c11, %c0_400] {strides = array<i32: 16, 1>} : memref<128x32xf32, #tpu.memory_space<vmem>>, vector<8x32xf32>
    %619 = arith.truncf %618 : vector<8x32xf32> to vector<8x32xbf16>
    %c11_401 = arith.constant 11 : index
    %c0_402 = arith.constant 0 : index
    %c0_403 = arith.constant 0 : index
    %620 = vector.load %arg8[%c11_401, %c0_402, %c0_403] : memref<16x16x8xbf16, #tpu.memory_space<vmem>>, vector<1x16x8xbf16>
    %621 = vector.shape_cast %620 : vector<1x16x8xbf16> to vector<16x8xbf16>
    %cst_404 = arith.constant dense<0.000000e+00> : vector<16x32xf32>
    %622 = tpu.matmul %621, %619, %cst_404 {dimension_numbers = #tpu.dot_dimension_numbers<[1], [0], [0], [1], [0, 0, 1, 1], [], []>} : vector<16x8xbf16>, vector<8x32xbf16>, vector<16x32xf32> -> vector<16x32xf32>
    %c11_405 = arith.constant 11 : index
    %c0_406 = arith.constant 0 : index
    %c0_407 = arith.constant 0 : index
    %623 = vector.load %arg9[%c11_405, %c0_406, %c0_407] : memref<16x16x1xf32, #tpu.memory_space<vmem>>, vector<1x16x1xf32>
    %624 = vector.shape_cast %623 : vector<1x16x1xf32> to vector<16x1xf32>
    %625 = vector.broadcast %624 : vector<16x1xf32> to vector<16x32xf32>
    %626 = arith.addf %622, %625 : vector<16x32xf32>
    %cst_408 = arith.constant 5.000000e-01 : f32
    %627 = vector.broadcast %cst_408 : f32 to vector<16x32xf32>
    %628 = arith.mulf %627, %626 : vector<16x32xf32>
    %cst_409 = arith.constant 4.471500e-02 : f32
    %629 = vector.broadcast %cst_409 : f32 to vector<16x32xf32>
    %630 = arith.mulf %629, %626 : vector<16x32xf32>
    %631 = arith.mulf %630, %626 : vector<16x32xf32>
    %632 = arith.mulf %631, %626 : vector<16x32xf32>
    %633 = arith.addf %626, %632 : vector<16x32xf32>
    %cst_410 = arith.constant 0.797884583 : f32
    %634 = vector.broadcast %cst_410 : f32 to vector<16x32xf32>
    %635 = arith.mulf %634, %633 : vector<16x32xf32>
    %636 = math.tanh %635 : vector<16x32xf32>
    %cst_411 = arith.constant 1.000000e+00 : f32
    %637 = vector.broadcast %cst_411 : f32 to vector<16x32xf32>
    %638 = arith.addf %637, %636 : vector<16x32xf32>
    %639 = arith.mulf %628, %638 : vector<16x32xf32>
    %640 = arith.truncf %639 : vector<16x32xf32> to vector<16x32xbf16>
    %c11_412 = arith.constant 11 : index
    %c0_413 = arith.constant 0 : index
    %c0_414 = arith.constant 0 : index
    %641 = vector.load %arg10[%c11_412, %c0_413, %c0_414] : memref<16x8x16xbf16, #tpu.memory_space<vmem>>, vector<1x8x16xbf16>
    %642 = vector.shape_cast %641 : vector<1x8x16xbf16> to vector<8x16xbf16>
    %cst_415 = arith.constant dense<0.000000e+00> : vector<8x32xf32>
    %643 = tpu.matmul %642, %640, %cst_415 {dimension_numbers = #tpu.dot_dimension_numbers<[1], [0], [0], [1], [0, 0, 1, 1], [], []>} : vector<8x16xbf16>, vector<16x32xbf16>, vector<8x32xf32> -> vector<8x32xf32>
    %c11_416 = arith.constant 11 : index
    %c0_417 = arith.constant 0 : index
    %c0_418 = arith.constant 0 : index
    %644 = vector.load %arg11[%c11_416, %c0_417, %c0_418] : memref<16x8x1xf32, #tpu.memory_space<vmem>>, vector<1x8x1xf32>
    %645 = vector.shape_cast %644 : vector<1x8x1xf32> to vector<8x1xf32>
    %646 = vector.broadcast %645 : vector<8x1xf32> to vector<8x32xf32>
    %647 = arith.addf %643, %646 : vector<8x32xf32>
    %c11_419 = arith.constant 11 : index
    %c0_420 = arith.constant 0 : index
    %c0_421 = arith.constant 0 : index
    %648 = vector.load %arg12[%c11_419, %c0_420, %c0_421] : memref<16x8x32xf32, #tpu.memory_space<vmem>>, vector<1x8x32xf32>
    %649 = vector.shape_cast %648 : vector<1x8x32xf32> to vector<8x32xf32>
    %650 = vector.shape_cast %647 : vector<8x32xf32> to vector<1x8x32xf32>
    tpu.vector_store %arg12[%c11_419, %c0_420, %c0_421], %650 {strides = array<i32>} : memref<16x8x32xf32, #tpu.memory_space<vmem>>, vector<1x8x32xf32>,
    %c12 = arith.constant 12 : index
    %c0_422 = arith.constant 0 : index
    %651 = tpu.strided_load %arg13[%c12, %c0_422] {strides = array<i32: 16, 1>} : memref<128x32xf32, #tpu.memory_space<vmem>>, vector<8x32xf32>
    %652 = arith.truncf %651 : vector<8x32xf32> to vector<8x32xbf16>
    %c12_423 = arith.constant 12 : index
    %c0_424 = arith.constant 0 : index
    %c0_425 = arith.constant 0 : index
    %653 = vector.load %arg8[%c12_423, %c0_424, %c0_425] : memref<16x16x8xbf16, #tpu.memory_space<vmem>>, vector<1x16x8xbf16>
    %654 = vector.shape_cast %653 : vector<1x16x8xbf16> to vector<16x8xbf16>
    %cst_426 = arith.constant dense<0.000000e+00> : vector<16x32xf32>
    %655 = tpu.matmul %654, %652, %cst_426 {dimension_numbers = #tpu.dot_dimension_numbers<[1], [0], [0], [1], [0, 0, 1, 1], [], []>} : vector<16x8xbf16>, vector<8x32xbf16>, vector<16x32xf32> -> vector<16x32xf32>
    %c12_427 = arith.constant 12 : index
    %c0_428 = arith.constant 0 : index
    %c0_429 = arith.constant 0 : index
    %656 = vector.load %arg9[%c12_427, %c0_428, %c0_429] : memref<16x16x1xf32, #tpu.memory_space<vmem>>, vector<1x16x1xf32>
    %657 = vector.shape_cast %656 : vector<1x16x1xf32> to vector<16x1xf32>
    %658 = vector.broadcast %657 : vector<16x1xf32> to vector<16x32xf32>
    %659 = arith.addf %655, %658 : vector<16x32xf32>
    %cst_430 = arith.constant 5.000000e-01 : f32
    %660 = vector.broadcast %cst_430 : f32 to vector<16x32xf32>
    %661 = arith.mulf %660, %659 : vector<16x32xf32>
    %cst_431 = arith.constant 4.471500e-02 : f32
    %662 = vector.broadcast %cst_431 : f32 to vector<16x32xf32>
    %663 = arith.mulf %662, %659 : vector<16x32xf32>
    %664 = arith.mulf %663, %659 : vector<16x32xf32>
    %665 = arith.mulf %664, %659 : vector<16x32xf32>
    %666 = arith.addf %659, %665 : vector<16x32xf32>
    %cst_432 = arith.constant 0.797884583 : f32
    %667 = vector.broadcast %cst_432 : f32 to vector<16x32xf32>
    %668 = arith.mulf %667, %666 : vector<16x32xf32>
    %669 = math.tanh %668 : vector<16x32xf32>
    %cst_433 = arith.constant 1.000000e+00 : f32
    %670 = vector.broadcast %cst_433 : f32 to vector<16x32xf32>
    %671 = arith.addf %670, %669 : vector<16x32xf32>
    %672 = arith.mulf %661, %671 : vector<16x32xf32>
    %673 = arith.truncf %672 : vector<16x32xf32> to vector<16x32xbf16>
    %c12_434 = arith.constant 12 : index
    %c0_435 = arith.constant 0 : index
    %c0_436 = arith.constant 0 : index
    %674 = vector.load %arg10[%c12_434, %c0_435, %c0_436] : memref<16x8x16xbf16, #tpu.memory_space<vmem>>, vector<1x8x16xbf16>
    %675 = vector.shape_cast %674 : vector<1x8x16xbf16> to vector<8x16xbf16>
    %cst_437 = arith.constant dense<0.000000e+00> : vector<8x32xf32>
    %676 = tpu.matmul %675, %673, %cst_437 {dimension_numbers = #tpu.dot_dimension_numbers<[1], [0], [0], [1], [0, 0, 1, 1], [], []>} : vector<8x16xbf16>, vector<16x32xbf16>, vector<8x32xf32> -> vector<8x32xf32>
    %c12_438 = arith.constant 12 : index
    %c0_439 = arith.constant 0 : index
    %c0_440 = arith.constant 0 : index
    %677 = vector.load %arg11[%c12_438, %c0_439, %c0_440] : memref<16x8x1xf32, #tpu.memory_space<vmem>>, vector<1x8x1xf32>
    %678 = vector.shape_cast %677 : vector<1x8x1xf32> to vector<8x1xf32>
    %679 = vector.broadcast %678 : vector<8x1xf32> to vector<8x32xf32>
    %680 = arith.addf %676, %679 : vector<8x32xf32>
    %c12_441 = arith.constant 12 : index
    %c0_442 = arith.constant 0 : index
    %c0_443 = arith.constant 0 : index
    %681 = vector.load %arg12[%c12_441, %c0_442, %c0_443] : memref<16x8x32xf32, #tpu.memory_space<vmem>>, vector<1x8x32xf32>
    %682 = vector.shape_cast %681 : vector<1x8x32xf32> to vector<8x32xf32>
    %683 = vector.shape_cast %680 : vector<8x32xf32> to vector<1x8x32xf32>
    tpu.vector_store %arg12[%c12_441, %c0_442, %c0_443], %683 {strides = array<i32>} : memref<16x8x32xf32, #tpu.memory_space<vmem>>, vector<1x8x32xf32>,
    %c13 = arith.constant 13 : index
    %c0_444 = arith.constant 0 : index
    %684 = tpu.strided_load %arg13[%c13, %c0_444] {strides = array<i32: 16, 1>} : memref<128x32xf32, #tpu.memory_space<vmem>>, vector<8x32xf32>
    %685 = arith.truncf %684 : vector<8x32xf32> to vector<8x32xbf16>
    %c13_445 = arith.constant 13 : index
    %c0_446 = arith.constant 0 : index
    %c0_447 = arith.constant 0 : index
    %686 = vector.load %arg8[%c13_445, %c0_446, %c0_447] : memref<16x16x8xbf16, #tpu.memory_space<vmem>>, vector<1x16x8xbf16>
    %687 = vector.shape_cast %686 : vector<1x16x8xbf16> to vector<16x8xbf16>
    %cst_448 = arith.constant dense<0.000000e+00> : vector<16x32xf32>
    %688 = tpu.matmul %687, %685, %cst_448 {dimension_numbers = #tpu.dot_dimension_numbers<[1], [0], [0], [1], [0, 0, 1, 1], [], []>} : vector<16x8xbf16>, vector<8x32xbf16>, vector<16x32xf32> -> vector<16x32xf32>
    %c13_449 = arith.constant 13 : index
    %c0_450 = arith.constant 0 : index
    %c0_451 = arith.constant 0 : index
    %689 = vector.load %arg9[%c13_449, %c0_450, %c0_451] : memref<16x16x1xf32, #tpu.memory_space<vmem>>, vector<1x16x1xf32>
    %690 = vector.shape_cast %689 : vector<1x16x1xf32> to vector<16x1xf32>
    %691 = vector.broadcast %690 : vector<16x1xf32> to vector<16x32xf32>
    %692 = arith.addf %688, %691 : vector<16x32xf32>
    %cst_452 = arith.constant 5.000000e-01 : f32
    %693 = vector.broadcast %cst_452 : f32 to vector<16x32xf32>
    %694 = arith.mulf %693, %692 : vector<16x32xf32>
    %cst_453 = arith.constant 4.471500e-02 : f32
    %695 = vector.broadcast %cst_453 : f32 to vector<16x32xf32>
    %696 = arith.mulf %695, %692 : vector<16x32xf32>
    %697 = arith.mulf %696, %692 : vector<16x32xf32>
    %698 = arith.mulf %697, %692 : vector<16x32xf32>
    %699 = arith.addf %692, %698 : vector<16x32xf32>
    %cst_454 = arith.constant 0.797884583 : f32
    %700 = vector.broadcast %cst_454 : f32 to vector<16x32xf32>
    %701 = arith.mulf %700, %699 : vector<16x32xf32>
    %702 = math.tanh %701 : vector<16x32xf32>
    %cst_455 = arith.constant 1.000000e+00 : f32
    %703 = vector.broadcast %cst_455 : f32 to vector<16x32xf32>
    %704 = arith.addf %703, %702 : vector<16x32xf32>
    %705 = arith.mulf %694, %704 : vector<16x32xf32>
    %706 = arith.truncf %705 : vector<16x32xf32> to vector<16x32xbf16>
    %c13_456 = arith.constant 13 : index
    %c0_457 = arith.constant 0 : index
    %c0_458 = arith.constant 0 : index
    %707 = vector.load %arg10[%c13_456, %c0_457, %c0_458] : memref<16x8x16xbf16, #tpu.memory_space<vmem>>, vector<1x8x16xbf16>
    %708 = vector.shape_cast %707 : vector<1x8x16xbf16> to vector<8x16xbf16>
    %cst_459 = arith.constant dense<0.000000e+00> : vector<8x32xf32>
    %709 = tpu.matmul %708, %706, %cst_459 {dimension_numbers = #tpu.dot_dimension_numbers<[1], [0], [0], [1], [0, 0, 1, 1], [], []>} : vector<8x16xbf16>, vector<16x32xbf16>, vector<8x32xf32> -> vector<8x32xf32>
    %c13_460 = arith.constant 13 : index
    %c0_461 = arith.constant 0 : index
    %c0_462 = arith.constant 0 : index
    %710 = vector.load %arg11[%c13_460, %c0_461, %c0_462] : memref<16x8x1xf32, #tpu.memory_space<vmem>>, vector<1x8x1xf32>
    %711 = vector.shape_cast %710 : vector<1x8x1xf32> to vector<8x1xf32>
    %712 = vector.broadcast %711 : vector<8x1xf32> to vector<8x32xf32>
    %713 = arith.addf %709, %712 : vector<8x32xf32>
    %c13_463 = arith.constant 13 : index
    %c0_464 = arith.constant 0 : index
    %c0_465 = arith.constant 0 : index
    %714 = vector.load %arg12[%c13_463, %c0_464, %c0_465] : memref<16x8x32xf32, #tpu.memory_space<vmem>>, vector<1x8x32xf32>
    %715 = vector.shape_cast %714 : vector<1x8x32xf32> to vector<8x32xf32>
    %716 = vector.shape_cast %713 : vector<8x32xf32> to vector<1x8x32xf32>
    tpu.vector_store %arg12[%c13_463, %c0_464, %c0_465], %716 {strides = array<i32>} : memref<16x8x32xf32, #tpu.memory_space<vmem>>, vector<1x8x32xf32>,
    %c14 = arith.constant 14 : index
    %c0_466 = arith.constant 0 : index
    %717 = tpu.strided_load %arg13[%c14, %c0_466] {strides = array<i32: 16, 1>} : memref<128x32xf32, #tpu.memory_space<vmem>>, vector<8x32xf32>
    %718 = arith.truncf %717 : vector<8x32xf32> to vector<8x32xbf16>
    %c14_467 = arith.constant 14 : index
    %c0_468 = arith.constant 0 : index
    %c0_469 = arith.constant 0 : index
    %719 = vector.load %arg8[%c14_467, %c0_468, %c0_469] : memref<16x16x8xbf16, #tpu.memory_space<vmem>>, vector<1x16x8xbf16>
    %720 = vector.shape_cast %719 : vector<1x16x8xbf16> to vector<16x8xbf16>
    %cst_470 = arith.constant dense<0.000000e+00> : vector<16x32xf32>
    %721 = tpu.matmul %720, %718, %cst_470 {dimension_numbers = #tpu.dot_dimension_numbers<[1], [0], [0], [1], [0, 0, 1, 1], [], []>} : vector<16x8xbf16>, vector<8x32xbf16>, vector<16x32xf32> -> vector<16x32xf32>
    %c14_471 = arith.constant 14 : index
    %c0_472 = arith.constant 0 : index
    %c0_473 = arith.constant 0 : index
    %722 = vector.load %arg9[%c14_471, %c0_472, %c0_473] : memref<16x16x1xf32, #tpu.memory_space<vmem>>, vector<1x16x1xf32>
    %723 = vector.shape_cast %722 : vector<1x16x1xf32> to vector<16x1xf32>
    %724 = vector.broadcast %723 : vector<16x1xf32> to vector<16x32xf32>
    %725 = arith.addf %721, %724 : vector<16x32xf32>
    %cst_474 = arith.constant 5.000000e-01 : f32
    %726 = vector.broadcast %cst_474 : f32 to vector<16x32xf32>
    %727 = arith.mulf %726, %725 : vector<16x32xf32>
    %cst_475 = arith.constant 4.471500e-02 : f32
    %728 = vector.broadcast %cst_475 : f32 to vector<16x32xf32>
    %729 = arith.mulf %728, %725 : vector<16x32xf32>
    %730 = arith.mulf %729, %725 : vector<16x32xf32>
    %731 = arith.mulf %730, %725 : vector<16x32xf32>
    %732 = arith.addf %725, %731 : vector<16x32xf32>
    %cst_476 = arith.constant 0.797884583 : f32
    %733 = vector.broadcast %cst_476 : f32 to vector<16x32xf32>
    %734 = arith.mulf %733, %732 : vector<16x32xf32>
    %735 = math.tanh %734 : vector<16x32xf32>
    %cst_477 = arith.constant 1.000000e+00 : f32
    %736 = vector.broadcast %cst_477 : f32 to vector<16x32xf32>
    %737 = arith.addf %736, %735 : vector<16x32xf32>
    %738 = arith.mulf %727, %737 : vector<16x32xf32>
    %739 = arith.truncf %738 : vector<16x32xf32> to vector<16x32xbf16>
    %c14_478 = arith.constant 14 : index
    %c0_479 = arith.constant 0 : index
    %c0_480 = arith.constant 0 : index
    %740 = vector.load %arg10[%c14_478, %c0_479, %c0_480] : memref<16x8x16xbf16, #tpu.memory_space<vmem>>, vector<1x8x16xbf16>
    %741 = vector.shape_cast %740 : vector<1x8x16xbf16> to vector<8x16xbf16>
    %cst_481 = arith.constant dense<0.000000e+00> : vector<8x32xf32>
    %742 = tpu.matmul %741, %739, %cst_481 {dimension_numbers = #tpu.dot_dimension_numbers<[1], [0], [0], [1], [0, 0, 1, 1], [], []>} : vector<8x16xbf16>, vector<16x32xbf16>, vector<8x32xf32> -> vector<8x32xf32>
    %c14_482 = arith.constant 14 : index
    %c0_483 = arith.constant 0 : index
    %c0_484 = arith.constant 0 : index
    %743 = vector.load %arg11[%c14_482, %c0_483, %c0_484] : memref<16x8x1xf32, #tpu.memory_space<vmem>>, vector<1x8x1xf32>
    %744 = vector.shape_cast %743 : vector<1x8x1xf32> to vector<8x1xf32>
    %745 = vector.broadcast %744 : vector<8x1xf32> to vector<8x32xf32>
    %746 = arith.addf %742, %745 : vector<8x32xf32>
    %c14_485 = arith.constant 14 : index
    %c0_486 = arith.constant 0 : index
    %c0_487 = arith.constant 0 : index
    %747 = vector.load %arg12[%c14_485, %c0_486, %c0_487] : memref<16x8x32xf32, #tpu.memory_space<vmem>>, vector<1x8x32xf32>
    %748 = vector.shape_cast %747 : vector<1x8x32xf32> to vector<8x32xf32>
    %749 = vector.shape_cast %746 : vector<8x32xf32> to vector<1x8x32xf32>
    tpu.vector_store %arg12[%c14_485, %c0_486, %c0_487], %749 {strides = array<i32>} : memref<16x8x32xf32, #tpu.memory_space<vmem>>, vector<1x8x32xf32>,
    %c15 = arith.constant 15 : index
    %c0_488 = arith.constant 0 : index
    %750 = tpu.strided_load %arg13[%c15, %c0_488] {strides = array<i32: 16, 1>} : memref<128x32xf32, #tpu.memory_space<vmem>>, vector<8x32xf32>
    %751 = arith.truncf %750 : vector<8x32xf32> to vector<8x32xbf16>
    %c15_489 = arith.constant 15 : index
    %c0_490 = arith.constant 0 : index
    %c0_491 = arith.constant 0 : index
    %752 = vector.load %arg8[%c15_489, %c0_490, %c0_491] : memref<16x16x8xbf16, #tpu.memory_space<vmem>>, vector<1x16x8xbf16>
    %753 = vector.shape_cast %752 : vector<1x16x8xbf16> to vector<16x8xbf16>
    %cst_492 = arith.constant dense<0.000000e+00> : vector<16x32xf32>
    %754 = tpu.matmul %753, %751, %cst_492 {dimension_numbers = #tpu.dot_dimension_numbers<[1], [0], [0], [1], [0, 0, 1, 1], [], []>} : vector<16x8xbf16>, vector<8x32xbf16>, vector<16x32xf32> -> vector<16x32xf32>
    %c15_493 = arith.constant 15 : index
    %c0_494 = arith.constant 0 : index
    %c0_495 = arith.constant 0 : index
    %755 = vector.load %arg9[%c15_493, %c0_494, %c0_495] : memref<16x16x1xf32, #tpu.memory_space<vmem>>, vector<1x16x1xf32>
    %756 = vector.shape_cast %755 : vector<1x16x1xf32> to vector<16x1xf32>
    %757 = vector.broadcast %756 : vector<16x1xf32> to vector<16x32xf32>
    %758 = arith.addf %754, %757 : vector<16x32xf32>
    %cst_496 = arith.constant 5.000000e-01 : f32
    %759 = vector.broadcast %cst_496 : f32 to vector<16x32xf32>
    %760 = arith.mulf %759, %758 : vector<16x32xf32>
    %cst_497 = arith.constant 4.471500e-02 : f32
    %761 = vector.broadcast %cst_497 : f32 to vector<16x32xf32>
    %762 = arith.mulf %761, %758 : vector<16x32xf32>
    %763 = arith.mulf %762, %758 : vector<16x32xf32>
    %764 = arith.mulf %763, %758 : vector<16x32xf32>
    %765 = arith.addf %758, %764 : vector<16x32xf32>
    %cst_498 = arith.constant 0.797884583 : f32
    %766 = vector.broadcast %cst_498 : f32 to vector<16x32xf32>
    %767 = arith.mulf %766, %765 : vector<16x32xf32>
    %768 = math.tanh %767 : vector<16x32xf32>
    %cst_499 = arith.constant 1.000000e+00 : f32
    %769 = vector.broadcast %cst_499 : f32 to vector<16x32xf32>
    %770 = arith.addf %769, %768 : vector<16x32xf32>
    %771 = arith.mulf %760, %770 : vector<16x32xf32>
    %772 = arith.truncf %771 : vector<16x32xf32> to vector<16x32xbf16>
    %c15_500 = arith.constant 15 : index
    %c0_501 = arith.constant 0 : index
    %c0_502 = arith.constant 0 : index
    %773 = vector.load %arg10[%c15_500, %c0_501, %c0_502] : memref<16x8x16xbf16, #tpu.memory_space<vmem>>, vector<1x8x16xbf16>
    %774 = vector.shape_cast %773 : vector<1x8x16xbf16> to vector<8x16xbf16>
    %cst_503 = arith.constant dense<0.000000e+00> : vector<8x32xf32>
    %775 = tpu.matmul %774, %772, %cst_503 {dimension_numbers = #tpu.dot_dimension_numbers<[1], [0], [0], [1], [0, 0, 1, 1], [], []>} : vector<8x16xbf16>, vector<16x32xbf16>, vector<8x32xf32> -> vector<8x32xf32>
    %c15_504 = arith.constant 15 : index
    %c0_505 = arith.constant 0 : index
    %c0_506 = arith.constant 0 : index
    %776 = vector.load %arg11[%c15_504, %c0_505, %c0_506] : memref<16x8x1xf32, #tpu.memory_space<vmem>>, vector<1x8x1xf32>
    %777 = vector.shape_cast %776 : vector<1x8x1xf32> to vector<8x1xf32>
    %778 = vector.broadcast %777 : vector<8x1xf32> to vector<8x32xf32>
    %779 = arith.addf %775, %778 : vector<8x32xf32>
    %c15_507 = arith.constant 15 : index
    %c0_508 = arith.constant 0 : index
    %c0_509 = arith.constant 0 : index
    %780 = vector.load %arg12[%c15_507, %c0_508, %c0_509] : memref<16x8x32xf32, #tpu.memory_space<vmem>>, vector<1x8x32xf32>
    %781 = vector.shape_cast %780 : vector<1x8x32xf32> to vector<8x32xf32>
    %782 = vector.shape_cast %779 : vector<8x32xf32> to vector<1x8x32xf32>
    tpu.vector_store %arg12[%c15_507, %c0_508, %c0_509], %782 {strides = array<i32>} : memref<16x8x32xf32, #tpu.memory_space<vmem>>, vector<1x8x32xf32>,
    return
  }
  func.func @transform_0(%arg0: i32) -> (i32, i32) {
    %c0_i32 = arith.constant 0 : i32
    %c0_i32_0 = arith.constant 0 : i32
    return %c0_i32, %arg0 : i32, i32
  }
  func.func @transform_1(%arg0: i32) -> (i32, i32) {
    %c0_i32 = arith.constant 0 : i32
    %c0_i32_0 = arith.constant 0 : i32
    %c0_i32_1 = arith.constant 0 : i32
    return %c0_i32, %c0_i32_0 : i32, i32
  }
  func.func @transform_2(%arg0: i32) -> (i32, i32) {
    %c0_i32 = arith.constant 0 : i32
    %c0_i32_0 = arith.constant 0 : i32
    %c0_i32_1 = arith.constant 0 : i32
    return %c0_i32, %c0_i32_0 : i32, i32
  }
  func.func @transform_3(%arg0: i32) -> (i32, i32, i32) {
    %c0_i32 = arith.constant 0 : i32
    %c0_i32_0 = arith.constant 0 : i32
    %c0_i32_1 = arith.constant 0 : i32
    %c0_i32_2 = arith.constant 0 : i32
    return %c0_i32, %c0_i32_0, %c0_i32_1 : i32, i32, i32
  }
  func.func @transform_4(%arg0: i32) -> (i32, i32, i32) {
    %c0_i32 = arith.constant 0 : i32
    %c0_i32_0 = arith.constant 0 : i32
    %c0_i32_1 = arith.constant 0 : i32
    %c0_i32_2 = arith.constant 0 : i32
    return %c0_i32, %c0_i32_0, %c0_i32_1 : i32, i32, i32
  }
  func.func @transform_5(%arg0: i32) -> (i32, i32, i32) {
    %c0_i32 = arith.constant 0 : i32
    %c0_i32_0 = arith.constant 0 : i32
    %c0_i32_1 = arith.constant 0 : i32
    %c0_i32_2 = arith.constant 0 : i32
    return %c0_i32, %c0_i32_0, %c0_i32_1 : i32, i32, i32
  }
  func.func @transform_6(%arg0: i32) -> (i32, i32, i32) {
    %c0_i32 = arith.constant 0 : i32
    %c0_i32_0 = arith.constant 0 : i32
    %c0_i32_1 = arith.constant 0 : i32
    %c0_i32_2 = arith.constant 0 : i32
    return %c0_i32, %c0_i32_0, %c0_i32_1 : i32, i32, i32
  }
  func.func @transform_7(%arg0: i32) -> (i32, i32, i32) {
    %c0_i32 = arith.constant 0 : i32
    %c0_i32_0 = arith.constant 0 : i32
    %c0_i32_1 = arith.constant 0 : i32
    %c0_i32_2 = arith.constant 0 : i32
    return %c0_i32, %c0_i32_0, %c0_i32_1 : i32, i32, i32
  }
  func.func @transform_8(%arg0: i32) -> (i32, i32, i32) {
    %c0_i32 = arith.constant 0 : i32
    %c0_i32_0 = arith.constant 0 : i32
    %c0_i32_1 = arith.constant 0 : i32
    %c0_i32_2 = arith.constant 0 : i32
    return %c0_i32, %c0_i32_0, %c0_i32_1 : i32, i32, i32
  }
  func.func @transform_9(%arg0: i32) -> (i32, i32, i32) {
    %c0_i32 = arith.constant 0 : i32
    %c0_i32_0 = arith.constant 0 : i32
    %c0_i32_1 = arith.constant 0 : i32
    %c0_i32_2 = arith.constant 0 : i32
    return %c0_i32, %c0_i32_0, %c0_i32_1 : i32, i32, i32
  }
  func.func @transform_10(%arg0: i32) -> (i32, i32, i32) {
    %c0_i32 = arith.constant 0 : i32
    %c0_i32_0 = arith.constant 0 : i32
    %c0_i32_1 = arith.constant 0 : i32
    %c0_i32_2 = arith.constant 0 : i32
    return %c0_i32, %c0_i32_0, %c0_i32_1 : i32, i32, i32
  }
  func.func @transform_11(%arg0: i32) -> (i32, i32, i32) {
    %c0_i32 = arith.constant 0 : i32
    %c0_i32_0 = arith.constant 0 : i32
    %c0_i32_1 = arith.constant 0 : i32
    return %c0_i32, %c0_i32_0, %arg0 : i32, i32, i32
  }
}

</mosaic_0001>

<bundles_post_ra>
// kernel: modern_tcn_block.2
= control target key start
LH: loop header
LB: loop body
LE: loop exit
PB: predicated region body
PF: predicated region fallthrough
CT: control target
= control target key end

     0   :  { %s1489_s24 = smov 0   ;;  %s2107_s0 = inlined_call_operand.vmem [shape: f32[128,32], index: 0, kind: input, shape index: {}]   ;;  %s2108_s1 = inlined_call_operand.vmem [shape: f32[128,5], index: 1, kind: input, shape index: {}]   ;;  %s2109_s2 = inlined_call_operand.vmem [shape: f32[128,1], index: 2, kind: input, shape index: {}]   ;;  %s2110_s3 = inlined_call_operand.vmem [shape: f32[128,1], index: 3, kind: input, shape index: {}]   ;;  %s2111_s4 = inlined_call_operand.vmem [shape: f32[128,1], index: 4, kind: input, shape index: {}]   ;;  %s2112_s5 = inlined_call_operand.vmem [shape: f32[128,32], index: 5, kind: output, shape index: {0}]   ;;  %s2113_s6 = inlined_call_operand.vmem [shape: f32[128,1], index: 6, kind: output, shape index: {1}]   ;;  %s2114_s7 = inlined_call_operand.vmem [shape: f32[128,1], index: 7, kind: output, shape index: {2}]  }
   0x1 LB: > { %s1357_s25 = sadd.s32 4294967295, %s1434_s24   ;;  %p1361_p0 = scmp.ge.s32.totalorder %s1434_s24, 1  ;;  %s1434_s24 = sphi %s1489_s24, %s18_s24  }
   0x2   : > { %p287_p1 = scmp.lt.s32.totalorder %s1434_s24, 3 }
   0x4   : > { %p288_p2 = pnand %p1361_p0, %p287_p1 }
   0x5   : > { %s1362_s26 = sshll.u32 (!%p288_p2), %s1357_s25, 3  ;;  %s1438_s8 = smov (!%p288_p2), 98  }
   0x6   : > { %291 = sbr.rel (%p288_p2) target bundleno = 685 (0x2ad), region = 40  ;;  %p350_p3 = scmp.lt.s32.totalorder (!%p288_p2), %s1362_s26, 15 }
   0x7   : > { %s1439_s9 = smov (!%p288_p2), 2   ;;  %s1440_s13 = smov (!%p288_p2), 97  }
   0x8   : > { %s1441_s14 = smov (!%p288_p2), 1   ;;  %s1445_s15 = smov (!%p288_p2), 127  }
   0x9   : > { %s1446_s16 = smov (!%p288_p2), 31   ;;  %s1447_s17 = smov (!%p288_p2), 126  }
   0xa   : > { %s1448_s18 = smov (!%p288_p2), 30  }
   0xb   : > { %v1436_v0 = vmov 0   ;;  %v1437_v1 = vmov 1   ;;  %s2116_s26 = smov (!%p350_p3, %s1362_s26), 15  ;;  %v1442_v15 = vmov 2   ;;  %v1443_v19 = vmov 3  }
   0xc   : > { %1401 = vset.pattern.permute.xlu1 %v1436_v0  ;;  %1403 = vset.pattern.permute.xlu0 %v1437_v1  ;;  %s1498_s27 = sshll.u32 %s2116_s26, 3  ;;  %v1444_v20 = vmov 4   ;;  %vm610_vm0 = vcmask 7168   ;;  %vm483_vm1 = vcmask 15360   ;;  %vm777_vm4 = vcmask 252928  }
   0xd   : > { %s353_s30 = scalar_lea.vmem %s2107_s0, %s1498_s27  ;;  %s1538_s12 = scalar_lea.vmem %s2108_s1, %s1498_s27  ;;  %vm896_vm6 = vcmask 244736   ;;  %vm1023_vm8 = vcmask 261120  }
   0xe   : > { %v1504_v2 = vld [vmem:[%s353_s30 + $0x10] sm:$0xff]  ;;  %v1506_v3 = vld [vmem:[%s353_s30] sm:$0xff]  ;;  %v1510_v4 = vld [vmem:[%s353_s30 + $0x18] sm:$0xff]  ;;  %s1695_s21 = scalar_lea.vmem %s2109_s2, %s1498_s27  ;;  %s1920_s25 = scalar_lea.vmem %s2112_s5, %s1498_s27 }
   0xf   : > { %439 = vrot.lane.b32.xlu1 %v1504_v2, %s1438_s8  ;;  %435 = vrot.lane.b32.xlu0 %v1506_v3, %s1438_s8  ;;  %v1512_v5 = vld [vmem:[%s353_s30 + $0x8] sm:$0xff]  ;;  %v1518_v7 = vld [vmem:[%s353_s30 + $0x20] sm:$0xff]  ;;  %s2028_s29 = scalar_lea.vmem %s2110_s3, %s1498_s27 }
  0x10   : > { %v1516_v6 = vld [vmem:[%s353_s30 + $0x28] sm:$0xff]  ;;  %v1522_v8 = vld [vmem:[%s353_s30 + $0x38] sm:$0xff]  ;;  %v1524_v9 = vld [vmem:[%s353_s30 + $0x30] sm:$0xff] }
  0x11   : > { %v1543_v10 = vld [vmem:[%s1538_s12 + $0x8] sm:$0xff]  ;;  %v1548_v11 = vld [vmem:[%s1538_s12 + $0x10] sm:$0xff]  ;;  %v1553_v12 = vld [vmem:[%s1538_s12 + $0x20] sm:$0xff] }
  0x12   : > { %v1558_v13 = vld [vmem:[%s1538_s12 + $0x30] sm:$0xff]  ;;  %v405_v14 = vld [vmem:[%s1538_s12] sm:$0xff]  ;;  %v408_v16 = vld [vmem:[%s1538_s12 + $0x18] sm:$0xff] }
  0x13   : > { %441 = vrot.lane.b32.xlu1 %v1510_v4, %s1438_s8  ;;  %437 = vrot.lane.b32.xlu0 %v1512_v5, %s1438_s8  ;;  %v410_v17 = vld [vmem:[%s1538_s12 + $0x28] sm:$0xff]  ;;  %v412_v18 = vld [vmem:[%s1538_s12 + $0x38] sm:$0xff]  ;;  %s2041_s12 = scalar_lea.vmem %s2113_s6, %s1498_s27 }
  0x17   : > { %445 = vrot.lane.b32.xlu1 %v1516_v6, %s1438_s8  ;;  %443 = vrot.lane.b32.xlu0 %v1518_v7, %s1438_s8 }
  0x1b   : > { %449 = vrot.lane.b32.xlu1 %v1522_v8, %s1438_s8  ;;  %447 = vrot.lane.b32.xlu0 %v1524_v9, %s1438_s8 }
  0x1f   : > { %461 = vrot.lane.b32.xlu1 %v1512_v5, %s1439_s9  ;;  %459 = vrot.lane.b32.xlu0 %v1506_v3, %s1439_s9 }
  0x23   : > { %465 = vrot.lane.b32.xlu1 %v1510_v4, %s1439_s9  ;;  %463 = vrot.lane.b32.xlu0 %v1504_v2, %s1439_s9 }
  0x27   : > { %469 = vrot.lane.b32.xlu1 %v1516_v6, %s1439_s9  ;;  %467 = vrot.lane.b32.xlu0 %v1518_v7, %s1439_s9 }
  0x2b   : > { %473 = vrot.lane.b32.xlu1 %v1522_v8, %s1439_s9  ;;  %471 = vrot.lane.b32.xlu0 %v1524_v9, %s1439_s9  ;;  %s2035_s9 = scalar_lea.vmem %s2111_s4, %s1498_s27 }
  0x2f   : > { %499 = vperm.xlu1 %1401, %v1543_v10   ;;  %564 = vrot.lane.b32.xlu0 %v1512_v5, %s1440_s13 }
  0x33   : > { %504 = vperm.xlu1 %1401, %v1548_v11   ;;  %568 = vrot.lane.b32.xlu0 %v1510_v4, %s1440_s13 }
  0x37   : > { %514 = vperm.xlu1 %1401, %v1553_v12   ;;  %572 = vrot.lane.b32.xlu0 %v1516_v6, %s1440_s13 }
  0x3b   : > { %524 = vperm.xlu1 %1401, %v1558_v13   ;;  %576 = vrot.lane.b32.xlu0 %v1522_v8, %s1440_s13 }
  0x3f   : > { %562 = vrot.lane.b32.xlu1 %v1506_v3, %s1440_s13  ;;  %588 = vrot.lane.b32.xlu0 %v1512_v5, %s1441_s14 }
  0x40   : > { %1402 = vset.pattern.permute.xlu1 %v1437_v1  ;;  %v968_v1 = vld [vmem:[%s1695_s21 + $0x8] sm:$0xff] }
  0x43   : > { %566 = vrot.lane.b32.xlu1 %v1504_v2, %s1440_s13  ;;  %592 = vrot.lane.b32.xlu0 %v1510_v4, %s1441_s14 }
  0x47   : > { %570 = vrot.lane.b32.xlu1 %v1518_v7, %s1440_s13  ;;  %596 = vrot.lane.b32.xlu0 %v1516_v6, %s1441_s14 }
  0x4b   : > { %574 = vrot.lane.b32.xlu1 %v1524_v9, %s1440_s13  ;;  %600 = vrot.lane.b32.xlu0 %v1522_v8, %s1441_s14 }
  0x4f   : > { %586 = vrot.lane.b32.xlu1 %v1506_v3, %s1441_s14  ;;  %624 = vperm.xlu0 %1403, %v1543_v10  }
  0x53   : > { %590 = vrot.lane.b32.xlu1 %v1504_v2, %s1441_s14  ;;  %636 = vperm.xlu0 %1403, %v1553_v12  }
  0x57   : > { %594 = vrot.lane.b32.xlu1 %v1518_v7, %s1441_s14  ;;  %644 = vperm.xlu0 %1403, %v1558_v13  }
  0x5b   : > { %598 = vrot.lane.b32.xlu1 %v1524_v9, %s1441_s14  ;;  %1404 = vset.pattern.permute.xlu0 %v1442_v15 }
  0x5c   : > { %682 = vperm.xlu0 %1404, %v405_v14  }
  0x5f   : > { %620 = vperm.xlu1 %1402, %v405_v14  }
  0x60   : > { %694 = vperm.xlu0 %1404, %v408_v16  }
  0x63   : > { %628 = vperm.xlu1 %1402, %v1548_v11  }
  0x64   : > { %702 = vperm.xlu0 %1404, %v410_v17  }
  0x67   : > { %632 = vperm.xlu1 %1402, %v408_v16  }
  0x68   : > { %710 = vperm.xlu0 %1404, %v412_v18  }
  0x6b   : > { %640 = vperm.xlu1 %1402, %v410_v17  }
  0x6c   : > { %1407 = vset.pattern.permute.xlu0 %v1443_v19 }
  0x6d   : > { %791 = vperm.xlu0 %1407, %v1543_v10  }
  0x6f   : > { %648 = vperm.xlu1 %1402, %v412_v18  }
  0x71   : > { %803 = vperm.xlu0 %1407, %v1553_v12  }
  0x73   : > { %1405 = vset.pattern.permute.xlu1 %v1442_v15 }
  0x74   : > { %686 = vperm.xlu1 %1405, %v1543_v10  }
  0x75   : > { %811 = vperm.xlu0 %1407, %v1558_v13  }
  0x78   : > { %690 = vperm.xlu1 %1405, %v1548_v11  }
  0x79   : > { %1408 = vset.pattern.permute.xlu0 %v1444_v20 }
  0x7a   : > { %906 = vperm.xlu0 %1408, %v405_v14  }
  0x7c   : > { %698 = vperm.xlu1 %1405, %v1553_v12  }
  0x7e   : > { %918 = vperm.xlu0 %1408, %v408_v16  }
  0x80   : > { %706 = vperm.xlu1 %1405, %v1558_v13  }
  0x81   : > { %v1589_v21 = vpop.permute.xlu1 %439  ;;  %v1591_v22 = vpop.permute.xlu0 %435 }
  0x82   : > { %926 = vperm.xlu0 %1408, %v410_v17  }
  0x84   : > { %1406 = vset.pattern.permute.xlu1 %v1443_v19  ;;  %v973_v19 = vld [vmem:[%s1695_s21 + $0x30] sm:$0xff] }
  0x85   : > { %v1593_v23 = vpop.permute.xlu1 %441  ;;  %787 = vperm.xlu1 %1406, %v405_v14   ;;  %v1595_v24 = vpop.permute.xlu0 %437 }
  0x86   : > { %934 = vperm.xlu0 %1408, %v412_v18  }
  0x89   : > { %v1597_v25 = vpop.permute.xlu1 %445  ;;  %795 = vperm.xlu1 %1406, %v1548_v11   ;;  %v1600_v26 = vpop.permute.xlu0 %443 }
  0x8a   : > { %1410 = vset.pattern.permute.xlu0 %v1436_v0 }
  0x8b   : > { %494 = vperm.xlu0 %1410, %v405_v14  }
  0x8d   : > { %799 = vperm.xlu1 %1406, %v408_v16   ;;  %v1603_v27 = vpop.permute.xlu0 %447  ;;  %v1605_v28 = vpop.permute.xlu1 %449 }
  0x8f   : > { %509 = vperm.xlu0 %1410, %v408_v16  }
  0x91   : > { %807 = vperm.xlu1 %1406, %v410_v17   ;;  %v1607_v29 = vpop.permute.xlu0 %459  ;;  %v1609_v30 = vpop.permute.xlu1 %461 }
  0x93   : > { %519 = vperm.xlu0 %1410, %v410_v17  }
  0x95   : > { %815 = vperm.xlu1 %1406, %v412_v18   ;;  %v1611_v31 = vpop.permute.xlu0 %463  ;;  %v1615_v33 = vpop.permute.xlu1 %465 }
  0x97   : > { %529 = vperm.xlu0 %1410, %v412_v18  }
  0x99   : > { %1409 = vset.pattern.permute.xlu1 %v1444_v20  ;;  %v1613_v32 = vpop.permute.xlu0 %467  ;;  %v1623_v35 = vpop.permute.xlu1 %469 }
  0x9a   : > { %910 = vperm.xlu1 %1409, %v1543_v10  }
  0x9b   : > { %731 = vrot.lane.b32.xlu0 %v1512_v5, %s1445_s15 }
  0x9d   : > { %v1619_v34 = vpop.permute.xlu0 %471  ;;  %v1631_v38 = vpop.permute.xlu1 %473 }
  0x9e   : > { %914 = vperm.xlu1 %1409, %v1548_v11  }
  0x9f   : > { %735 = vrot.lane.b32.xlu0 %v1510_v4, %s1445_s15 }
  0xa1   : > { %v1625_v36 = vpop.permute.xlu0 %564 }
  0xa2   : > { %922 = vperm.xlu1 %1409, %v1553_v12   ;;  %v413_v12 = vlaneseq }
  0xa3   : > { %739 = vrot.lane.b32.xlu0 %v1516_v6, %s1445_s15 }
  0xa4   : > { %v414_v18 = vand.u32 127, %v413_v12  ;;  %v485_v12 = vsel %vm483_vm1, %v1595_v24, %v1609_v30  ;;  %v486_v30 = vsel %vm483_vm1, %v1589_v21, %v1611_v31  ;;  %v488_v21 = vsel %vm483_vm1, %v1600_v26, %v1613_v32 }
  0xa5   : > { %v1629_v37 = vpop.permute.xlu0 %568  ;;  %v490_v26 = vsel %vm483_vm1, %v1603_v27, %v1619_v34 }
  0xa6   : > { %930 = vperm.xlu1 %1409, %v1558_v13   ;;  %v971_v13 = vld [vmem:[%s1695_s21 + $0x20] sm:$0xff] }
  0xa7   : > { %743 = vrot.lane.b32.xlu0 %v1522_v8, %s1445_s15 }
  0xa9   : > { %v1635_v39 = vpop.permute.xlu0 %572 }
  0xaa   : > { %v1637_v40 = vpop.permute.xlu1 %499  ;;  %729 = vrot.lane.b32.xlu1 %v1506_v3, %s1445_s15 }
  0xab   : > { %755 = vrot.lane.b32.xlu0 %v1512_v5, %s1446_s16  ;;  %1411 = vset.pattern.permute.xlu1 %v1436_v0 }
  0xad   : > { %v1645_v42 = vpop.permute.xlu0 %576 }
  0xae   : > { %v1642_v41 = vpop.permute.xlu1 %504  ;;  %733 = vrot.lane.b32.xlu1 %v1504_v2, %s1445_s15 }
  0xaf   : > { %759 = vrot.lane.b32.xlu0 %v1510_v4, %s1446_s16 }
  0xb1   : > { %v1652_v44 = vpop.permute.xlu0 %588 }
  0xb2   : > { %v1648_v43 = vpop.permute.xlu1 %514  ;;  %737 = vrot.lane.b32.xlu1 %v1518_v7, %s1445_s15 }
  0xb3   : > { %763 = vrot.lane.b32.xlu0 %v1516_v6, %s1446_s16 }
  0xb5   : > { %v593_v46 = vpop.permute.xlu0 %592 }
  0xb6   : > { %v1654_v45 = vpop.permute.xlu1 %524  ;;  %741 = vrot.lane.b32.xlu1 %v1524_v9, %s1445_s15  ;;  %s2051_s15 = scalar_lea.vmem %s2114_s7, %s1498_s27 }
  0xb7   : > { %767 = vrot.lane.b32.xlu0 %v1522_v8, %s1446_s16 }
  0xb9   : > { %v597_v49 = vpop.permute.xlu0 %596 }
  0xba   : > { %753 = vrot.lane.b32.xlu1 %v1506_v3, %s1446_s16  ;;  %v1659_v47 = vpop.permute.xlu1 %562 }
  0xbb   : > { %850 = vrot.lane.b32.xlu0 %v1512_v5, %s1447_s17 }
  0xbd   : > { %v1669_v51 = vpop.permute.xlu0 %600 }
  0xbe   : > { %757 = vrot.lane.b32.xlu1 %v1504_v2, %s1446_s16  ;;  %v567_v48 = vpop.permute.xlu1 %566 }
  0xbf   : > { %854 = vrot.lane.b32.xlu0 %v1510_v4, %s1447_s17 }
  0xc2   : > { %761 = vrot.lane.b32.xlu1 %v1518_v7, %s1446_s16  ;;  %v571_v50 = vpop.permute.xlu1 %570 }
  0xc3   : > { %858 = vrot.lane.b32.xlu0 %v1516_v6, %s1447_s17 }
  0xc6   : > { %765 = vrot.lane.b32.xlu1 %v1524_v9, %s1446_s16  ;;  %v575_v52 = vpop.permute.xlu1 %574 }
  0xc7   : > { %862 = vrot.lane.b32.xlu0 %v1522_v8, %s1447_s17 }
  0xca   : > { %848 = vrot.lane.b32.xlu1 %v1506_v3, %s1447_s17  ;;  %v1676_v53 = vpop.permute.xlu1 %586  ;;  %v625_v54 = vpop.permute.xlu0 %624 }
  0xcb   : > { %874 = vrot.lane.b32.xlu0 %v1512_v5, %s1448_s18 }
  0xce   : > { %852 = vrot.lane.b32.xlu1 %v1504_v2, %s1447_s17  ;;  %v591_v55 = vpop.permute.xlu1 %590  ;;  %v637_v56 = vpop.permute.xlu0 %636 }
  0xcf   : > { %878 = vrot.lane.b32.xlu0 %v1510_v4, %s1448_s18  ;;  %v613_v14 = vsel %vm610_vm0, %v567_v48, %v591_v55  ;;  %v1728_v48 = vand.u32 15, %v414_v18 }
  0xd1   : > { %v1731_v55 = vadd.s32 4294967295, %v1728_v48 }
  0xd2   : > { %856 = vrot.lane.b32.xlu1 %v1518_v7, %s1447_s17  ;;  %v595_v57 = vpop.permute.xlu1 %594  ;;  %v645_v58 = vpop.permute.xlu0 %644 }
  0xd3   : > { %v615_v59 = vsel %vm610_vm0, %v571_v50, %v595_v57  ;;  %882 = vrot.lane.b32.xlu0 %v1516_v6, %s1448_s18  ;;  %v614_v50 = vsel %vm610_vm0, %v1629_v37, %v593_v46  ;;  %v967_v46 = vld [vmem:[%s1695_s21] sm:$0xff]  ;;  %vm660_vm2 = vcmp.ge.s32.totalorder %v1731_v55, 0 }
  0xd4   : > { %v1689_v60 = vmul.f32 %v637_v56, %v615_v59  ;;  %v1741_v59 = vadd.s32 4294967294, %v1728_v48 }
  0xd6   : > { %860 = vrot.lane.b32.xlu1 %v1524_v9, %s1447_s17  ;;  %v599_v61 = vpop.permute.xlu1 %598  ;;  %vm541_vm3 = vcmp.ge.s32.totalorder %v1741_v59, 0 }
  0xd7   : > { %v617_v62 = vsel %vm610_vm0, %v575_v52, %v599_v61  ;;  %886 = vrot.lane.b32.xlu0 %v1522_v8, %s1448_s18  ;;  %v1702_v63 = vpop.permute.xlu0 %682  ;;  %v612_v61 = vsel %vm610_vm0, %v1625_v36, %v1652_v44  ;;  %v969_v36 = vld [vmem:[%s1695_s21 + $0x10] sm:$0xff] }
  0xd8   : > { %v1704_v0 = vmul.f32 %v645_v58, %v617_v62  ;;  %v616_v58 = vsel %vm610_vm0, %v1635_v39, %v597_v49  ;;  %v618_v49 = vsel %vm610_vm0, %v1645_v42, %v1669_v51 }
  0xda   : > { %872 = vrot.lane.b32.xlu1 %v1506_v3, %s1448_s18  ;;  %v1709_v10 = vpop.permute.xlu1 %620 }
  0xdb   : > { %982 = vperm.xlu0 %1410, %v968_v1   ;;  %v1711_v11 = vpop.permute.xlu0 %694  ;;  %v652_v1 = vmul.f32 %v625_v54, %v612_v61  ;;  %v970_v54 = vld [vmem:[%s1695_s21 + $0x18] sm:$0xff] }
  0xdd   : > { %v666_v24 = vsel %vm660_vm2, %v652_v1, 0.0  ;;  %v538_v1 = vmul.f32 %v1654_v45, %v490_v26 }
  0xde   : > { %876 = vrot.lane.b32.xlu1 %v1504_v2, %s1448_s18  ;;  %v629_v15 = vpop.permute.xlu1 %628 }
  0xdf   : > { %v653_v16 = vmul.f32 %v629_v15, %v613_v14  ;;  %997 = vperm.xlu0 %1410, %v971_v13   ;;  %v1717_v17 = vpop.permute.xlu0 %702  ;;  %v533_v13 = vmul.f32 %v1637_v40, %v485_v12  ;;  %v534_v40 = vmul.f32 %v1642_v41, %v486_v30  ;;  %v552_v34 = vsel %vm541_vm3, %v538_v1, 0.0 }
  0xe0   : > { %v718_v1 = vmul.f32 %v1717_v17, %v1516_v6 }
  0xe1   : > { %v547_v42 = vsel %vm541_vm3, %v533_v13, 0.0  ;;  %v548_v41 = vsel %vm541_vm3, %v534_v40, 0.0 }
  0xe2   : > { %880 = vrot.lane.b32.xlu1 %v1518_v7, %s1448_s18  ;;  %v633_v20 = vpop.permute.xlu1 %632  ;;  %v674_v15 = vadd.f32 %v666_v24, %v547_v42 }
  0xe3   : > { %v1724_v52 = vmul.f32 %v633_v20, %v614_v50  ;;  %1007 = vperm.xlu0 %1410, %v973_v19   ;;  %v1726_v56 = vpop.permute.xlu0 %710  ;;  %v667_v20 = vsel %vm660_vm2, %v653_v16, 0.0  ;;  %v536_v50 = vmul.f32 %v1648_v43, %v488_v21  ;;  %v669_v16 = vsel %vm660_vm2, %v1689_v60, 0.0 }
  0xe4   : > { %v671_v60 = vsel %vm660_vm2, %v1704_v0, 0.0  ;;  %v611_v0 = vsel %vm610_vm0, %v1659_v47, %v1676_v53  ;;  %v713_v47 = vmul.f32 %v1702_v63, %v1506_v3  ;;  %v716_v3 = vmul.f32 %v1711_v11, %v1510_v4 }
  0xe5   : > { %v550_v43 = vsel %vm541_vm3, %v536_v50, 0.0  ;;  %v679_v24 = vadd.f32 %v671_v60, %v552_v34  ;;  %v491_v11 = vsel %vm483_vm1, %v1605_v28, %v1631_v38 }
  0xe6   : > { %884 = vrot.lane.b32.xlu1 %v1524_v9, %s1448_s18  ;;  %v641_v57 = vpop.permute.xlu1 %640 }
  0xe7   : > { %v1737_v37 = vmul.f32 %v641_v57, %v616_v58  ;;  %v675_v58 = vadd.f32 %v667_v20, %v548_v41 }
  0xe8   : > { %v1746_v62 = vpop.permute.xlu0 %791 }
  0xea   : > { %977 = vperm.xlu1 %1411, %v967_v46   ;;  %v649_v39 = vpop.permute.xlu1 %648 }
  0xeb   : > { %v1756_v14 = vmul.f32 %v649_v39, %v618_v49  ;;  %v677_v39 = vadd.f32 %v669_v16, %v550_v43  ;;  %v670_v43 = vsel %vm660_vm2, %v1737_v37, 0.0 }
  0xec   : > { %v1760_v44 = vpop.permute.xlu0 %803 }
  0xee   : > { %987 = vperm.xlu1 %1411, %v969_v36  }
  0xef   : > { %v687_v51 = vpop.permute.xlu1 %686 }
  0xf0   : > { %v714_v18 = vmul.f32 %v687_v51, %v1512_v5  ;;  %v1772_v19 = vpop.permute.xlu0 %811  ;;  %v972_v5 = vld [vmem:[%s1695_s21 + $0x28] sm:$0xff] }
  0xf2   : > { %v1779_v31 = vadd.f32 %v714_v18, %v674_v15  ;;  %992 = vperm.xlu1 %1411, %v970_v54   ;;  %v651_v54 = vmul.f32 %v1709_v10, %v611_v0  ;;  %v487_v10 = vsel %vm483_vm1, %v1593_v23, %v1615_v33  ;;  %v489_v23 = vsel %vm483_vm1, %v1597_v25, %v1623_v35 }
  0xf3   : > { %v691_v57 = vpop.permute.xlu1 %690 }
  0xf4   : > { %v715_v46 = vmul.f32 %v691_v57, %v1504_v2  ;;  %v974_v2 = vld [vmem:[%s1695_s21 + $0x38] sm:$0xff]  ;;  %v665_v21 = vsel %vm660_vm2, %v651_v54, 0.0 }
  0xf5   : > { %v1789_v61 = vpop.permute.xlu0 %906 }
  0xf6   : > { %v1794_v32 = vadd.f32 %v715_v46, %v675_v58  ;;  %1002 = vperm.xlu1 %1411, %v972_v5   ;;  %v668_v5 = vsel %vm660_vm2, %v1724_v52, 0.0 }
  0xf7   : > { %v699_v12 = vpop.permute.xlu1 %698 }
  0xf8   : > { %v717_v49 = vmul.f32 %v699_v12, %v1518_v7 }
  0xf9   : > { %v1804_v13 = vpop.permute.xlu0 %918 }
  0xfa   : > { %v1806_v27 = vadd.f32 %v717_v49, %v677_v39  ;;  %1012 = vperm.xlu1 %1411, %v974_v2   ;;  %v672_v2 = vsel %vm660_vm2, %v1756_v14, 0.0  ;;  %v720_v49 = vmul.f32 %v1726_v56, %v1522_v8  ;;  %v1873_v14 = vadd.s32 1, %v1728_v48 }
  0xfb   : > { %v707_v36 = vpop.permute.xlu1 %706 }
  0xfc   : > { %v719_v45 = vmul.f32 %v707_v36, %v1524_v9  ;;  %v484_v9 = vsel %vm483_vm1, %v1591_v22, %v1607_v29  ;;  %vm828_vm5 = vcmp.lt.s32.totalorder %v1873_v14, 16 }
  0xfd   : > { %v1811_v30 = vpop.permute.xlu0 %926 }
  0xfe   : > { %v1813_v42 = vadd.f32 %v719_v45, %v679_v24 }
 0x100   : > { %v1815_v7 = vpop.permute.xlu1 %787 }
 0x101   : > { %v1817_v40 = vpop.permute.xlu0 %934 }
 0x104   : > { %v1822_v51 = vpop.permute.xlu1 %795 }
 0x106   : > { %v495_v15 = vpop.permute.xlu0 %494 }
 0x107   : > { %v532_v18 = vmul.f32 %v495_v15, %v484_v9 }
 0x108   : > { %v800_v20 = vpop.permute.xlu1 %799 }
 0x109   : > { %v546_v41 = vsel %vm541_vm3, %v532_v18, 0.0 }
 0x10a   : > { %v673_v53 = vadd.f32 %v665_v21, %v546_v41  ;;  %v510_v50 = vpop.permute.xlu0 %509 }
 0x10b   : > { %v535_v57 = vmul.f32 %v510_v50, %v487_v10 }
 0x10c   : > { %v1837_v22 = vadd.f32 %v713_v47, %v673_v53  ;;  %v808_v29 = vpop.permute.xlu1 %807 }
 0x10d   : > { %v549_v58 = vsel %vm541_vm3, %v535_v57, 0.0 }
 0x10e   : > { %v676_v63 = vadd.f32 %v668_v5, %v549_v58  ;;  %v520_v33 = vpop.permute.xlu0 %519 }
 0x10f   : > { %v537_v46 = vmul.f32 %v520_v33, %v489_v23 }
 0x110   : > { %v724_v16 = vadd.f32 %v716_v3, %v676_v63  ;;  %v816_v26 = vpop.permute.xlu1 %815 }
 0x111   : > { %v551_v52 = vsel %vm541_vm3, %v537_v46, 0.0 }
 0x112   : > { %v678_v4 = vadd.f32 %v670_v43, %v551_v52  ;;  %v530_v25 = vpop.permute.xlu0 %529 }
 0x113   : > { %v539_v35 = vmul.f32 %v530_v25, %v491_v11 }
 0x114   : > { %v726_v12 = vadd.f32 %v718_v1, %v678_v4 }
 0x115   : > { %v553_v37 = vsel %vm541_vm3, %v539_v35, 0.0  ;;  %v911_v39 = vpop.permute.xlu1 %910 }
 0x116   : > { %v680_v6 = vadd.f32 %v672_v2, %v553_v37  ;;  %v732_v17 = vpop.permute.xlu0 %731 }
 0x118   : > { %v728_v60 = vadd.f32 %v720_v49, %v680_v6 }
 0x119   : > { %v1866_v34 = vpop.permute.xlu1 %914 }
 0x11a   : > { %v736_v28 = vpop.permute.xlu0 %735 }
 0x11d   : > { %v1868_v38 = vpop.permute.xlu1 %922 }
 0x11e   : > { %v740_v36 = vpop.permute.xlu0 %739 }
 0x121   : > { %v1870_v24 = vpop.permute.xlu1 %930 }
 0x122   : > { %v744_v55 = vpop.permute.xlu0 %743 }
 0x125   : > { %v730_v59 = vpop.permute.xlu1 %729 }
 0x126   : > { %v756_v45 = vpop.permute.xlu0 %755 }
 0x127   : > { %v779_v8 = vsel %vm777_vm4, %v732_v17, %v756_v45 }
 0x128   : > { %v819_v56 = vmul.f32 %v1746_v62, %v779_v8 }
 0x129   : > { %v734_v0 = vpop.permute.xlu1 %733 }
 0x12a   : > { %v833_v54 = vsel %vm828_vm5, %v819_v56, 0.0  ;;  %v760_v9 = vpop.permute.xlu0 %759 }
 0x12b   : > { %v781_v15 = vsel %vm777_vm4, %v736_v28, %v760_v9  ;;  %v841_v18 = vadd.f32 %v833_v54, %v1779_v31 }
 0x12c   : > { %v821_v21 = vmul.f32 %v800_v20, %v781_v15 }
 0x12d   : > { %v738_v41 = vpop.permute.xlu1 %737 }
 0x12e   : > { %v835_v47 = vsel %vm828_vm5, %v821_v21, 0.0  ;;  %v764_v53 = vpop.permute.xlu0 %763 }
 0x12f   : > { %v783_v10 = vsel %vm777_vm4, %v740_v36, %v764_v53  ;;  %v1885_v50 = vadd.f32 %v835_v47, %v724_v16 }
 0x130   : > { %v823_v62 = vmul.f32 %v808_v29, %v783_v10 }
 0x131   : > { %v742_v57 = vpop.permute.xlu1 %741 }
 0x132   : > { %v837_v5 = vsel %vm828_vm5, %v823_v62, 0.0  ;;  %v768_v58 = vpop.permute.xlu0 %767 }
 0x133   : > { %v785_v3 = vsel %vm777_vm4, %v744_v55, %v768_v58  ;;  %v1890_v63 = vadd.f32 %v837_v5, %v726_v12 }
 0x134   : > { %v825_v31 = vmul.f32 %v816_v26, %v785_v3 }
 0x135   : > { %v754_v20 = vpop.permute.xlu1 %753 }
 0x136   : > { %v839_v23 = vsel %vm828_vm5, %v825_v31, 0.0  ;;  %v778_v33 = vsel %vm777_vm4, %v730_v59, %v754_v20  ;;  %v851_v46 = vpop.permute.xlu0 %850 }
 0x137   : > { %v818_v16 = vmul.f32 %v1815_v7, %v778_v33  ;;  %v1896_v29 = vadd.f32 %v839_v23, %v728_v60 }
 0x139   : > { %v832_v43 = vsel %vm828_vm5, %v818_v16, 0.0  ;;  %v758_v52 = vpop.permute.xlu1 %757 }
 0x13a   : > { %v780_v1 = vsel %vm777_vm4, %v734_v0, %v758_v52  ;;  %v855_v4 = vpop.permute.xlu0 %854  ;;  %v840_v26 = vadd.f32 %v832_v43, %v1837_v22 }
 0x13b   : > { %v820_v11 = vmul.f32 %v1822_v51, %v780_v1  ;;  %v1910_v51 = vadd.s32 2, %v1728_v48 }
 0x13d   : > { %v834_v25 = vsel %vm828_vm5, %v820_v11, 0.0  ;;  %v762_v35 = vpop.permute.xlu1 %761  ;;  %vm947_vm7 = vcmp.lt.s32.totalorder %v1910_v51, 16 }
 0x13e   : > { %v859_v12 = vpop.permute.xlu0 %858  ;;  %v842_v7 = vadd.f32 %v834_v25, %v1794_v32  ;;  %v782_v0 = vsel %vm777_vm4, %v738_v41, %v762_v35 }
 0x13f   : > { %v822_v54 = vmul.f32 %v1760_v44, %v782_v0 }
 0x141   : > { %v766_v2 = vpop.permute.xlu1 %765  ;;  %v836_v53 = vsel %vm828_vm5, %v822_v54, 0.0 }
 0x142   : > { %v1906_v37 = vpop.permute.xlu0 %862  ;;  %v844_v31 = vadd.f32 %v836_v53, %v1806_v27 }
 0x145   : > { %v849_v49 = vpop.permute.xlu1 %848 }
 0x146   : > { %v875_v6 = vpop.permute.xlu0 %874 }
 0x147   : > { %v898_v22 = vsel %vm896_vm6, %v851_v46, %v875_v6 }
 0x148   : > { %v938_v36 = vmul.f32 %v911_v39, %v898_v22 }
 0x149   : > { %v853_v17 = vpop.permute.xlu1 %852 }
 0x14a   : > { %v879_v60 = vpop.permute.xlu0 %878  ;;  %v952_v45 = vsel %vm947_vm7, %v938_v36, 0.0 }
 0x14b   : > { %v960_v56 = vadd.f32 %v952_v45, %v841_v18  ;;  %v784_v18 = vsel %vm777_vm4, %v742_v57, %v766_v2  ;;  %v900_v33 = vsel %vm896_vm6, %v855_v4, %v879_v60 }
 0x14c   : > { %v824_v44 = vmul.f32 %v1772_v19, %v784_v18  ;;  %v940_v52 = vmul.f32 %v1804_v13, %v900_v33 }
 0x14d   : > { %v857_v28 = vpop.permute.xlu1 %856 }
 0x14e   : > { %v883_v55 = vpop.permute.xlu0 %882 }
 0x14f   : > { %v902_v25 = vsel %vm896_vm6, %v859_v12, %v883_v55  ;;  %v954_v12 = vsel %vm947_vm7, %v940_v52, 0.0 }
 0x151   : > { %v861_v32 = vpop.permute.xlu1 %860 }
 0x152   : > { %v887_v59 = vpop.permute.xlu0 %886 }
 0x155   : > { %v873_v8 = vpop.permute.xlu1 %872 }
 0x156   : > { %v983_v48 = vpop.permute.xlu0 %982  ;;  %v897_v21 = vsel %vm896_vm6, %v849_v49, %v873_v8  ;;  %v904_v49 = vsel %vm896_vm6, %v1906_v37, %v887_v59 }
 0x157   : > { %v1922_v39 = vadd.f32 %v983_v48, %v960_v56  ;;  %v937_v10 = vmul.f32 %v1789_v61, %v897_v21  ;;  %v944_v22 = vmul.f32 %v1817_v40, %v904_v49 }
 0x159   : > { %1025 = vst.msk [vmem:[%s1920_s25 + $0x8] sm:$0xff] %vm1023_vm8, %v1922_v39  ;;  %v877_v9 = vpop.permute.xlu1 %876  ;;  %v1035_v15 = vsel %vm1023_vm8, %v1922_v39, 0.0  ;;  %v951_v61 = vsel %vm947_vm7, %v937_v10, 0.0 }
 0x15a   : > { %v899_v41 = vsel %vm896_vm6, %v853_v17, %v877_v9  ;;  %1036 = vadd.xlane.f32.xlu1 %v1035_v15  ;;  %v998_v20 = vpop.permute.xlu0 %997  ;;  %v959_v16 = vadd.f32 %v951_v61, %v840_v26  ;;  %v942_v26 = vmul.f32 %v1811_v30, %v902_v25  ;;  %v962_v30 = vadd.f32 %v954_v12, %v1885_v50  ;;  %v1114_v12 = vld [vmem:[%s2028_s29 + $0x8] sm:$0xff] }
 0x15b   : > { %v939_v47 = vmul.f32 %v1866_v34, %v899_v41  ;;  %v838_v34 = vsel %vm828_vm5, %v824_v44, 0.0  ;;  %v958_v50 = vsel %vm947_vm7, %v944_v22, 0.0  ;;  %v1154_v22 = vld [vmem:[%s2035_s9 + $0x8] sm:$0xff] }
 0x15c   : > { %v846_v14 = vadd.f32 %v838_v34, %v1813_v42  ;;  %v956_v37 = vsel %vm947_vm7, %v942_v26, 0.0  ;;  %v966_v40 = vadd.f32 %v958_v50, %v1896_v29 }
 0x15d   : > { %v881_v62 = vpop.permute.xlu1 %880  ;;  %v953_v5 = vsel %vm947_vm7, %v939_v47, 0.0  ;;  %v964_v55 = vadd.f32 %v956_v37, %v1890_v63 }
 0x15e   : > { %v901_v57 = vsel %vm896_vm6, %v857_v28, %v881_v62  ;;  %v961_v58 = vadd.f32 %v953_v5, %v842_v7 }
 0x15f   : > { %v941_v3 = vmul.f32 %v1868_v38, %v901_v57 }
 0x161   : > { %v955_v19 = vsel %vm947_vm7, %v941_v3, 0.0  ;;  %v885_v23 = vpop.permute.xlu1 %884 }
 0x162   : > { %v963_v46 = vadd.f32 %v955_v19, %v844_v31  ;;  %v903_v38 = vsel %vm896_vm6, %v861_v32, %v885_v23 }
 0x163   : > { %v943_v27 = vmul.f32 %v1870_v24, %v903_v38  ;;  %v1008_v24 = vpop.permute.xlu0 %1007 }
 0x164   : > { %v1019_v43 = vadd.f32 %v998_v20, %v963_v46 }
 0x165   : > { %v957_v1 = vsel %vm947_vm7, %v943_v27, 0.0  ;;  %v978_v11 = vpop.permute.xlu1 %977 }
 0x166   : > { %v965_v35 = vadd.f32 %v957_v1, %v846_v14  ;;  %v1015_v4 = vadd.f32 %v978_v11, %v959_v16  ;;  %v1044_v7 = vsel %vm1023_vm8, %v1019_v43, 0.0  ;;  %1028 = vst.msk [vmem:[%s1920_s25 + $0x20] sm:$0xff] %vm1023_vm8, %v1019_v43 }
 0x167   : > { %1045 = vadd.xlane.f32.xlu1 %v1044_v7 }
 0x168   : > { %1024 = vst.msk [vmem:[%s1920_s25] sm:$0xff] %vm1023_vm8, %v1015_v4  ;;  %v1032_v13 = vsel %vm1023_vm8, %v1015_v4, 0.0  ;;  %v1021_v42 = vadd.f32 %v1008_v24, %v965_v35 }
 0x169   : > { %v988_v2 = vpop.permute.xlu1 %987  ;;  %1033 = vadd.xlane.f32.xlu0 %v1032_v13 }
 0x16a   : > { %v1017_v6 = vadd.f32 %v988_v2, %v961_v58  ;;  %v1050_v17 = vsel %vm1023_vm8, %v1021_v42, 0.0  ;;  %1030 = vst.msk [vmem:[%s1920_s25 + $0x30] sm:$0xff] %vm1023_vm8, %v1021_v42 }
 0x16b   : > { %1051 = vadd.xlane.f32.xlu1 %v1050_v17 }
 0x16c   : > { %1026 = vst.msk [vmem:[%s1920_s25 + $0x10] sm:$0xff] %vm1023_vm8, %v1017_v6  ;;  %v1038_v60 = vsel %vm1023_vm8, %v1017_v6, 0.0 }
 0x16d   : > { %v993_v28 = vpop.permute.xlu1 %992  ;;  %1039 = vadd.xlane.f32.xlu0 %v1038_v60 }
 0x16e   : > { %v1018_v36 = vadd.f32 %v993_v28, %v962_v30 }
 0x170   : > { %1027 = vst.msk [vmem:[%s1920_s25 + $0x18] sm:$0xff] %vm1023_vm8, %v1018_v36  ;;  %v1041_v32 = vsel %vm1023_vm8, %v1018_v36, 0.0 }
 0x171   : > { %v1003_v59 = vpop.permute.xlu1 %1002  ;;  %1042 = vadd.xlane.f32.xlu0 %v1041_v32 }
 0x172   : > { %v1020_v45 = vadd.f32 %v1003_v59, %v964_v55 }
 0x174   : > { %1029 = vst.msk [vmem:[%s1920_s25 + $0x28] sm:$0xff] %vm1023_vm8, %v1020_v45  ;;  %v1047_v8 = vsel %vm1023_vm8, %v1020_v45, 0.0 }
 0x175   : > { %v1013_v56 = vpop.permute.xlu1 %1012  ;;  %1048 = vadd.xlane.f32.xlu0 %v1047_v8 }
 0x176   : > { %v1022_v0 = vadd.f32 %v1013_v56, %v966_v40 }
 0x178   : > { %1031 = vst.msk [vmem:[%s1920_s25 + $0x38] sm:$0xff] %vm1023_vm8, %v1022_v0  ;;  %v1053_v63 = vsel %vm1023_vm8, %v1022_v0, 0.0 }
 0x179   : > { %1054 = vadd.xlane.f32.xlu0 %v1053_v63 }
 0x1e3   : > { %v1037_v48 = vpop.xlane.xlu1 %1036 }
 0x1e4   : > { %v1991_v54 = vmul.f32 0.03125, %v1037_v48 }
 0x1e6   : > { %v1066_v51 = vsub.f32 %v1922_v39, %v1991_v54 }
 0x1e8   : > { %v1074_v9 = vmul.f32 %v1066_v51, %v1066_v51 }
 0x1ea   : > { %v1084_v15 = vsel %vm1023_vm8, %v1074_v9, 0.0  ;;  %v1113_v9 = vld [vmem:[%s2028_s29] sm:$0xff] }
 0x1eb   : > { %1085 = vadd.xlane.f32.xlu0 %v1084_v15 }
 0x1f0   : > { %v1046_v29 = vpop.xlane.xlu1 %1045 }
 0x1f1   : > { %v1998_v41 = vmul.f32 0.03125, %v1046_v29 }
 0x1f2   : > { %v1034_v18 = vpop.xlane.xlu0 %1033 }
 0x1f3   : > { %v1996_v21 = vmul.f32 0.03125, %v1034_v18  ;;  %v1069_v5 = vsub.f32 %v1019_v43, %v1998_v41 }
 0x1f4   : > { %v1052_v53 = vpop.xlane.xlu1 %1051 }
 0x1f5   : > { %v1065_v47 = vsub.f32 %v1015_v4, %v1996_v21  ;;  %v2004_v39 = vmul.f32 0.03125, %v1052_v53  ;;  %v1077_v20 = vmul.f32 %v1069_v5, %v1069_v5 }
 0x1f6   : > { %v1040_v44 = vpop.xlane.xlu0 %1039 }
 0x1f7   : > { %v1073_v10 = vmul.f32 %v1065_v47, %v1065_v47  ;;  %v2001_v62 = vmul.f32 0.03125, %v1040_v44  ;;  %v1071_v19 = vsub.f32 %v1021_v42, %v2004_v39  ;;  %v1093_v16 = vsel %vm1023_vm8, %v1077_v20, 0.0  ;;  %v1153_v44 = vld [vmem:[%s2035_s9] sm:$0xff] }
 0x1f8   : > { %v1117_v20 = vld [vmem:[%s2028_s29 + $0x20] sm:$0xff] }
 0x1f9   : > { %v1067_v57 = vsub.f32 %v1017_v6, %v2001_v62  ;;  %v1081_v58 = vsel %vm1023_vm8, %v1073_v10, 0.0  ;;  %v1079_v27 = vmul.f32 %v1071_v19, %v1071_v19  ;;  %v1115_v10 = vld [vmem:[%s2028_s29 + $0x10] sm:$0xff] }
 0x1fa   : > { %1082 = vadd.xlane.f32.xlu1 %v1081_v58  ;;  %v1043_v3 = vpop.xlane.xlu0 %1042 }
 0x1fb   : > { %v1075_v31 = vmul.f32 %v1067_v57, %v1067_v57  ;;  %v2008_v34 = vmul.f32 0.03125, %v1043_v3  ;;  %v1099_v35 = vsel %vm1023_vm8, %v1079_v27, 0.0  ;;  %v1157_v27 = vld [vmem:[%s2035_s9 + $0x20] sm:$0xff] }
 0x1fd   : > { %v1068_v23 = vsub.f32 %v1018_v36, %v2008_v34  ;;  %v1087_v61 = vsel %vm1023_vm8, %v1075_v31, 0.0  ;;  %v1155_v31 = vld [vmem:[%s2035_s9 + $0x10] sm:$0xff] }
 0x1fe   : > { %1088 = vadd.xlane.f32.xlu1 %v1087_v61  ;;  %v1049_v33 = vpop.xlane.xlu0 %1048 }
 0x1ff   : > { %v1076_v46 = vmul.f32 %v1068_v23, %v1068_v23  ;;  %v2013_v38 = vmul.f32 0.03125, %v1049_v33  ;;  %v1116_v23 = vld [vmem:[%s2028_s29 + $0x18] sm:$0xff] }
 0x201   : > { %v1070_v14 = vsub.f32 %v1020_v45, %v2013_v38  ;;  %v1090_v43 = vsel %vm1023_vm8, %v1076_v46, 0.0 }
 0x202   : > { %1094 = vadd.xlane.f32.xlu1 %v1093_v16  ;;  %1091 = vadd.xlane.f32.xlu0 %v1090_v43  ;;  %v1055_v52 = vpop.xlane.xlu0 %1054  ;;  %v1119_v16 = vld [vmem:[%s2028_s29 + $0x30] sm:$0xff] }
 0x203   : > { %v1078_v1 = vmul.f32 %v1070_v14, %v1070_v14  ;;  %v2018_v11 = vmul.f32 0.03125, %v1055_v52  ;;  %v1118_v52 = vld [vmem:[%s2028_s29 + $0x28] sm:$0xff] }
 0x205   : > { %v1072_v25 = vsub.f32 %v1022_v0, %v2018_v11  ;;  %v1096_v4 = vsel %vm1023_vm8, %v1078_v1, 0.0 }
 0x206   : > { %1100 = vadd.xlane.f32.xlu1 %v1099_v35  ;;  %1097 = vadd.xlane.f32.xlu0 %v1096_v4 }
 0x207   : > { %v1080_v7 = vmul.f32 %v1072_v25, %v1072_v25 }
 0x209   : > { %v1102_v24 = vsel %vm1023_vm8, %v1080_v7, 0.0 }
 0x20a   : > { %1103 = vadd.xlane.f32.xlu0 %v1102_v24 }
 0x274   : > { %v1086_v13 = vpop.xlane.xlu0 %1085 }
 0x275   : > { %v1106_v42 = vmul.f32 0.03125, %v1086_v13  ;;  %v1159_v13 = vld [vmem:[%s2035_s9 + $0x30] sm:$0xff] }
 0x277   : > { %v1122_v26 = vadd.f32 1e-05, %v1106_v42 }
 0x279   : > { %1412 = vrsqrt.f32 %v1122_v26 }
 0x283   : > { %v1083_v2 = vpop.xlane.xlu1 %1082 }
 0x284   : > { %v1105_v49 = vmul.f32 0.03125, %v1083_v2  ;;  %v1158_v2 = vld [vmem:[%s2035_s9 + $0x28] sm:$0xff] }
 0x286   : > { %v1413_v6 = vpop.eup %1412  ;;  %v1121_v17 = vadd.f32 1e-05, %v1105_v49 }
 0x287   : > { %v1138_v30 = vmul.f32 %v1413_v6, %v1114_v12  ;;  %v1089_v60 = vpop.xlane.xlu1 %1088 }
 0x288   : > { %1414 = vrsqrt.f32 %v1121_v17  ;;  %v1107_v28 = vmul.f32 0.03125, %v1089_v60 }
 0x289   : > { %1146 = vst.msk [vmem:[%s2041_s12 + $0x8] sm:$0xff] %vm610_vm0, %v1138_v30  ;;  %v1162_v37 = vmul.f32 %v1138_v30, %v1991_v54  ;;  %v1160_v30 = vld [vmem:[%s2035_s9 + $0x38] sm:$0xff] }
 0x28a   : > { %v1123_v36 = vadd.f32 1e-05, %v1107_v28 }
 0x28b   : > { %v1170_v55 = vsub.f32 %v1154_v22, %v1162_v37  ;;  %v1095_v32 = vpop.xlane.xlu1 %1094  ;;  %v1092_v59 = vpop.xlane.xlu0 %1091 }
 0x28c   : > { %1416 = vrsqrt.f32 %v1123_v36  ;;  %v1109_v50 = vmul.f32 0.03125, %v1095_v32  ;;  %v1108_v45 = vmul.f32 0.03125, %v1092_v59 }
 0x28d   : > { %1178 = vst.msk [vmem:[%s2051_s15 + $0x8] sm:$0xff] %vm610_vm0, %v1170_v55 }
 0x28e   : > { %v1125_v40 = vadd.f32 1e-05, %v1109_v50  ;;  %v1124_v8 = vadd.f32 1e-05, %v1108_v45 }
 0x28f   : > { %v1101_v56 = vpop.xlane.xlu1 %1100  ;;  %v1098_v0 = vpop.xlane.xlu0 %1097 }
 0x290   : > { %1418 = vrsqrt.f32 %v1125_v40  ;;  %v1111_v63 = vmul.f32 0.03125, %v1101_v56  ;;  %v1110_v48 = vmul.f32 0.03125, %v1098_v0 }
 0x291   : > { %1420 = vrsqrt.f32 %v1124_v8 }
 0x292   : > { %v1127_v54 = vadd.f32 1e-05, %v1111_v63  ;;  %v1126_v51 = vadd.f32 1e-05, %v1110_v48 }
 0x293   : > { %v1104_v15 = vpop.xlane.xlu0 %1103 }
 0x294   : > { %1422 = vrsqrt.f32 %v1127_v54  ;;  %v1112_v29 = vmul.f32 0.03125, %v1104_v15 }
 0x295   : > { %v1415_v18 = vpop.eup %1414  ;;  %1424 = vrsqrt.f32 %v1126_v51 }
 0x296   : > { %v1137_v47 = vmul.f32 %v1415_v18, %v1113_v9  ;;  %v1128_v53 = vadd.f32 1e-05, %v1112_v29 }
 0x298   : > { %1145 = vst.msk [vmem:[%s2041_s12] sm:$0xff] %vm610_vm0, %v1137_v47  ;;  %v1161_v5 = vmul.f32 %v1137_v47, %v1996_v21  ;;  %1426 = vrsqrt.f32 %v1128_v53 }
 0x299   : > { %v1417_v57 = vpop.eup %1416 }
 0x29a   : > { %v1169_v58 = vsub.f32 %v1153_v44, %v1161_v5  ;;  %v1139_v3 = vmul.f32 %v1417_v57, %v1115_v10 }
 0x29c   : > { %1177 = vst.msk [vmem:[%s2051_s15] sm:$0xff] %vm610_vm0, %v1169_v58  ;;  %1147 = vst.msk [vmem:[%s2041_s12 + $0x10] sm:$0xff] %vm610_vm0, %v1139_v3  ;;  %v1163_v19 = vmul.f32 %v1139_v3, %v2001_v62  ;;  %v1156_v62 = vld [vmem:[%s2035_s9 + $0x18] sm:$0xff] }
 0x29d   : > { %v1419_v21 = vpop.eup %1418 }
 0x29e   : > { %v1421_v61 = vpop.eup %1420  ;;  %v1171_v33 = vsub.f32 %v1155_v31, %v1163_v19  ;;  %v1141_v46 = vmul.f32 %v1419_v21, %v1117_v20 }
 0x29f   : > { %v1140_v14 = vmul.f32 %v1421_v61, %v1116_v23 }
 0x2a0   : > { %1179 = vst.msk [vmem:[%s2051_s15 + $0x10] sm:$0xff] %vm610_vm0, %v1171_v33  ;;  %1149 = vst.msk [vmem:[%s2041_s12 + $0x20] sm:$0xff] %vm610_vm0, %v1141_v46  ;;  %v1165_v43 = vmul.f32 %v1141_v46, %v1998_v41  ;;  %v1120_v41 = vld [vmem:[%s2028_s29 + $0x38] sm:$0xff] }
 0x2a1   : > { %v1423_v1 = vpop.eup %1422  ;;  %1148 = vst.msk [vmem:[%s2041_s12 + $0x18] sm:$0xff] %vm610_vm0, %v1140_v14  ;;  %v1164_v25 = vmul.f32 %v1140_v14, %v2008_v34 }
 0x2a2   : > { %v1425_v35 = vpop.eup %1424  ;;  %v1173_v4 = vsub.f32 %v1157_v27, %v1165_v43  ;;  %v1143_v7 = vmul.f32 %v1423_v1, %v1119_v16 }
 0x2a3   : > { %v1172_v24 = vsub.f32 %v1156_v62, %v1164_v25  ;;  %v1142_v42 = vmul.f32 %v1425_v35, %v1118_v52 }
 0x2a4   : > { %1181 = vst.msk [vmem:[%s2051_s15 + $0x20] sm:$0xff] %vm610_vm0, %v1173_v4  ;;  %1151 = vst.msk [vmem:[%s2041_s12 + $0x30] sm:$0xff] %vm610_vm0, %v1143_v7  ;;  %v1167_v26 = vmul.f32 %v1143_v7, %v2004_v39 }
 0x2a5   : > { %v1427_v34 = vpop.eup %1426  ;;  %1180 = vst.msk [vmem:[%s2051_s15 + $0x18] sm:$0xff] %vm610_vm0, %v1172_v24  ;;  %1150 = vst.msk [vmem:[%s2041_s12 + $0x28] sm:$0xff] %vm610_vm0, %v1142_v42  ;;  %v1166_v12 = vmul.f32 %v1142_v42, %v2013_v38 }
 0x2a6   : > { %v1175_v49 = vsub.f32 %v1159_v13, %v1167_v26  ;;  %v1144_v6 = vmul.f32 %v1427_v34, %v1120_v41 }
 0x2a7   : > { %v1174_v17 = vsub.f32 %v1158_v2, %v1166_v12 }
 0x2a8   : > { %1183 = vst.msk [vmem:[%s2051_s15 + $0x30] sm:$0xff] %vm610_vm0, %v1175_v49  ;;  %1152 = vst.msk [vmem:[%s2041_s12 + $0x38] sm:$0xff] %vm610_vm0, %v1144_v6  ;;  %v1168_v60 = vmul.f32 %v1144_v6, %v2018_v11 }
 0x2a9   : > { %1182 = vst.msk [vmem:[%s2051_s15 + $0x28] sm:$0xff] %vm610_vm0, %v1174_v17 }
 0x2aa   : > { %v1176_v39 = vsub.f32 %v1160_v30, %v1168_v60 }
 0x2ac   : > { %1184 = vst.msk [vmem:[%s2051_s15 + $0x38] sm:$0xff] %vm610_vm0, %v1176_v39 }
 0x2ad PF: > { %s18_s24 = sadd.s32 1, %s1434_s24  }
 0x2ae   : > { %p15_p4 = scmp.ge.s32.totalorder %s18_s24, 4  }
 0x2b0   :  { %17 = sbr.rel (!%p15_p4) target bundleno = 1 (0x1), region = 106 }

// kernel: modern_tcn_block.3
= control target key start
LH: loop header
LB: loop body
LE: loop exit
PB: predicated region body
PF: predicated region fallthrough
CT: control target
= control target key end

     0   :  { %v5159_v0 = vmov 0   ;;  %vm318_vm0 = vcmask 130048   ;;  %vm5161_vm1 = vmmov 0   ;;  %vm431_vm2 = vcmask 261120   ;;  %s6567_s2 = inlined_call_operand.vmem [shape: f32[128,1], index: 2, kind: input, shape index: {}]   ;;  %s6568_s1 = inlined_call_operand.vmem [shape: f32[128,1], index: 1, kind: input, shape index: {}]   ;;  %s6569_s3 = inlined_call_operand.vmem [shape: bf16[8,32,16], index: 3, kind: input, shape index: {}]   ;;  %s6570_s4 = inlined_call_operand.vmem [shape: f32[8,32,1], index: 4, kind: input, shape index: {}]   ;;  %s6571_s0 = inlined_call_operand.vmem [shape: f32[128,32], index: 0, kind: input, shape index: {}]   ;;  %s6572_s6 = inlined_call_operand.vmem [shape: f32[8,16,1], index: 6, kind: input, shape index: {}]   ;;  %s6573_s8 = inlined_call_operand.vmem [shape: f32[16,16,1], index: 8, kind: input, shape index: {}]   ;;  %s6574_s10 = inlined_call_operand.vmem [shape: f32[16,8,1], index: 10, kind: input, shape index: {}]   ;;  %s6575_s5 = inlined_call_operand.vmem [shape: bf16[8,16,32], index: 5, kind: input, shape index: {}]   ;;  %s6576_s7 = inlined_call_operand.vmem [shape: bf16[16,16,8], index: 7, kind: input, shape index: {}]   ;;  %s6577_s9 = inlined_call_operand.vmem [shape: bf16[16,8,16], index: 9, kind: input, shape index: {}]   ;;  %s6578_s11 = inlined_call_operand.vmem [shape: f32[16,8,32], index: 11, kind: output, shape index: {}]  }
   0x1   :  { %4990 = vset.pattern.permute.xlu1 %v5159_v0  ;;  %4989 = vset.pattern.permute.xlu0 %v5159_v0  ;;  %v167_v1 = vld [vmem:[%s6567_s2] sm:$0xff]  ;;  %v168_v3 = vld [vmem:[%s6567_s2 + $0x8] sm:$0xff]  ;;  %v58_v5 = vld [vmem:[%s6568_s1 + $0x18] sm:$0xff]  ;;  %vm1916_vm3 = vcmask 1043456   ;;  %vm1912_vm4 = vcmask 64512  }
   0x2   :  { %v55_v2 = vld [vmem:[%s6568_s1] sm:$0xff]  ;;  %185 = vperm.xlu1 %4990, %v167_v1   ;;  %v56_v4 = vld [vmem:[%s6568_s1 + $0x8] sm:$0xff]  ;;  %v57_v6 = vld [vmem:[%s6568_s1 + $0x10] sm:$0xff] }
   0x3   :  { %73 = vperm.xlu0 %4989, %v55_v2   ;;  %v170_v7 = vld [vmem:[%s6567_s2 + $0x18] sm:$0xff]  ;;  %v169_v8 = vld [vmem:[%s6567_s2 + $0x10] sm:$0xff]  ;;  %v60_v9 = vld [vmem:[%s6568_s1 + $0x28] sm:$0xff] }
   0x4   :  { %v59_v10 = vld [vmem:[%s6568_s1 + $0x20] sm:$0xff]  ;;  %v172_v11 = vld [vmem:[%s6567_s2 + $0x28] sm:$0xff]  ;;  %v62_v13 = vld [vmem:[%s6568_s1 + $0x38] sm:$0xff] }
   0x5   :  { %v171_v12 = vld [vmem:[%s6567_s2 + $0x20] sm:$0xff]  ;;  %v61_v14 = vld [vmem:[%s6568_s1 + $0x30] sm:$0xff]  ;;  %v174_v16 = vld [vmem:[%s6567_s2 + $0x38] sm:$0xff] }
   0x6   :  { %190 = vperm.xlu1 %4990, %v168_v3   ;;  %v4991_v15 = vld [vmem:[%s6569_s3] sm:$0xff]   ;;  %v173_v17 = vld [vmem:[%s6567_s2 + $0x30] sm:$0xff]  ;;  %v64_v18 = vld [vmem:[%s6568_s1 + $0x48] sm:$0xff] }
   0x7   :  { %78 = vperm.xlu0 %4989, %v56_v4   ;;  %4684 = vmatprep.mubr.msk.bf16.mxu0 %vm318_vm0, %v4991_v15  ;;  %v63_v19 = vld [vmem:[%s6568_s1 + $0x40] sm:$0xff]  ;;  %v176_v20 = vld [vmem:[%s6567_s2 + $0x48] sm:$0xff]  ;;  %v66_v22 = vld [vmem:[%s6568_s1 + $0x58] sm:$0xff] }
   0x8   :  { %v175_v21 = vld [vmem:[%s6567_s2 + $0x40] sm:$0xff]  ;;  %v65_v23 = vld [vmem:[%s6568_s1 + $0x50] sm:$0xff]  ;;  %v178_v24 = vld [vmem:[%s6567_s2 + $0x58] sm:$0xff] }
   0x9   :  { %v177_v25 = vld [vmem:[%s6567_s2 + $0x50] sm:$0xff]  ;;  %v68_v26 = vld [vmem:[%s6568_s1 + $0x68] sm:$0xff]  ;;  %v67_v27 = vld [vmem:[%s6568_s1 + $0x60] sm:$0xff] }
   0xa   :  { %88 = vperm.xlu1 %4990, %v58_v5   ;;  %v180_v28 = vld [vmem:[%s6567_s2 + $0x68] sm:$0xff]  ;;  %v179_v29 = vld [vmem:[%s6567_s2 + $0x60] sm:$0xff]  ;;  %v70_v30 = vld [vmem:[%s6568_s1 + $0x78] sm:$0xff] }
   0xb   :  { %83 = vperm.xlu0 %4989, %v57_v6   ;;  %v69_v31 = vld [vmem:[%s6568_s1 + $0x70] sm:$0xff]  ;;  %v182_v32 = vld [vmem:[%s6567_s2 + $0x78] sm:$0xff]  ;;  %v285_v36 = vld [vmem:[%s6570_s4 + $0x8] sm:$0xff] }
   0xc   :  { %v181_v33 = vld [vmem:[%s6567_s2 + $0x70] sm:$0xff]  ;;  %v287_v34 = vld [vmem:[%s6570_s4 + $0x18] sm:$0xff]  ;;  %v284_v37 = vld [vmem:[%s6570_s4] sm:$0xff] }
   0xd   :  { %v286_v35 = vld [vmem:[%s6570_s4 + $0x10] sm:$0xff]  ;;  %v4298_v38 = vld [vmem:[%s6570_s4 + $0x38] sm:$0xff]  ;;  %v4296_v40 = vld [vmem:[%s6570_s4 + $0x28] sm:$0xff] }
   0xe   :  { %200 = vperm.xlu1 %4990, %v170_v7   ;;  %v4297_v39 = vld [vmem:[%s6570_s4 + $0x30] sm:$0xff]  ;;  %v4295_v41 = vld [vmem:[%s6570_s4 + $0x20] sm:$0xff]  ;;  %v4316_v42 = vld [vmem:[%s6570_s4 + $0x58] sm:$0xff] }
   0xf   :  { %195 = vperm.xlu0 %4989, %v169_v8   ;;  %v4315_v43 = vld [vmem:[%s6570_s4 + $0x50] sm:$0xff]  ;;  %v4314_v44 = vld [vmem:[%s6570_s4 + $0x48] sm:$0xff]  ;;  %v4313_v45 = vld [vmem:[%s6570_s4 + $0x40] sm:$0xff] }
  0x10   :  { %v4334_v46 = vld [vmem:[%s6570_s4 + $0x78] sm:$0xff]  ;;  %v4333_v47 = vld [vmem:[%s6570_s4 + $0x70] sm:$0xff]  ;;  %v4332_v48 = vld [vmem:[%s6570_s4 + $0x68] sm:$0xff] }
  0x11   :  { %v4331_v49 = vld [vmem:[%s6570_s4 + $0x60] sm:$0xff]  ;;  %v4352_v50 = vld [vmem:[%s6570_s4 + $0x98] sm:$0xff]  ;;  %v4351_v51 = vld [vmem:[%s6570_s4 + $0x90] sm:$0xff] }
  0x12   :  { %98 = vperm.xlu1 %4990, %v60_v9   ;;  %v4350_v52 = vld [vmem:[%s6570_s4 + $0x88] sm:$0xff]  ;;  %v4349_v53 = vld [vmem:[%s6570_s4 + $0x80] sm:$0xff]  ;;  %v4370_v54 = vld [vmem:[%s6570_s4 + $0xb8] sm:$0xff] }
  0x13   :  { %93 = vperm.xlu0 %4989, %v59_v10   ;;  %v4369_v55 = vld [vmem:[%s6570_s4 + $0xb0] sm:$0xff]  ;;  %v4368_v56 = vld [vmem:[%s6570_s4 + $0xa8] sm:$0xff]  ;;  %v4367_v57 = vld [vmem:[%s6570_s4 + $0xa0] sm:$0xff] }
  0x14   :  { %v4388_v58 = vld [vmem:[%s6570_s4 + $0xd8] sm:$0xff]  ;;  %v4387_v59 = vld [vmem:[%s6570_s4 + $0xd0] sm:$0xff]  ;;  %v4386_v60 = vld [vmem:[%s6570_s4 + $0xc8] sm:$0xff] }
  0x15   :  { %v4385_v61 = vld [vmem:[%s6570_s4 + $0xc0] sm:$0xff]  ;;  %v4406_v62 = vld [vmem:[%s6570_s4 + $0xf8] sm:$0xff]  ;;  %v4405_v63 = vld [vmem:[%s6570_s4 + $0xf0] sm:$0xff] }
  0x16   :  { %210 = vperm.xlu1 %4990, %v172_v11   ;;  %v4404_v0 = vld [vmem:[%s6570_s4 + $0xe8] sm:$0xff]  ;;  %v4403_v1 = vld [vmem:[%s6570_s4 + $0xe0] sm:$0xff]  ;;  %v4305_v6 = vld [vmem:[%s6572_s6 + $0x10] sm:$0xff] }
  0x17   :  { %205 = vperm.xlu0 %4989, %v171_v12   ;;  %v39_v4 = vld [vmem:[%s6571_s0] sm:$0xff]  ;;  %v40_v5 = vld [vmem:[%s6571_s0 + $0x8] sm:$0xff]  ;;  %v4341_v12 = vld [vmem:[%s6572_s6 + $0x30] sm:$0xff] }
  0x18   :  { %v414_v7 = vld [vmem:[%s6572_s6] sm:$0xff] }
  0x1a   :  { %108 = vperm.xlu1 %4990, %v62_v13   ;;  %v4323_v13 = vld [vmem:[%s6572_s6 + $0x20] sm:$0xff] }
  0x1b   :  { %103 = vperm.xlu0 %4989, %v61_v14  }
  0x1e   :  { %220 = vperm.xlu1 %4990, %v174_v16  }
  0x1f   :  { %215 = vperm.xlu0 %4989, %v173_v17   ;;  %v42_v17 = vld [vmem:[%s6571_s0 + $0x18] sm:$0xff] }
  0x22   :  { %118 = vperm.xlu1 %4990, %v64_v18  }
  0x23   :  { %113 = vperm.xlu0 %4989, %v63_v19   ;;  %v41_v19 = vld [vmem:[%s6571_s0 + $0x10] sm:$0xff] }
  0x26   :  { %230 = vperm.xlu1 %4990, %v176_v20  }
  0x27   :  { %225 = vperm.xlu0 %4989, %v175_v21   ;;  %v4377_v21 = vld [vmem:[%s6572_s6 + $0x50] sm:$0xff] }
  0x2a   :  { %128 = vperm.xlu1 %4990, %v66_v22   ;;  %v4359_v22 = vld [vmem:[%s6572_s6 + $0x40] sm:$0xff] }
  0x2b   :  { %123 = vperm.xlu0 %4989, %v65_v23  }
  0x2e   :  { %240 = vperm.xlu1 %4990, %v178_v24  }
  0x2f   :  { %235 = vperm.xlu0 %4989, %v177_v25   ;;  %v4992_v25 = vld [vmem:[%s6569_s3 + $0x8] sm:$0xff]  }
  0x32   :  { %138 = vperm.xlu1 %4990, %v68_v26  }
  0x33   :  { %133 = vperm.xlu0 %4989, %v67_v27  }
  0x36   :  { %250 = vperm.xlu1 %4990, %v180_v28   ;;  %v4993_v28 = vld [vmem:[%s6569_s3 + $0x10] sm:$0xff]  }
  0x37   :  { %245 = vperm.xlu0 %4989, %v179_v29  }
  0x3a   :  { %148 = vperm.xlu1 %4990, %v70_v30  }
  0x3b   :  { %143 = vperm.xlu0 %4989, %v69_v31   ;;  %v4413_v31 = vld [vmem:[%s6572_s6 + $0x70] sm:$0xff] }
  0x3e   :  { %260 = vperm.xlu1 %4990, %v182_v32   ;;  %v4395_v32 = vld [vmem:[%s6572_s6 + $0x60] sm:$0xff] }
  0x3f   :  { %255 = vperm.xlu0 %4989, %v181_v33  }
  0x42   :  { %305 = vperm.xlu1 %4990, %v287_v34  }
  0x43   :  { %300 = vperm.xlu0 %4989, %v286_v35   ;;  %v44_v35 = vld [vmem:[%s6571_s0 + $0x28] sm:$0xff] }
  0x46   :  { %295 = vperm.xlu1 %4990, %v285_v36  }
  0x47   :  { %290 = vperm.xlu0 %4989, %v284_v37   ;;  %v43_v37 = vld [vmem:[%s6571_s0 + $0x20] sm:$0xff] }
  0x4a   :  { %506 = vperm.xlu1 %4990, %v4298_v38   ;;  %v4306_v38 = vld [vmem:[%s6572_s6 + $0x18] sm:$0xff] }
  0x4b   :  { %501 = vperm.xlu0 %4989, %v4297_v39   ;;  %v415_v39 = vld [vmem:[%s6572_s6 + $0x8] sm:$0xff] }
  0x4e   :  { %496 = vperm.xlu1 %4990, %v4296_v40  }
  0x4f   :  { %491 = vperm.xlu0 %4989, %v4295_v41  }
  0x52   :  { %707 = vperm.xlu1 %4990, %v4316_v42   ;;  %v4994_v42 = vld [vmem:[%s6569_s3 + $0x18] sm:$0xff]  }
  0x53   :  { %702 = vperm.xlu0 %4989, %v4315_v43  }
  0x56   :  { %697 = vperm.xlu1 %4990, %v4314_v44  }
  0x57   :  { %692 = vperm.xlu0 %4989, %v4313_v45   ;;  %v4995_v45 = vld [vmem:[%s6569_s3 + $0x20] sm:$0xff]  }
  0x5a   :  { %908 = vperm.xlu1 %4990, %v4334_v46  }
  0x5b   :  { %903 = vperm.xlu0 %4989, %v4333_v47  }
  0x5e   :  { %898 = vperm.xlu1 %4990, %v4332_v48   ;;  %v4342_v48 = vld [vmem:[%s6572_s6 + $0x38] sm:$0xff] }
  0x5f   :  { %893 = vperm.xlu0 %4989, %v4331_v49   ;;  %v4324_v49 = vld [vmem:[%s6572_s6 + $0x28] sm:$0xff] }
  0x62   :  { %1109 = vperm.xlu1 %4990, %v4352_v50  }
  0x63   :  { %1104 = vperm.xlu0 %4989, %v4351_v51  }
  0x66   :  { %1099 = vperm.xlu1 %4990, %v4350_v52   ;;  %v46_v52 = vld [vmem:[%s6571_s0 + $0x38] sm:$0xff] }
  0x67   :  { %1094 = vperm.xlu0 %4989, %v4349_v53  }
  0x6a   :  { %1310 = vperm.xlu1 %4990, %v4370_v54   ;;  %v45_v54 = vld [vmem:[%s6571_s0 + $0x30] sm:$0xff] }
  0x6b   :  { %1305 = vperm.xlu0 %4989, %v4369_v55   ;;  %v4378_v55 = vld [vmem:[%s6572_s6 + $0x58] sm:$0xff] }
  0x6e   :  { %1300 = vperm.xlu1 %4990, %v4368_v56   ;;  %v4360_v56 = vld [vmem:[%s6572_s6 + $0x48] sm:$0xff] }
  0x6f   :  { %1295 = vperm.xlu0 %4989, %v4367_v57  }
  0x72   :  { %1511 = vperm.xlu1 %4990, %v4388_v58  }
  0x73   :  { %1506 = vperm.xlu0 %4989, %v4387_v59   ;;  %v4996_v59 = vld [vmem:[%s6569_s3 + $0x28] sm:$0xff]  }
  0x76   :  { %1501 = vperm.xlu1 %4990, %v4386_v60  }
  0x77   :  { %1496 = vperm.xlu0 %4989, %v4385_v61  }
  0x7a   :  { %1712 = vperm.xlu1 %4990, %v4406_v62   ;;  %v4997_v62 = vld [vmem:[%s6569_s3 + $0x30] sm:$0xff]  }
  0x7b   :  { %1707 = vperm.xlu0 %4989, %v4405_v63  }
  0x7d   :  { %v186_v2 = vpop.permute.xlu1 %185 }
  0x7e   :  { %v74_v3 = vpop.permute.xlu0 %73  ;;  %1702 = vperm.xlu1 %4990, %v4404_v0  }
  0x7f   :  { %1697 = vperm.xlu0 %4989, %v4403_v1   ;;  %v151_v8 = vmul.f32 %v74_v3, %v39_v4  ;;  %v4414_v1 = vld [vmem:[%s6572_s6 + $0x78] sm:$0xff] }
  0x81   :  { %v191_v9 = vpop.permute.xlu1 %190  ;;  %v263_v14 = vadd.f32 %v186_v2, %v151_v8  ;;  %v4396_v2 = vld [vmem:[%s6572_s6 + $0x68] sm:$0xff] }
  0x82   :  { %v79_v10 = vpop.permute.xlu0 %78  ;;  %620 = vperm.xlu1 %4990, %v4305_v6   ;;  %v1896_v8 = vld [vmem:[%s6573_s8 + $0x8] sm:$0xff] }
  0x83   :  { %v152_v11 = vmul.f32 %v79_v10, %v40_v5  ;;  %418 = vperm.xlu0 %4989, %v414_v7   ;;  %v48_v5 = vld [vmem:[%s6571_s0 + $0x48] sm:$0xff]  ;;  %v47_v7 = vld [vmem:[%s6571_s0 + $0x40] sm:$0xff] }
  0x85   :  { %v264_v15 = vadd.f32 %v191_v9, %v152_v11  ;;  %v89_v16 = vpop.permute.xlu1 %88  ;;  %v1895_v9 = vld [vmem:[%s6573_s8] sm:$0xff] }
  0x86   :  { %v84_v18 = vpop.permute.xlu0 %83  ;;  %1022 = vperm.xlu1 %4990, %v4341_v12   ;;  %v154_v23 = vmul.f32 %v89_v16, %v42_v17  ;;  %v4998_v12 = vld [vmem:[%s6569_s3 + $0x38] sm:$0xff]  }
  0x87   :  { %821 = vperm.xlu0 %4989, %v4323_v13   ;;  %v279_v20 = vpack.c.bf16 %v264_v15, %v263_v14  ;;  %v153_v24 = vmul.f32 %v84_v18, %v41_v19  ;;  %v4999_v15 = vld [vmem:[%s6569_s3 + $0x40] sm:$0xff]   ;;  %v4423_v18 = vld [vmem:[%s6573_s8 + $0x18] sm:$0xff]  ;;  %v4422_v19 = vld [vmem:[%s6573_s8 + $0x10] sm:$0xff] }
  0x89   :  { %4682 = vmatprep.subr.bf16.mxu0 %v279_v20  ;;  %v201_v26 = vpop.permute.xlu1 %200 }
  0x8a   :  { %v196_v27 = vpop.permute.xlu0 %195  ;;  %4683 = vmatpush3.bf16.msra.mxu0 %v279_v20  ;;  %v266_v29 = vadd.f32 %v201_v26, %v154_v23  ;;  %1424 = vperm.xlu1 %4990, %v4377_v21   ;;  %v4432_v26 = vld [vmem:[%s6573_s8 + $0x20] sm:$0xff] }
  0x8b   :  { %v265_v30 = vadd.f32 %v196_v27, %v153_v24  ;;  %1223 = vperm.xlu0 %4989, %v4359_v22   ;;  %v50_v22 = vld [vmem:[%s6571_s0 + $0x58] sm:$0xff]  ;;  %v49_v24 = vld [vmem:[%s6571_s0 + $0x50] sm:$0xff] }
  0x8d   :  { %v478_v33 = vpack.c.bf16 %v266_v29, %v265_v30  ;;  %4685 = vmatmul.mubr.msk.bf16.vlgmr.msra.gmra.mxu0 %vm318_vm0, %v4992_v25  ;;  %v99_v34 = vpop.permute.xlu1 %98  ;;  %v4433_v25 = vld [vmem:[%s6573_s8 + $0x28] sm:$0xff] }
  0x8e   :  { %v94_v36 = vpop.permute.xlu0 %93  ;;  %4698 = vmatprep.mubr.msk.bf16.mxu0 %vm318_vm0, %v4993_v28  ;;  %1826 = vperm.xlu1 %4990, %v4413_v31   ;;  %v156_v40 = vmul.f32 %v99_v34, %v44_v35  ;;  %v5000_v29 = vld [vmem:[%s6569_s3 + $0x48] sm:$0xff]   ;;  %v4443_v35 = vld [vmem:[%s6573_s8 + $0x38] sm:$0xff] }
  0x8f   :  { %1625 = vperm.xlu0 %4989, %v4395_v32   ;;  %4696 = vmatprep.subr.bf16.mxu0 %v478_v33  ;;  %v155_v41 = vmul.f32 %v94_v36, %v43_v37  ;;  %v5001_v32 = vld [vmem:[%s6569_s3 + $0x50] sm:$0xff]  }
  0x90   :  { %4697 = vmatpush3.bf16.msra.mxu0 %v478_v33  ;;  %v4442_v36 = vld [vmem:[%s6573_s8 + $0x30] sm:$0xff] }
  0x91   :  { %v211_v43 = vpop.permute.xlu1 %210 }
  0x92   :  { %v206_v44 = vpop.permute.xlu0 %205  ;;  %v268_v46 = vadd.f32 %v211_v43, %v156_v40  ;;  %625 = vperm.xlu1 %4990, %v4306_v38   ;;  %v4452_v43 = vld [vmem:[%s6573_s8 + $0x40] sm:$0xff] }
  0x93   :  { %v267_v47 = vadd.f32 %v206_v44, %v155_v41  ;;  %423 = vperm.xlu0 %4989, %v415_v39   ;;  %v52_v39 = vld [vmem:[%s6571_s0 + $0x68] sm:$0xff]  ;;  %v51_v41 = vld [vmem:[%s6571_s0 + $0x60] sm:$0xff] }
  0x95   :  { %v679_v50 = vpack.c.bf16 %v268_v46, %v267_v47  ;;  %4699 = vmatmul.mubr.msk.bf16.vlgmr.msra.gmra.mxu0 %vm318_vm0, %v4994_v42  ;;  %v109_v51 = vpop.permute.xlu1 %108  ;;  %v4453_v42 = vld [vmem:[%s6573_s8 + $0x48] sm:$0xff]  ;;  %v5002_v46 = vld [vmem:[%s6569_s3 + $0x58] sm:$0xff]  }
  0x96   :  { %v104_v53 = vpop.permute.xlu0 %103  ;;  %4712 = vmatprep.mubr.msk.bf16.mxu0 %vm318_vm0, %v4995_v45  ;;  %1027 = vperm.xlu1 %4990, %v4342_v48   ;;  %v158_v57 = vmul.f32 %v109_v51, %v46_v52  ;;  %v4463_v52 = vld [vmem:[%s6573_s8 + $0x58] sm:$0xff] }
  0x97   :  { %826 = vperm.xlu0 %4989, %v4324_v49   ;;  %4710 = vmatprep.subr.bf16.mxu0 %v679_v50  ;;  %v157_v58 = vmul.f32 %v104_v53, %v45_v54  ;;  %v5003_v49 = vld [vmem:[%s6569_s3 + $0x60] sm:$0xff]   ;;  %v4462_v53 = vld [vmem:[%s6573_s8 + $0x50] sm:$0xff] }
  0x98   :  { %4711 = vmatpush3.bf16.msra.mxu0 %v679_v50 }
  0x99   :  { %v221_v60 = vpop.permute.xlu1 %220 }
  0x9a   :  { %v216_v61 = vpop.permute.xlu0 %215  ;;  %v270_v63 = vadd.f32 %v221_v60, %v158_v57  ;;  %1429 = vperm.xlu1 %4990, %v4378_v55   ;;  %v4472_v60 = vld [vmem:[%s6573_s8 + $0x60] sm:$0xff] }
  0x9b   :  { %v269_v0 = vadd.f32 %v216_v61, %v157_v58  ;;  %1228 = vperm.xlu0 %4989, %v4360_v56   ;;  %v54_v56 = vld [vmem:[%s6571_s0 + $0x78] sm:$0xff]  ;;  %v53_v58 = vld [vmem:[%s6571_s0 + $0x70] sm:$0xff] }
  0x9d   :  { %v880_v3 = vpack.c.bf16 %v270_v63, %v269_v0  ;;  %4713 = vmatmul.mubr.msk.bf16.vlgmr.msra.gmra.mxu0 %vm318_vm0, %v4996_v59  ;;  %v119_v4 = vpop.permute.xlu1 %118  ;;  %v4473_v59 = vld [vmem:[%s6573_s8 + $0x68] sm:$0xff] }
  0x9e   :  { %v114_v6 = vpop.permute.xlu0 %113  ;;  %4726 = vmatprep.mubr.msk.bf16.mxu0 %vm318_vm0, %v4997_v62  ;;  %1831 = vperm.xlu1 %4990, %v4414_v1   ;;  %v160_v10 = vmul.f32 %v119_v4, %v48_v5  ;;  %v5004_v63 = vld [vmem:[%s6569_s3 + $0x68] sm:$0xff]   ;;  %v4483_v5 = vld [vmem:[%s6573_s8 + $0x78] sm:$0xff] }
  0x9f   :  { %1630 = vperm.xlu0 %4989, %v4396_v2   ;;  %4724 = vmatprep.subr.bf16.mxu0 %v880_v3  ;;  %v159_v11 = vmul.f32 %v114_v6, %v47_v7  ;;  %v5005_v2 = vld [vmem:[%s6569_s3 + $0x70] sm:$0xff]  }
  0xa0   :  { %4725 = vmatpush3.bf16.msra.mxu0 %v880_v3  ;;  %v4482_v6 = vld [vmem:[%s6573_s8 + $0x70] sm:$0xff] }
  0xa1   :  { %v231_v13 = vpop.permute.xlu1 %230 }
  0xa2   :  { %v226_v14 = vpop.permute.xlu0 %225  ;;  %v272_v16 = vadd.f32 %v231_v13, %v160_v10  ;;  %1904 = vperm.xlu1 %4990, %v1896_v8   ;;  %v4493_v8 = vld [vmem:[%s6573_s8 + $0x88] sm:$0xff]  ;;  %v5006_v10 = vld [vmem:[%s6569_s3 + $0x78] sm:$0xff]  }
  0xa3   :  { %v271_v17 = vadd.f32 %v226_v14, %v159_v11  ;;  %1899 = vperm.xlu0 %4989, %v1895_v9   ;;  %v4492_v9 = vld [vmem:[%s6573_s8 + $0x80] sm:$0xff]  ;;  %v4503_v11 = vld [vmem:[%s6573_s8 + $0x98] sm:$0xff]  ;;  %v4513_v13 = vld [vmem:[%s6573_s8 + $0xa8] sm:$0xff] }
  0xa4   :  { %v4512_v14 = vld [vmem:[%s6573_s8 + $0xa0] sm:$0xff] }
  0xa5   :  { %v1081_v20 = vpack.c.bf16 %v272_v16, %v271_v17  ;;  %4727 = vmatmul.mubr.msk.bf16.vlgmr.msra.gmra.mxu0 %vm318_vm0, %v4998_v12  ;;  %v129_v21 = vpop.permute.xlu1 %128  ;;  %v4502_v12 = vld [vmem:[%s6573_s8 + $0x90] sm:$0xff]  ;;  %v4533_v17 = vld [vmem:[%s6573_s8 + $0xc8] sm:$0xff] }
  0xa6   :  { %v124_v23 = vpop.permute.xlu0 %123  ;;  %4740 = vmatprep.mubr.msk.bf16.mxu0 %vm318_vm0, %v4999_v15  ;;  %2053 = vperm.xlu1 %4990, %v4423_v18   ;;  %v162_v27 = vmul.f32 %v129_v21, %v50_v22  ;;  %v4523_v15 = vld [vmem:[%s6573_s8 + $0xb8] sm:$0xff]  ;;  %v4522_v16 = vld [vmem:[%s6573_s8 + $0xb0] sm:$0xff]  ;;  %v4532_v18 = vld [vmem:[%s6573_s8 + $0xc0] sm:$0xff] }
  0xa7   :  { %2048 = vperm.xlu0 %4989, %v4422_v19   ;;  %4738 = vmatprep.subr.bf16.mxu0 %v1081_v20  ;;  %v161_v28 = vmul.f32 %v124_v23, %v49_v24  ;;  %v4543_v19 = vld [vmem:[%s6573_s8 + $0xd8] sm:$0xff]  ;;  %v4553_v21 = vld [vmem:[%s6573_s8 + $0xe8] sm:$0xff]  ;;  %v4552_v22 = vld [vmem:[%s6573_s8 + $0xe0] sm:$0xff] }
  0xa8   :  { %4739 = vmatpush3.bf16.msra.mxu0 %v1081_v20  ;;  %v4542_v20 = vld [vmem:[%s6573_s8 + $0xd0] sm:$0xff]  ;;  %v4563_v23 = vld [vmem:[%s6573_s8 + $0xf8] sm:$0xff] }
  0xa9   :  { %v241_v30 = vpop.permute.xlu1 %240  ;;  %v4562_v24 = vld [vmem:[%s6573_s8 + $0xf0] sm:$0xff] }
  0xaa   :  { %v236_v31 = vpop.permute.xlu0 %235  ;;  %v274_v33 = vadd.f32 %v241_v30, %v162_v27  ;;  %2203 = vperm.xlu1 %4990, %v4433_v25   ;;  %v4427_v25 = vld [vmem:[%s6574_s10 + $0x8] sm:$0xff]  ;;  %v4447_v27 = vld [vmem:[%s6574_s10 + $0x18] sm:$0xff]  ;;  %v4457_v30 = vld [vmem:[%s6574_s10 + $0x20] sm:$0xff] }
  0xab   :  { %v273_v34 = vadd.f32 %v236_v31, %v161_v28  ;;  %2198 = vperm.xlu0 %4989, %v4432_v26   ;;  %v1981_v26 = vld [vmem:[%s6574_s10] sm:$0xff]  ;;  %v4437_v28 = vld [vmem:[%s6574_s10 + $0x10] sm:$0xff]  ;;  %v4487_v31 = vld [vmem:[%s6574_s10 + $0x38] sm:$0xff] }
  0xad   :  { %v1282_v37 = vpack.c.bf16 %v274_v33, %v273_v34  ;;  %4741 = vmatmul.mubr.msk.bf16.vlgmr.msra.gmra.mxu0 %vm318_vm0, %v5000_v29  ;;  %v139_v38 = vpop.permute.xlu1 %138  ;;  %v4467_v29 = vld [vmem:[%s6574_s10 + $0x28] sm:$0xff]  ;;  %v4497_v34 = vld [vmem:[%s6574_s10 + $0x40] sm:$0xff] }
  0xae   :  { %v134_v40 = vpop.permute.xlu0 %133  ;;  %4754 = vmatprep.mubr.msk.bf16.mxu0 %vm318_vm0, %v5001_v32  ;;  %2353 = vperm.xlu1 %4990, %v4443_v35   ;;  %v164_v44 = vmul.f32 %v139_v38, %v52_v39  ;;  %v4477_v32 = vld [vmem:[%s6574_s10 + $0x30] sm:$0xff]  ;;  %v4507_v33 = vld [vmem:[%s6574_s10 + $0x48] sm:$0xff]  ;;  %v5160_v35 = vmov 0.0   ;;  %v4537_v39 = vld [vmem:[%s6574_s10 + $0x60] sm:$0xff] }
  0xaf   :  { %2348 = vperm.xlu0 %4989, %v4442_v36   ;;  %4752 = vmatprep.subr.bf16.mxu0 %v1282_v37  ;;  %v163_v45 = vmul.f32 %v134_v40, %v51_v41  ;;  %v4527_v36 = vld [vmem:[%s6574_s10 + $0x58] sm:$0xff]  ;;  %v4547_v38 = vld [vmem:[%s6574_s10 + $0x68] sm:$0xff]  ;;  %v4557_v41 = vld [vmem:[%s6574_s10 + $0x70] sm:$0xff] }
  0xb0   :  { %4753 = vmatpush3.bf16.msra.mxu0 %v1282_v37  ;;  %4688 = vmatprep.subr.bf16.mxu1 %v5160_v35  ;;  %v4517_v37 = vld [vmem:[%s6574_s10 + $0x50] sm:$0xff]  ;;  %v4567_v40 = vld [vmem:[%s6574_s10 + $0x78] sm:$0xff] }
  0xb1   :  { %v251_v47 = vpop.permute.xlu1 %250  ;;  %4692 = vmatprep.mubr.msk.bf16.mxu1 %vm5161_vm1, %v5160_v35 }
  0xb2   :  { %v246_v48 = vpop.permute.xlu0 %245  ;;  %v276_v50 = vadd.f32 %v251_v47, %v164_v44  ;;  %2503 = vperm.xlu1 %4990, %v4453_v42  }
  0xb3   :  { %v275_v51 = vadd.f32 %v246_v48, %v163_v45  ;;  %2498 = vperm.xlu0 %4989, %v4452_v43  }
  0xb5   :  { %v1483_v54 = vpack.c.bf16 %v276_v50, %v275_v51  ;;  %4755 = vmatmul.mubr.msk.bf16.vlgmr.msra.gmra.mxu0 %vm318_vm0, %v5002_v46  ;;  %v149_v55 = vpop.permute.xlu1 %148 }
  0xb6   :  { %v144_v57 = vpop.permute.xlu0 %143  ;;  %4768 = vmatprep.mubr.msk.bf16.mxu0 %vm318_vm0, %v5003_v49  ;;  %2653 = vperm.xlu1 %4990, %v4463_v52   ;;  %v166_v61 = vmul.f32 %v149_v55, %v54_v56 }
  0xb7   :  { %2648 = vperm.xlu0 %4989, %v4462_v53   ;;  %4766 = vmatprep.subr.bf16.mxu0 %v1483_v54  ;;  %v165_v62 = vmul.f32 %v144_v57, %v53_v58 }
  0xb8   :  { %4767 = vmatpush3.bf16.msra.mxu0 %v1483_v54 }
  0xb9   :  { %v261_v0 = vpop.permute.xlu1 %260 }
  0xba   :  { %v256_v1 = vpop.permute.xlu0 %255  ;;  %v278_v3 = vadd.f32 %v261_v0, %v166_v61  ;;  %2803 = vperm.xlu1 %4990, %v4473_v59  }
  0xbb   :  { %v277_v4 = vadd.f32 %v256_v1, %v165_v62  ;;  %2798 = vperm.xlu0 %4989, %v4472_v60  }
  0xbd   :  { %v1684_v7 = vpack.c.bf16 %v278_v3, %v277_v4  ;;  %4769 = vmatmul.mubr.msk.bf16.vlgmr.msra.gmra.mxu0 %vm318_vm0, %v5004_v63  ;;  %v306_v43 = vpop.permute.xlu1 %305 }
  0xbe   :  { %4782 = vmatprep.mubr.msk.bf16.mxu0 %vm318_vm0, %v5005_v2  ;;  %2953 = vperm.xlu1 %4990, %v4483_v5   ;;  %v301_v42 = vpop.permute.xlu0 %300 }
  0xbf   :  { %2948 = vperm.xlu0 %4989, %v4482_v6   ;;  %4780 = vmatprep.subr.bf16.mxu0 %v1684_v7 }
  0xc0   :  { %4781 = vmatpush3.bf16.msra.mxu0 %v1684_v7 }
  0xc1   :  { %4794 = vmatprep.subr.bf16.mxu0 %v5160_v35  ;;  %v296_v45 = vpop.permute.xlu1 %295 }
  0xc2   :  { %3103 = vperm.xlu1 %4990, %v4493_v8   ;;  %v291_v44 = vpop.permute.xlu0 %290 }
  0xc3   :  { %3098 = vperm.xlu0 %4989, %v4492_v9  }
  0xc5   :  { %4783 = vmatmul.mubr.msk.bf16.vlgmr.msra.gmra.mxu0 %vm318_vm0, %v5006_v10  ;;  %v507_v47 = vpop.permute.xlu1 %506 }
  0xc6   :  { %3253 = vperm.xlu1 %4990, %v4503_v11   ;;  %4796 = vmatprep.mubr.msk.bf16.mxu0 %vm5161_vm1, %v5160_v35  ;;  %v502_v46 = vpop.permute.xlu0 %501 }
  0xc7   :  { %3248 = vperm.xlu0 %4989, %v4502_v12  }
  0xc9   :  { %v497_v49 = vpop.permute.xlu1 %496 }
  0xca   :  { %3403 = vperm.xlu1 %4990, %v4513_v13   ;;  %v492_v48 = vpop.permute.xlu0 %491 }
  0xcb   :  { %3398 = vperm.xlu0 %4989, %v4512_v14  }
  0xcd   :  { %v5724_v53 = vpop.permute.xlu1 %707 }
  0xce   :  { %3553 = vperm.xlu1 %4990, %v4523_v15   ;;  %v703_v50 = vpop.permute.xlu0 %702 }
  0xcf   :  { %3548 = vperm.xlu0 %4989, %v4522_v16  }
  0xd1   :  { %v5728_v2 = vpop.permute.xlu1 %697 }
  0xd2   :  { %3703 = vperm.xlu1 %4990, %v4533_v17   ;;  %v5726_v55 = vpop.permute.xlu0 %692 }
  0xd3   :  { %3698 = vperm.xlu0 %4989, %v4532_v18  }
  0xd6   :  { %3853 = vperm.xlu1 %4990, %v4543_v19   ;;  %v5730_v5 = vpop.permute.xlu0 %903 }
  0xd7   :  { %3848 = vperm.xlu0 %4989, %v4542_v20  }
  0xda   :  { %4003 = vperm.xlu1 %4990, %v4553_v21  }
  0xdb   :  { %3998 = vperm.xlu0 %4989, %v4552_v22  }
  0xde   :  { %4153 = vperm.xlu1 %4990, %v4563_v23  }
  0xdf   :  { %4148 = vperm.xlu0 %4989, %v4562_v24   ;;  %v5734_v24 = vpop.permute.xlu1 %908 }
  0xe2   :  { %2133 = vperm.xlu1 %4990, %v4427_v25  }
  0xe3   :  { %1984 = vperm.xlu0 %4989, %v1981_v26  }
  0xe6   :  { %2433 = vperm.xlu1 %4990, %v4447_v27  }
  0xe7   :  { %2283 = vperm.xlu0 %4989, %v4437_v28  }
  0xea   :  { %2733 = vperm.xlu1 %4990, %v4467_v29   ;;  %v5740_v29 = vpop.permute.xlu0 %893 }
  0xeb   :  { %2583 = vperm.xlu0 %4989, %v4457_v30  }
  0xee   :  { %3033 = vperm.xlu1 %4990, %v4487_v31  }
  0xef   :  { %2883 = vperm.xlu0 %4989, %v4477_v32  }
  0xf2   :  { %3333 = vperm.xlu1 %4990, %v4507_v33  }
  0xf3   :  { %3183 = vperm.xlu0 %4989, %v4497_v34  }
  0xf6   :  { %3633 = vperm.xlu1 %4990, %v4527_v36  }
  0xf7   :  { %3483 = vperm.xlu0 %4989, %v4517_v37  }
  0xfa   :  { %3933 = vperm.xlu1 %4990, %v4547_v38  }
  0xfb   :  { %3783 = vperm.xlu0 %4989, %v4537_v39  }
  0xfe   :  { %4233 = vperm.xlu1 %4990, %v4567_v40  }
  0xff   :  { %4083 = vperm.xlu0 %4989, %v4557_v41  }
 0x14d   :  { %v4686_v51 = vpop.f32.mrf.mxu0 }
 0x14e   :  { %v368_v52 = vadd.f32 %v4686_v51, %v301_v42 }
 0x14f   :  { %v359_v54 = vpop.f32.mrf.mxu0 }
 0x150   :  { %v380_v56 = vmul.f32 0.044715, %v368_v52  ;;  %v360_v57 = vadd.f32 %v359_v54, %v291_v44  ;;  %v5732_v17 = vmul.f32 0.5, %v368_v52  ;;  %v899_v54 = vpop.permute.xlu1 %898 }
 0x151   :  { %v4687_v58 = vpop.f32.mrf.mxu0 }
 0x152   :  { %v384_v59 = vmul.f32 %v380_v56, %v368_v52  ;;  %v378_v60 = vmul.f32 0.044715, %v360_v57  ;;  %v371_v61 = vadd.f32 %v4687_v58, %v306_v43  ;;  %v5738_v28 = vmul.f32 0.5, %v360_v57 }
 0x153   :  { %v362_v62 = vpop.f32.mrf.mxu0 }
 0x154   :  { %v382_v63 = vmul.f32 %v378_v60, %v360_v57  ;;  %v381_v0 = vmul.f32 0.044715, %v371_v61  ;;  %v363_v1 = vadd.f32 %v362_v62, %v296_v45  ;;  %v388_v4 = vmul.f32 %v384_v59, %v368_v52  ;;  %v5751_v60 = vpop.permute.xlu0 %1104 }
 0x155   :  { %v4700_v3 = vpop.f32.mrf.mxu0  ;;  %v5736_v26 = vmul.f32 0.5, %v371_v61 }
 0x156   :  { %v386_v6 = vmul.f32 %v382_v63, %v360_v57  ;;  %v385_v7 = vmul.f32 %v381_v0, %v371_v61  ;;  %v379_v8 = vmul.f32 0.044715, %v363_v1  ;;  %v568_v9 = vadd.f32 %v4700_v3, %v502_v46 }
 0x157   :  { %v559_v10 = vpop.f32.mrf.mxu0  ;;  %v392_v11 = vadd.f32 %v388_v4, %v368_v52  ;;  %v5742_v37 = vmul.f32 0.5, %v363_v1 }
 0x158   :  { %v383_v12 = vmul.f32 %v379_v8, %v363_v1  ;;  %v580_v13 = vmul.f32 0.044715, %v568_v9  ;;  %v560_v14 = vadd.f32 %v559_v10, %v492_v48  ;;  %v389_v15 = vmul.f32 %v385_v7, %v371_v61 }
 0x159   :  { %v4701_v16 = vpop.f32.mrf.mxu0  ;;  %v396_v18 = vmul.f32 0.7978846, %v392_v11  ;;  %v390_v19 = vadd.f32 %v386_v6, %v360_v57  ;;  %v5744_v46 = vmul.f32 0.5, %v568_v9 }
 0x15a   :  { %v387_v20 = vmul.f32 %v383_v12, %v363_v1  ;;  %v584_v21 = vmul.f32 %v580_v13, %v568_v9  ;;  %v578_v22 = vmul.f32 0.044715, %v560_v14  ;;  %v571_v23 = vadd.f32 %v4701_v16, %v507_v47 }
 0x15b   :  { %v562_v25 = vpop.f32.mrf.mxu0  ;;  %v393_v27 = vadd.f32 %v389_v15, %v371_v61  ;;  %5031 = vtanh.f32 %v396_v18  ;;  %v394_v39 = vmul.f32 0.7978846, %v390_v19  ;;  %v5746_v47 = vmul.f32 0.5, %v560_v14  ;;  %v1110_v15 = vpop.permute.xlu1 %1109 }
 0x15c   :  { %v588_v30 = vmul.f32 %v584_v21, %v568_v9  ;;  %v582_v31 = vmul.f32 %v578_v22, %v560_v14  ;;  %v581_v32 = vmul.f32 0.044715, %v571_v23  ;;  %v563_v33 = vadd.f32 %v562_v25, %v497_v49  ;;  %v1095_v21 = vpop.permute.xlu0 %1094 }
 0x15d   :  { %v4714_v34 = vpop.f32.mrf.mxu0  ;;  %v397_v36 = vmul.f32 0.7978846, %v393_v27  ;;  %v391_v38 = vadd.f32 %v387_v20, %v363_v1  ;;  %v5753_v63 = vmul.f32 0.5, %v571_v23 }
 0x15e   :  { %v592_v40 = vadd.f32 %v588_v30, %v568_v9  ;;  %v586_v41 = vmul.f32 %v582_v31, %v560_v14  ;;  %v585_v42 = vmul.f32 %v581_v32, %v571_v23  ;;  %v579_v43 = vmul.f32 0.044715, %v563_v33 }
 0x15f   :  { %v769_v44 = vadd.f32 %v4714_v34, %v703_v50  ;;  %v760_v45 = vpop.f32.mrf.mxu0  ;;  %5033 = vtanh.f32 %v397_v36  ;;  %v395_v52 = vmul.f32 0.7978846, %v391_v38  ;;  %v5759_v6 = vmul.f32 0.5, %v563_v33 }
 0x160   :  { %v590_v48 = vadd.f32 %v586_v41, %v560_v14  ;;  %v589_v51 = vmul.f32 %v585_v42, %v571_v23  ;;  %v583_v49 = vmul.f32 %v579_v43, %v563_v33  ;;  %v596_v56 = vmul.f32 0.7978846, %v592_v40 }
 0x161   :  { %v781_v57 = vmul.f32 0.044715, %v769_v44  ;;  %v5749_v58 = vadd.f32 %v760_v45, %v5726_v55  ;;  %v4715_v59 = vpop.f32.mrf.mxu0  ;;  %5035 = vtanh.f32 %v394_v39  ;;  %v5786_v41 = vmul.f32 0.5, %v769_v44 }
 0x162   :  { %v594_v50 = vmul.f32 0.7978846, %v590_v48  ;;  %v593_v61 = vadd.f32 %v589_v51, %v571_v23  ;;  %v587_v62 = vmul.f32 %v583_v49, %v563_v33  ;;  %v5757_v3 = vadd.f32 %v4715_v59, %v5724_v53  ;;  %v1100_v49 = vpop.permute.xlu1 %1099 }
 0x163   :  { %v785_v0 = vmul.f32 %v781_v57, %v769_v44  ;;  %v779_v1 = vmul.f32 0.044715, %v5749_v58  ;;  %v763_v4 = vpop.f32.mrf.mxu0  ;;  %5037 = vtanh.f32 %v395_v52 }
 0x164   :  { %v597_v55 = vmul.f32 0.7978846, %v593_v61  ;;  %v591_v7 = vadd.f32 %v587_v62, %v563_v33  ;;  %v5762_v8 = vadd.f32 %v763_v4, %v5728_v2  ;;  %5039 = vtanh.f32 %v596_v56 }
 0x165   :  { %v789_v9 = vmul.f32 %v785_v0, %v769_v44  ;;  %v783_v10 = vmul.f32 %v779_v1, %v5749_v58  ;;  %v782_v11 = vmul.f32 0.044715, %v5757_v3  ;;  %v4728_v12 = vpop.f32.mrf.mxu0  ;;  %5041 = vtanh.f32 %v594_v50 }
 0x166   :  { %v595_v13 = vmul.f32 0.7978846, %v591_v7  ;;  %v780_v53 = vmul.f32 0.044715, %v5762_v8  ;;  %v5768_v14 = vadd.f32 %v4728_v12, %v5730_v5  ;;  %5043 = vtanh.f32 %v597_v55 }
 0x167   :  { %v793_v16 = vadd.f32 %v789_v9, %v769_v44  ;;  %v787_v2 = vmul.f32 %v783_v10, %v5749_v58  ;;  %v786_v18 = vmul.f32 %v782_v11, %v5757_v3  ;;  %v961_v19 = vpop.f32.mrf.mxu0  ;;  %v1306_v44 = vpop.permute.xlu0 %1305 }
 0x168   :  { %v5032_v20 = vpop.eup %5031  ;;  %5045 = vtanh.f32 %v595_v13  ;;  %v784_v22 = vmul.f32 %v780_v53, %v5762_v8  ;;  %v982_v23 = vmul.f32 0.044715, %v5768_v14  ;;  %v5775_v25 = vadd.f32 %v961_v19, %v5740_v29 }
 0x169   :  { %v797_v5 = vmul.f32 0.7978846, %v793_v16  ;;  %v791_v27 = vadd.f32 %v787_v2, %v5749_v58  ;;  %v790_v30 = vmul.f32 %v786_v18, %v5757_v3  ;;  %v4729_v31 = vpop.f32.mrf.mxu0  ;;  %v404_v32 = vadd.f32 1.0, %v5032_v20 }
 0x16a   :  { %v788_v33 = vmul.f32 %v784_v22, %v5762_v8  ;;  %v986_v34 = vmul.f32 %v982_v23, %v5768_v14  ;;  %v980_v36 = vmul.f32 0.044715, %v5775_v25  ;;  %v5783_v38 = vadd.f32 %v4729_v31, %v5734_v24  ;;  %v1311_v22 = vpop.permute.xlu1 %1310 }
 0x16b   :  { %5047 = vtanh.f32 %v797_v5  ;;  %v795_v39 = vmul.f32 0.7978846, %v791_v27  ;;  %v794_v29 = vadd.f32 %v790_v30, %v5757_v3  ;;  %v964_v40 = vpop.f32.mrf.mxu0  ;;  %v408_v59 = vmul.f32 %v404_v32, %v5732_v17  ;;  %v1296_v32 = vpop.permute.xlu0 %1295 }
 0x16c   :  { %v5034_v42 = vpop.eup %5033  ;;  %v792_v43 = vadd.f32 %v788_v33, %v5762_v8  ;;  %v990_v45 = vmul.f32 %v986_v34, %v5768_v14  ;;  %v984_v48 = vmul.f32 %v980_v36, %v5775_v25  ;;  %v983_v51 = vmul.f32 0.044715, %v5783_v38 }
 0x16d   :  { %v798_v52 = vmul.f32 0.7978846, %v794_v29  ;;  %v5792_v24 = vadd.f32 %v964_v40, %v899_v54  ;;  %v4742_v56 = vpop.f32.mrf.mxu0  ;;  %v405_v57 = vadd.f32 1.0, %v5034_v42  ;;  %5049 = vtanh.f32 %v795_v39 }
 0x16e   :  { %v5036_v50 = vpop.eup %5035  ;;  %v796_v61 = vmul.f32 0.7978846, %v792_v43  ;;  %v994_v62 = vadd.f32 %v990_v45, %v5768_v14  ;;  %v988_v0 = vmul.f32 %v984_v48, %v5775_v25  ;;  %v987_v1 = vmul.f32 %v983_v51, %v5783_v38 }
 0x16f   :  { %v981_v4 = vmul.f32 0.044715, %v5792_v24  ;;  %v5800_v55 = vadd.f32 %v4742_v56, %v5751_v60  ;;  %v1162_v54 = vpop.f32.mrf.mxu0  ;;  %v409_v7 = vmul.f32 %v405_v57, %v5736_v26  ;;  %5051 = vtanh.f32 %v798_v52 }
 0x170   :  { %v998_v17 = vmul.f32 0.7978846, %v994_v62  ;;  %v992_v9 = vadd.f32 %v988_v0, %v5775_v25  ;;  %v991_v10 = vmul.f32 %v987_v1, %v5783_v38  ;;  %v5038_v11 = vpop.eup %5037  ;;  %v5807_v53 = vadd.f32 %v1162_v54, %v1095_v21 }
 0x171   :  { %v985_v12 = vmul.f32 %v981_v4, %v5792_v24  ;;  %v1183_v13 = vmul.f32 0.044715, %v5800_v55  ;;  %v4743_v16 = vpop.f32.mrf.mxu0  ;;  %v411_v2 = vpack.c.bf16 %v409_v7, %v408_v59  ;;  %v5040_v60 = vpop.eup %5039  ;;  %5053 = vtanh.f32 %v796_v61 }
 0x172   :  { %v995_v18 = vadd.f32 %v991_v10, %v5783_v38  ;;  %v5810_v26 = vadd.f32 %v4743_v16, %v1110_v15  ;;  %v5813_v19 = vmul.f32 0.5, %v5749_v58  ;;  %v5815_v20 = vpop.eup %5041  ;;  %v1181_v21 = vmul.f32 0.044715, %v5807_v53 }
 0x173   :  { %v989_v23 = vmul.f32 %v985_v12, %v5792_v24  ;;  %v1187_v5 = vmul.f32 %v1183_v13, %v5800_v55  ;;  %4689 = vmatpush3.bf16.msra.mxu1 %v411_v2  ;;  %v1165_v27 = vpop.f32.mrf.mxu0  ;;  %v402_v30 = vadd.f32 1.0, %v5036_v50  ;;  %v5044_v31 = vpop.eup %5043  ;;  %5055 = vtanh.f32 %v998_v17 }
 0x174   :  { %v996_v15 = vmul.f32 0.7978846, %v992_v9  ;;  %v1184_v33 = vmul.f32 0.044715, %v5810_v26  ;;  %v5821_v58 = vadd.f32 %v1165_v27, %v1100_v49  ;;  %4690 = vmatprep.subr.bf16.mxu1 %v5160_v35  ;;  %v1185_v29 = vmul.f32 %v1181_v21, %v5807_v53 }
 0x175   :  { %v5824_v34 = vpop.eup %5045  ;;  %v993_v36 = vadd.f32 %v989_v23, %v5792_v24  ;;  %v1191_v39 = vmul.f32 %v1187_v5, %v5800_v55  ;;  %v4756_v40 = vpop.f32.mrf.mxu0  ;;  %v403_v42 = vadd.f32 1.0, %v5038_v11  ;;  %v999_v43 = vmul.f32 0.7978846, %v995_v18 }
 0x176   :  { %v1188_v45 = vmul.f32 %v1184_v33, %v5810_v26  ;;  %v1182_v48 = vmul.f32 0.044715, %v5821_v58  ;;  %v5831_v51 = vadd.f32 %v4756_v40, %v1306_v44  ;;  %v1189_v56 = vmul.f32 %v1185_v29, %v5807_v53  ;;  %v1301_v44 = vpop.permute.xlu1 %1300 }
 0x177   :  { %v997_v49 = vmul.f32 0.7978846, %v993_v36  ;;  %v1195_v52 = vadd.f32 %v1191_v39, %v5800_v55  ;;  %v406_v57 = vmul.f32 %v402_v30, %v5738_v28  ;;  %v1363_v59 = vpop.f32.mrf.mxu0  ;;  %v407_v1 = vmul.f32 %v403_v42, %v5742_v37  ;;  %v1507_v28 = vpop.permute.xlu0 %1506  ;;  %v5007_v37 = vld [vmem:[%s6575_s5] sm:$0xff]  }
 0x178   :  { %v5836_v50 = vpop.eup %5047  ;;  %v1192_v61 = vmul.f32 %v1188_v45, %v5810_v26  ;;  %v1186_v62 = vmul.f32 %v1182_v48, %v5821_v58  ;;  %v1384_v0 = vmul.f32 0.044715, %v5831_v51  ;;  %5057 = vtanh.f32 %v996_v15 }
 0x179   :  { %v1199_v4 = vmul.f32 0.7978846, %v1195_v52  ;;  %v1193_v54 = vadd.f32 %v1189_v56, %v5807_v53  ;;  %v5843_v7 = vadd.f32 %v1363_v59, %v1296_v32  ;;  %v4757_v17 = vpop.f32.mrf.mxu0  ;;  %v410_v12 = vpack.c.bf16 %v407_v1, %v406_v57 }
 0x17a   :  { %v1196_v9 = vadd.f32 %v1192_v61, %v5810_v26  ;;  %v1190_v10 = vmul.f32 %v1186_v62, %v5821_v58  ;;  %v1388_v11 = vmul.f32 %v1384_v0, %v5831_v51  ;;  %5059 = vtanh.f32 %v999_v43  ;;  %v5857_v23 = vpop.eup %5049 }
 0x17b   :  { %v1382_v13 = vmul.f32 0.044715, %v5843_v7  ;;  %v5852_v16 = vadd.f32 %v4757_v17, %v1311_v22  ;;  %v1366_v2 = vpop.f32.mrf.mxu0  ;;  %v5855_v18 = vmul.f32 0.5, %v5757_v3  ;;  %5061 = vtanh.f32 %v997_v49  ;;  %4691 = vmatpush3.bf16.msra.mxu1 %v410_v12  ;;  %v1497_v49 = vpop.permute.xlu0 %1496 }
 0x17c   :  { %v1197_v5 = vmul.f32 0.7978846, %v1193_v54  ;;  %v1194_v21 = vadd.f32 %v1190_v10, %v5821_v58  ;;  %v604_v27 = vadd.f32 1.0, %v5040_v60  ;;  %v5052_v30 = vpop.eup %5051  ;;  %v1392_v32 = vmul.f32 %v1388_v11, %v5831_v51  ;;  %4702 = vmatprep.subr.bf16.mxu1 %v5160_v35  ;;  %v1512_v60 = vpop.permute.xlu1 %1511 }
 0x17d   :  { %v1386_v15 = vmul.f32 %v1382_v13, %v5843_v7  ;;  %v1385_v22 = vmul.f32 0.044715, %v5852_v16  ;;  %v605_v33 = vadd.f32 1.0, %v5044_v31  ;;  %v4770_v3 = vpop.f32.mrf.mxu0  ;;  %5063 = vtanh.f32 %v1199_v4 }
 0x17e   :  { %v1200_v36 = vmul.f32 0.7978846, %v1196_v9  ;;  %v608_v39 = vmul.f32 %v604_v27, %v5744_v46  ;;  %v5866_v29 = vmul.f32 0.5, %v5762_v8  ;;  %v5868_v40 = vpop.eup %5053  ;;  %4693 = vmatmul.mubr.msk.bf16.vlgmr.msra.gmra.mxu1 %vm431_vm2, %v5007_v37  ;;  %v5874_v31 = vadd.f32 %v1366_v2, %v1301_v44 }
 0x17f   :  { %v1390_v42 = vmul.f32 %v1386_v15, %v5843_v7  ;;  %v1389_v43 = vmul.f32 %v1385_v22, %v5852_v16  ;;  %v609_v45 = vmul.f32 %v605_v33, %v5753_v63  ;;  %v1564_v48 = vpop.f32.mrf.mxu0  ;;  %5065 = vtanh.f32 %v1197_v5  ;;  %4706 = vmatprep.mubr.msk.bf16.mxu1 %vm5161_vm1, %v5160_v35 }
 0x180   :  { %v1198_v46 = vmul.f32 0.7978846, %v1194_v21  ;;  %v5876_v52 = vadd.f32 %v4770_v3, %v1507_v28  ;;  %v602_v8 = vadd.f32 1.0, %v5815_v20  ;;  %v5881_v56 = vpop.eup %5055  ;;  %v1396_v57 = vadd.f32 %v1392_v32, %v5831_v51  ;;  %v1502_v12 = vpop.permute.xlu1 %1501 }
 0x181   :  { %v1393_v59 = vmul.f32 %v1389_v43, %v5852_v16  ;;  %v611_v63 = vpack.c.bf16 %v609_v45, %v608_v39  ;;  %v1383_v61 = vmul.f32 0.044715, %v5874_v31  ;;  %v4771_v62 = vpop.f32.mrf.mxu0  ;;  %5067 = vtanh.f32 %v1200_v36  ;;  %v1708_v21 = vpop.permute.xlu0 %1707  ;;  %v5008_v36 = vld [vmem:[%s6575_s5 + $0x8] sm:$0xff]  }
 0x182   :  { %v1394_v0 = vadd.f32 %v1390_v42, %v5843_v7  ;;  %v1585_v1 = vmul.f32 0.044715, %v5876_v52  ;;  %v603_v20 = vadd.f32 1.0, %v5824_v34  ;;  %v606_v54 = vmul.f32 %v602_v8, %v5746_v47 }
 0x183   :  { %v1397_v44 = vadd.f32 %v1393_v59, %v5852_v16  ;;  %4703 = vmatpush3.bf16.msra.mxu1 %v611_v63  ;;  %v1387_v4 = vmul.f32 %v1383_v61, %v5874_v31  ;;  %v5892_v17 = vadd.f32 %v1564_v48, %v1497_v49  ;;  %v1567_v28 = vpop.f32.mrf.mxu0  ;;  %v5897_v11 = vadd.f32 %v4771_v62, %v1512_v60 }
 0x184   :  { %4704 = vmatprep.subr.bf16.mxu1 %v5160_v35  ;;  %v1589_v9 = vmul.f32 %v1585_v1, %v5876_v52  ;;  %v607_v10 = vmul.f32 %v603_v20, %v5759_v6  ;;  %v805_v34 = vadd.f32 1.0, %v5836_v50  ;;  %5069 = vtanh.f32 %v1198_v46  ;;  %v1713_v61 = vpop.permute.xlu1 %1712 }
 0x185   :  { %v1400_v13 = vmul.f32 0.7978846, %v1396_v57  ;;  %v1391_v37 = vmul.f32 %v1387_v4, %v5874_v31  ;;  %v1583_v47 = vmul.f32 0.044715, %v5892_v17  ;;  %v4784_v2 = vpop.f32.mrf.mxu0  ;;  %v5902_v5 = vpop.eup %5057  ;;  %v1586_v6 = vmul.f32 0.044715, %v5897_v11 }
 0x186   :  { %v1593_v27 = vmul.f32 %v1589_v9, %v5876_v52  ;;  %v610_v32 = vpack.c.bf16 %v607_v10, %v606_v54  ;;  %v806_v15 = vadd.f32 1.0, %v5052_v30  ;;  %v1398_v22 = vmul.f32 0.7978846, %v1394_v0 }
 0x187   :  { %v1401_v33 = vmul.f32 0.7978846, %v1397_v44  ;;  %v1395_v50 = vadd.f32 %v1391_v37, %v5874_v31  ;;  %v1587_v3 = vmul.f32 %v1583_v47, %v5892_v17  ;;  %v1765_v39 = vpop.f32.mrf.mxu0  ;;  %v5060_v60 = vpop.eup %5059  ;;  %v1590_v42 = vmul.f32 %v1586_v6, %v5897_v11  ;;  %v5009_v6 = vld [vmem:[%s6575_s5 + $0x10] sm:$0xff]  }
 0x188   :  { %4705 = vmatpush3.bf16.msra.mxu1 %v610_v32  ;;  %v809_v43 = vmul.f32 %v805_v34, %v5786_v41  ;;  %v810_v45 = vmul.f32 %v806_v15, %v5855_v18  ;;  %v5914_v30 = vadd.f32 %v1567_v28, %v1502_v12  ;;  %v5916_v48 = vpop.eup %5061  ;;  %5071 = vtanh.f32 %v1400_v13 }
 0x189   :  { %v1597_v49 = vadd.f32 %v1593_v27, %v5876_v52  ;;  %4716 = vmatprep.subr.bf16.mxu1 %v5160_v35  ;;  %v5920_v46 = vadd.f32 %v4784_v2, %v1708_v21  ;;  %v803_v8 = vadd.f32 1.0, %v5857_v23  ;;  %v1399_v57 = vmul.f32 0.7978846, %v1395_v50  ;;  %v4785_v20 = vpop.f32.mrf.mxu0  ;;  %v1698_v23 = vpop.permute.xlu0 %1697 }
 0x18a   :  { %v1594_v59 = vmul.f32 %v1590_v42, %v5897_v11  ;;  %v812_v63 = vpack.c.bf16 %v810_v45, %v809_v43  ;;  %v1584_v41 = vmul.f32 0.044715, %v5914_v30  ;;  %v5925_v18 = vpop.eup %5063  ;;  %5073 = vtanh.f32 %v1398_v22 }
 0x18b   :  { %v1591_v62 = vmul.f32 %v1587_v3, %v5892_v17  ;;  %4707 = vmatmul.mubr.msk.bf16.vlgmr.msra.gmra.mxu1 %vm431_vm2, %v5008_v36  ;;  %v1786_v0 = vmul.f32 0.044715, %v5920_v46  ;;  %v804_v1 = vadd.f32 1.0, %v5868_v40  ;;  %5075 = vtanh.f32 %v1401_v33  ;;  %v1768_v32 = vpop.f32.mrf.mxu0  ;;  %v1703_v33 = vpop.permute.xlu1 %1702 }
 0x18c   :  { %v1598_v44 = vadd.f32 %v1594_v59, %v5897_v11  ;;  %4717 = vmatpush3.bf16.msra.mxu1 %v812_v63  ;;  %v1588_v4 = vmul.f32 %v1584_v41, %v5914_v30  ;;  %4720 = vmatprep.mubr.msk.bf16.mxu1 %vm5161_vm1, %v5160_v35  ;;  %v5935_v54 = vpop.eup %5065  ;;  %v807_v9 = vmul.f32 %v803_v8, %v5813_v19  ;;  %5077 = vtanh.f32 %v1399_v57 }
 0x18d   :  { %4718 = vmatprep.subr.bf16.mxu1 %v5160_v35  ;;  %v1790_v28 = vmul.f32 %v1786_v0, %v5920_v46  ;;  %v808_v40 = vmul.f32 %v804_v1, %v5866_v29  ;;  %v5941_v10 = vadd.f32 %v1765_v39, %v1698_v23  ;;  %v1601_v34 = vmul.f32 0.7978846, %v1597_v49 }
 0x18e   :  { %v1592_v12 = vmul.f32 %v1588_v4, %v5914_v30  ;;  %v5944_v13 = vadd.f32 %v4785_v20, %v1713_v61  ;;  %v5068_v37 = vpop.eup %5067  ;;  %v1595_v47 = vadd.f32 %v1591_v62, %v5892_v17  ;;  %v1602_v2 = vmul.f32 0.7978846, %v1598_v44 }
 0x18f   :  { %v811_v21 = vpack.c.bf16 %v808_v40, %v807_v9  ;;  %v1784_v27 = vmul.f32 0.044715, %v5941_v10  ;;  %v1794_v29 = vmul.f32 %v1790_v28, %v5920_v46  ;;  %v978_v22 = vmul.f32 0.5, %v5768_v14 }
 0x190   :  { %v1596_v19 = vadd.f32 %v1592_v12, %v5914_v30  ;;  %v1787_v15 = vmul.f32 0.044715, %v5944_v13  ;;  %v979_v3 = vmul.f32 0.5, %v5783_v38  ;;  %v1006_v36 = vadd.f32 1.0, %v5881_v56 }
 0x191   :  { %4719 = vmatpush3.bf16.msra.mxu1 %v811_v21  ;;  %v1788_v50 = vmul.f32 %v1784_v27, %v5941_v10  ;;  %v1007_v39 = vadd.f32 1.0, %v5060_v60  ;;  %v5070_v42 = vpop.eup %5069  ;;  %5079 = vtanh.f32 %v1601_v34  ;;  %v5960_v45 = vadd.f32 %v1768_v32, %v1703_v33 }
 0x192   :  { %4730 = vmatprep.subr.bf16.mxu1 %v5160_v35  ;;  %v1791_v43 = vmul.f32 %v1787_v15, %v5944_v13  ;;  %v1599_v49 = vmul.f32 0.7978846, %v1595_v47  ;;  %5081 = vtanh.f32 %v1602_v2  ;;  %v1010_v14 = vmul.f32 %v1006_v36, %v978_v22 }
 0x193   :  { %v1011_v8 = vmul.f32 %v1007_v39, %v979_v3  ;;  %v1600_v57 = vmul.f32 0.7978846, %v1596_v19  ;;  %v1798_v59 = vadd.f32 %v1794_v29, %v5920_v46  ;;  %v1785_v56 = vmul.f32 0.044715, %v5960_v45 }
 0x194   :  { %4721 = vmatmul.mubr.msk.bf16.vlgmr.msra.gmra.mxu1 %vm431_vm2, %v5009_v6  ;;  %v1795_v38 = vmul.f32 %v1791_v43, %v5944_v13  ;;  %v1792_v60 = vmul.f32 %v1788_v50, %v5941_v10  ;;  %v976_v41 = vmul.f32 0.5, %v5775_v25  ;;  %v1004_v61 = vadd.f32 1.0, %v5902_v5 }
 0x195   :  { %v1013_v63 = vpack.c.bf16 %v1011_v8, %v1010_v14  ;;  %4734 = vmatprep.mubr.msk.bf16.mxu1 %vm5161_vm1, %v5160_v35  ;;  %v5072_v62 = vpop.eup %5071  ;;  %v1789_v1 = vmul.f32 %v1785_v56, %v5960_v45  ;;  %v977_v20 = vmul.f32 0.5, %v5792_v24  ;;  %v1005_v23 = vadd.f32 1.0, %v5916_v48  ;;  %v5011_v14 = vld [vmem:[%s6575_s5 + $0x20] sm:$0xff]  }
 0x196   :  { %v1799_v0 = vadd.f32 %v1795_v38, %v5944_v13  ;;  %v1008_v44 = vmul.f32 %v1004_v61, %v976_v41  ;;  %v1179_v4 = vmul.f32 0.5, %v5800_v55  ;;  %v1180_v25 = vmul.f32 0.5, %v5810_v26 }
 0x197   :  { %4731 = vmatpush3.bf16.msra.mxu1 %v1013_v63  ;;  %v1207_v5 = vadd.f32 1.0, %v5925_v18  ;;  %v5074_v28 = vpop.eup %5073  ;;  %v1793_v40 = vmul.f32 %v1789_v1, %v5960_v45  ;;  %v1009_v34 = vmul.f32 %v1005_v23, %v977_v20  ;;  %v1208_v12 = vadd.f32 1.0, %v5068_v37  ;;  %v5010_v18 = vld [vmem:[%s6575_s5 + $0x18] sm:$0xff]  }
 0x198   :  { %v1803_v9 = vmul.f32 0.7978846, %v1799_v0  ;;  %4732 = vmatprep.subr.bf16.mxu1 %v5160_v35  ;;  %v5076_v47 = vpop.eup %5075  ;;  %5083 = vtanh.f32 %v1600_v57  ;;  %v1802_v24 = vmul.f32 0.7978846, %v1798_v59  ;;  %v1796_v26 = vadd.f32 %v1792_v60, %v5941_v10 }
 0x199   :  { %v1797_v48 = vadd.f32 %v1793_v40, %v5960_v45  ;;  %v1012_v2 = vpack.c.bf16 %v1009_v34, %v1008_v44  ;;  %v1211_v21 = vmul.f32 %v1207_v5, %v1179_v4  ;;  %v1212_v55 = vmul.f32 %v1208_v12, %v1180_v25  ;;  %v5078_v27 = vpop.eup %5077 }
 0x19a   :  { %5085 = vtanh.f32 %v1599_v49  ;;  %v1178_v32 = vmul.f32 0.5, %v5821_v58  ;;  %v1206_v19 = vadd.f32 1.0, %v5070_v42  ;;  %v1205_v29 = vadd.f32 1.0, %v5935_v54 }
 0x19b   :  { %5087 = vtanh.f32 %v1803_v9  ;;  %4733 = vmatpush3.bf16.msra.mxu1 %v1012_v2  ;;  %v1214_v37 = vpack.c.bf16 %v1212_v55, %v1211_v21  ;;  %v1409_v6 = vadd.f32 1.0, %v5076_v47  ;;  %v1177_v15 = vmul.f32 0.5, %v5807_v53 }
 0x19c   :  { %5089 = vtanh.f32 %v1802_v24  ;;  %4744 = vmatprep.subr.bf16.mxu1 %v5160_v35  ;;  %v1801_v22 = vmul.f32 0.7978846, %v1797_v48  ;;  %v1210_v33 = vmul.f32 %v1206_v19, %v1178_v32  ;;  %v1381_v50 = vmul.f32 0.5, %v5852_v16 }
 0x19d   :  { %v1408_v3 = vadd.f32 1.0, %v5072_v62  ;;  %v1800_v39 = vmul.f32 0.7978846, %v1796_v26  ;;  %v1209_v42 = vmul.f32 %v1205_v29, %v1177_v15  ;;  %v1380_v54 = vmul.f32 0.5, %v5831_v51  ;;  %v621_v29 = vpop.permute.xlu1 %620 }
 0x19e   :  { %v5080_v36 = vpop.eup %5079  ;;  %4735 = vmatmul.mubr.msk.bf16.vlgmr.msra.gmra.mxu1 %vm431_vm2, %v5010_v18  ;;  %v1413_v43 = vmul.f32 %v1409_v6, %v1381_v50  ;;  %5091 = vtanh.f32 %v1801_v22  ;;  %v1407_v16 = vadd.f32 1.0, %v5078_v27  ;;  %v1379_v57 = vmul.f32 0.5, %v5874_v31 }
 0x19f   :  { %v5082_v58 = vpop.eup %5081  ;;  %4745 = vmatpush3.bf16.msra.mxu1 %v1214_v37  ;;  %4748 = vmatprep.mubr.msk.bf16.mxu1 %vm5161_vm1, %v5160_v35  ;;  %v1213_v53 = vpack.c.bf16 %v1210_v33, %v1209_v42  ;;  %v1412_v49 = vmul.f32 %v1408_v3, %v1380_v54  ;;  %5093 = vtanh.f32 %v1800_v39  ;;  %v1406_v59 = vadd.f32 1.0, %v5074_v28 }
 0x1a0   :  { %4746 = vmatprep.subr.bf16.mxu1 %v5160_v35  ;;  %v1610_v38 = vadd.f32 1.0, %v5082_v58  ;;  %v1378_v56 = vmul.f32 0.5, %v5843_v7  ;;  %v1411_v60 = vmul.f32 %v1407_v16, %v1379_v57  ;;  %v1582_v63 = vmul.f32 0.5, %v5897_v11  ;;  %v5012_v11 = vld [vmem:[%s6575_s5 + $0x28] sm:$0xff]  }
 0x1a1   :  { %v1415_v8 = vpack.c.bf16 %v1413_v43, %v1412_v49  ;;  %v1609_v41 = vadd.f32 1.0, %v5080_v36  ;;  %v1581_v31 = vmul.f32 0.5, %v5876_v52  ;;  %v1580_v25 = vmul.f32 0.5, %v5914_v30  ;;  %v1023_v15 = vpop.permute.xlu1 %1022 }
 0x1a2   :  { %v1410_v62 = vmul.f32 %v1406_v59, %v1378_v56  ;;  %v1614_v0 = vmul.f32 %v1610_v38, %v1582_v63  ;;  %v1579_v52 = vmul.f32 0.5, %v5892_v17  ;;  %v1783_v40 = vmul.f32 0.5, %v5944_v13  ;;  %v5013_v13 = vld [vmem:[%s6575_s5 + $0x30] sm:$0xff]  }
 0x1a3   :  { %4747 = vmatpush3.bf16.msra.mxu1 %v1213_v53  ;;  %v1613_v23 = vmul.f32 %v1609_v41, %v1581_v31  ;;  %v1782_v30 = vmul.f32 0.5, %v5920_v46  ;;  %v1781_v27 = vmul.f32 0.5, %v5960_v45  ;;  %v1780_v18 = vmul.f32 0.5, %v5941_v10  ;;  %v5014_v45 = vld [vmem:[%s6575_s5 + $0x38] sm:$0xff]   ;;  %v419_v10 = vpop.permute.xlu0 %418 }
 0x1a4   :  { %4758 = vmatprep.subr.bf16.mxu1 %v5160_v35  ;;  %v1414_v7 = vpack.c.bf16 %v1411_v60, %v1410_v62 }
 0x1a5   :  { %v5084_v51 = vpop.eup %5083  ;;  %v1616_v4 = vpack.c.bf16 %v1614_v0, %v1613_v23  ;;  %v1425_v36 = vpop.permute.xlu1 %1424 }
 0x1a6   :  { %4749 = vmatmul.mubr.msk.bf16.vlgmr.msra.gmra.mxu1 %vm431_vm2, %v5011_v14  ;;  %v1608_v44 = vadd.f32 1.0, %v5084_v51 }
 0x1a7   :  { %v5086_v61 = vpop.eup %5085  ;;  %4759 = vmatpush3.bf16.msra.mxu1 %v1415_v8  ;;  %4762 = vmatprep.mubr.msk.bf16.mxu1 %vm5161_vm1, %v5160_v35  ;;  %v822_v37 = vpop.permute.xlu0 %821 }
 0x1a8   :  { %v5088_v1 = vpop.eup %5087  ;;  %4760 = vmatprep.subr.bf16.mxu1 %v5160_v35  ;;  %v1607_v5 = vadd.f32 1.0, %v5086_v61  ;;  %v1612_v9 = vmul.f32 %v1608_v44, %v1580_v25 }
 0x1a9   :  { %v5090_v20 = vpop.eup %5089  ;;  %v1811_v28 = vadd.f32 1.0, %v5088_v1  ;;  %v1827_v43 = vpop.permute.xlu1 %1826 }
 0x1aa   :  { %v1810_v34 = vadd.f32 1.0, %v5090_v20  ;;  %v1611_v24 = vmul.f32 %v1607_v5, %v1579_v52 }
 0x1ab   :  { %4761 = vmatpush3.bf16.msra.mxu1 %v1414_v7  ;;  %v5092_v12 = vpop.eup %5091  ;;  %v1815_v48 = vmul.f32 %v1811_v28, %v1783_v40  ;;  %v1224_v6 = vpop.permute.xlu0 %1223 }
 0x1ac   :  { %4772 = vmatprep.subr.bf16.mxu1 %v5160_v35  ;;  %v5094_v47 = vpop.eup %5093  ;;  %v1615_v2 = vpack.c.bf16 %v1612_v9, %v1611_v24  ;;  %v1814_v17 = vmul.f32 %v1810_v34, %v1782_v30  ;;  %v1809_v21 = vadd.f32 1.0, %v5092_v12 }
 0x1ad   :  { %v1808_v26 = vadd.f32 1.0, %v5094_v47  ;;  %v626_v14 = vpop.permute.xlu1 %625 }
 0x1ae   :  { %4763 = vmatmul.mubr.msk.bf16.vlgmr.msra.gmra.mxu1 %vm431_vm2, %v5012_v11  ;;  %v1817_v55 = vpack.c.bf16 %v1815_v48, %v1814_v17  ;;  %v1813_v46 = vmul.f32 %v1809_v21, %v1781_v27 }
 0x1af   :  { %4773 = vmatpush3.bf16.msra.mxu1 %v1616_v4  ;;  %4776 = vmatprep.mubr.msk.bf16.mxu1 %vm5161_vm1, %v5160_v35  ;;  %v1812_v32 = vmul.f32 %v1808_v26, %v1780_v18  ;;  %v1626_v22 = vpop.permute.xlu0 %1625 }
 0x1b0   :  { %4774 = vmatprep.subr.bf16.mxu1 %v5160_v35 }
 0x1b1   :  { %v1816_v19 = vpack.c.bf16 %v1813_v46, %v1812_v32  ;;  %v1028_v1 = vpop.permute.xlu1 %1027 }
 0x1b3   :  { %4775 = vmatpush3.bf16.msra.mxu1 %v1615_v2  ;;  %v424_v39 = vpop.permute.xlu0 %423 }
 0x1b4   :  { %4786 = vmatprep.subr.bf16.mxu1 %v5160_v35 }
 0x1b5   :  { %v1430_v12 = vpop.permute.xlu1 %1429 }
 0x1b6   :  { %4777 = vmatmul.mubr.msk.bf16.vlgmr.msra.gmra.mxu1 %vm431_vm2, %v5013_v13 }
 0x1b7   :  { %4787 = vmatpush3.bf16.msra.mxu1 %v1817_v55  ;;  %4790 = vmatprep.mubr.msk.bf16.mxu1 %vm5161_vm1, %v5160_v35  ;;  %v827_v60 = vpop.permute.xlu0 %826 }
 0x1b8   :  { %4788 = vmatprep.subr.bf16.mxu1 %v5160_v35 }
 0x1b9   :  { %v1832_v32 = vpop.permute.xlu1 %1831 }
 0x1bb   :  { %4789 = vmatpush3.bf16.msra.mxu1 %v1816_v19  ;;  %v1229_v25 = vpop.permute.xlu0 %1228 }
 0x1bc   :  { %4800 = vmatprep.subr.bf16.mxu1 %v5160_v35 }
 0x1be   :  { %4791 = vmatmul.mubr.msk.bf16.vlgmr.msra.gmra.mxu1 %vm431_vm2, %v5014_v45 }
 0x1bf   :  { %4802 = vmatprep.mubr.msk.bf16.mxu1 %vm5161_vm1, %v5160_v35  ;;  %v1631_v21 = vpop.permute.xlu0 %1630 }
 0x23e   :  { %v469_v33 = vpop.f32.mrf.mxu1 }
 0x23f   :  { %v470_v50 = vadd.f32 %v469_v33, %v419_v10 }
 0x240   :  { %v4694_v3 = vpop.f32.mrf.mxu1 }
 0x241   :  { %476 = vst.msk [vmem:[#allocation2] sm:$0xff] %vm431_vm2, %v470_v50 }
 0x242   :  { %v472_v58 = vpop.f32.mrf.mxu1 }
 0x243   :  { %v473_v42 = vadd.f32 %v472_v58, %v424_v39 }
 0x244   :  { %v4695_v54 = vpop.f32.mrf.mxu1 }
 0x245   :  { %477 = vst.msk [vmem:[#allocation2 + $0x8] sm:$0xff] %vm431_vm2, %v473_v42 }
 0x24b   :  { %v670_v53 = vpop.f32.mrf.mxu1 }
 0x24c   :  { %v671_v49 = vadd.f32 %v670_v53, %v621_v29 }
 0x24d   :  { %v4708_v16 = vpop.f32.mrf.mxu1 }
 0x24e   :  { %677 = vst.msk [vmem:[#allocation2 + $0x10] sm:$0xff] %vm431_vm2, %v671_v49 }
 0x24f   :  { %v673_v8 = vpop.f32.mrf.mxu1 }
 0x250   :  { %v674_v57 = vadd.f32 %v673_v8, %v626_v14 }
 0x251   :  { %v4709_v59 = vpop.f32.mrf.mxu1 }
 0x252   :  { %678 = vst.msk [vmem:[#allocation2 + $0x18] sm:$0xff] %vm431_vm2, %v674_v57  ;;  %v5015_v57 = vld [vmem:[%s6576_s7] sm:$0xff]  }
 0x254   :  { %v871_v38 = vpop.f32.mrf.mxu1 }
 0x255   :  { %v872_v51 = vadd.f32 %v871_v38, %v822_v37  ;;  %v1885_v29 = vld [vmem:[#allocation2] ss:$16 sm:$0x3]  ;;  %v2182_v16 = vld [vmem:[#allocation2 + $0x2] ss:$16 sm:$0x3] }
 0x256   :  { %v4722_v56 = vpop.f32.mrf.mxu1 }
 0x257   :  { %878 = vst.msk [vmem:[#allocation2 + $0x20] sm:$0xff] %vm431_vm2, %v872_v51 }
 0x258   :  { %v874_v63 = vpop.f32.mrf.mxu1 }
 0x259   :  { %v875_v41 = vadd.f32 %v874_v63, %v827_v60 }
 0x25a   :  { %v4723_v61 = vpop.f32.mrf.mxu1 }
 0x25b   :  { %879 = vst.msk [vmem:[#allocation2 + $0x28] sm:$0xff] %vm431_vm2, %v875_v41  ;;  %v2332_v61 = vld [vmem:[#allocation2 + $0x3] ss:$16 sm:$0x3] }
 0x25e   :  { %v1072_v62 = vpop.f32.mrf.mxu1 }
 0x25f   :  { %v1073_v31 = vadd.f32 %v1072_v62, %v1023_v15 }
 0x260   :  { %v4736_v0 = vpop.f32.mrf.mxu1 }
 0x261   :  { %1079 = vst.msk [vmem:[#allocation2 + $0x30] sm:$0xff] %vm431_vm2, %v1073_v31  ;;  %v5016_v31 = vld [vmem:[%s6576_s7 + $0x8] sm:$0xff]  }
 0x262   :  { %v1075_v20 = vpop.f32.mrf.mxu1 }
 0x263   :  { %v1076_v7 = vadd.f32 %v1075_v20, %v1028_v1 }
 0x264   :  { %v4737_v23 = vpop.f32.mrf.mxu1 }
 0x265   :  { %1080 = vst.msk [vmem:[#allocation2 + $0x38] sm:$0xff] %vm431_vm2, %v1076_v7 }
 0x266   :  { %v1273_v44 = vpop.f32.mrf.mxu1 }
 0x267   :  { %v1274_v11 = vadd.f32 %v1273_v44, %v1224_v6  ;;  %v2032_v6 = vld [vmem:[#allocation2 + $0x1] ss:$16 sm:$0x3] }
 0x268   :  { %v4750_v4 = vpop.f32.mrf.mxu1  ;;  %v1886_v45 = vld [vmem:[#allocation2] ss:$16 sm:$0xc]  ;;  %v2033_v10 = vld [vmem:[#allocation2 + $0x1] ss:$16 sm:$0xc] }
 0x269   :  { %1280 = vst.msk [vmem:[#allocation2 + $0x40] sm:$0xff] %vm431_vm2, %v1274_v11  ;;  %v1887_v50 = vor.u32 %v1886_v45, %v1885_v29  ;;  %v2034_v3 = vor.u32 %v2033_v10, %v2032_v6  ;;  %v2183_v53 = vld [vmem:[#allocation2 + $0x2] ss:$16 sm:$0xc] }
 0x26a   :  { %v1276_v5 = vpop.f32.mrf.mxu1  ;;  %v2184_v38 = vor.u32 %v2183_v53, %v2182_v16  ;;  %v2333_v41 = vld [vmem:[#allocation2 + $0x3] ss:$16 sm:$0xc]  ;;  %v2483_v11 = vld [vmem:[#allocation2 + $0x4] ss:$16 sm:$0xc] }
 0x26b   :  { %v1277_v28 = vadd.f32 %v1276_v5, %v1229_v25  ;;  %v2334_v1 = vor.u32 %v2333_v41, %v2332_v61  ;;  %v2482_v4 = vld [vmem:[#allocation2 + $0x4] ss:$16 sm:$0x3]  ;;  %v3082_v53 = vld [vmem:[#allocation2 + $0x8] ss:$16 sm:$0x3] }
 0x26c   :  { %v4751_v52 = vpop.f32.mrf.mxu1  ;;  %v5017_v5 = vld [vmem:[%s6576_s7 + $0x10] sm:$0xff]   ;;  %v5022_v41 = vld [vmem:[%s6576_s7 + $0x38] sm:$0xff]  }
 0x26d   :  { %1281 = vst.msk [vmem:[#allocation2 + $0x48] sm:$0xff] %vm431_vm2, %v1277_v28  ;;  %v2484_v52 = vor.u32 %v2483_v11, %v2482_v4  ;;  %v5021_v16 = vld [vmem:[%s6576_s7 + $0x30] sm:$0xff]   ;;  %v5023_v11 = vld [vmem:[%s6576_s7 + $0x40] sm:$0xff]  }
 0x26e   :  { %v1474_v9 = vpop.f32.mrf.mxu1 }
 0x26f   :  { %v1475_v40 = vadd.f32 %v1474_v9, %v1425_v36 }
 0x270   :  { %v4764_v34 = vpop.f32.mrf.mxu1 }
 0x271   :  { %1481 = vst.msk [vmem:[#allocation2 + $0x50] sm:$0xff] %vm431_vm2, %v1475_v40 }
 0x272   :  { %v1477_v47 = vpop.f32.mrf.mxu1 }
 0x273   :  { %v1478_v24 = vadd.f32 %v1477_v47, %v1430_v12  ;;  %v2633_v47 = vld [vmem:[#allocation2 + $0x5] ss:$16 sm:$0xc] }
 0x274   :  { %v4765_v30 = vpop.f32.mrf.mxu1 }
 0x275   :  { %1482 = vst.msk [vmem:[#allocation2 + $0x58] sm:$0xff] %vm431_vm2, %v1478_v24  ;;  %v2632_v24 = vld [vmem:[#allocation2 + $0x5] ss:$16 sm:$0x3] }
 0x276   :  { %v1675_v48 = vpop.f32.mrf.mxu1 }
 0x277   :  { %v1676_v2 = vadd.f32 %v1675_v48, %v1626_v22  ;;  %v5018_v48 = vld [vmem:[%s6576_s7 + $0x18] sm:$0xff]  }
 0x278   :  { %v4778_v17 = vpop.f32.mrf.mxu1  ;;  %v1888_v22 = vld [vmem:[#allocation2] ss:$16 sm:$0x30]  ;;  %v2035_v33 = vld [vmem:[#allocation2 + $0x1] ss:$16 sm:$0x30] }
 0x279   :  { %1682 = vst.msk [vmem:[#allocation2 + $0x60] sm:$0xff] %vm431_vm2, %v1676_v2  ;;  %v1889_v36 = vor.u32 %v1888_v22, %v1887_v50  ;;  %v2036_v39 = vor.u32 %v2035_v33, %v2034_v3  ;;  %v2185_v14 = vld [vmem:[#allocation2 + $0x2] ss:$16 sm:$0x30]  ;;  %v2634_v17 = vor.u32 %v2633_v47, %v2632_v24  ;;  %v5020_v50 = vld [vmem:[%s6576_s7 + $0x28] sm:$0xff]  }
 0x27a   :  { %v1678_v13 = vpop.f32.mrf.mxu1  ;;  %v2186_v56 = vor.u32 %v2185_v14, %v2184_v38  ;;  %v2335_v62 = vld [vmem:[#allocation2 + $0x3] ss:$16 sm:$0x30]  ;;  %v2485_v25 = vld [vmem:[#allocation2 + $0x4] ss:$16 sm:$0x30] }
 0x27b   :  { %v1679_v55 = vadd.f32 %v1678_v13, %v1631_v21  ;;  %v2336_v7 = vor.u32 %v2335_v62, %v2334_v1  ;;  %v2486_v40 = vor.u32 %v2485_v25, %v2484_v52  ;;  %v2635_v30 = vld [vmem:[#allocation2 + $0x5] ss:$16 sm:$0x30]  ;;  %v2932_v22 = vld [vmem:[#allocation2 + $0x7] ss:$16 sm:$0x3] }
 0x27c   :  { %v4779_v27 = vpop.f32.mrf.mxu1  ;;  %v2636_v13 = vor.u32 %v2635_v30, %v2634_v17  ;;  %v2935_v33 = vld [vmem:[#allocation2 + $0x7] ss:$16 sm:$0x30]  ;;  %v5024_v47 = vld [vmem:[%s6576_s7 + $0x48] sm:$0xff]  }
 0x27d   :  { %1683 = vst.msk [vmem:[#allocation2 + $0x68] sm:$0xff] %vm431_vm2, %v1679_v55 }
 0x27e   :  { %v1876_v26 = vpop.f32.mrf.mxu1 }
 0x27f   :  { %v1877_v18 = vadd.f32 %v1876_v26, %v1827_v43  ;;  %v2783_v26 = vld [vmem:[#allocation2 + $0x6] ss:$16 sm:$0xc] }
 0x280   :  { %v4792_v46 = vpop.f32.mrf.mxu1 }
 0x281   :  { %1883 = vst.msk [vmem:[#allocation2 + $0x70] sm:$0xff] %vm431_vm2, %v1877_v18  ;;  %v2782_v18 = vld [vmem:[#allocation2 + $0x6] ss:$16 sm:$0x3] }
 0x282   :  { %v1879_v19 = vpop.f32.mrf.mxu1  ;;  %v2785_v46 = vld [vmem:[#allocation2 + $0x6] ss:$16 sm:$0x30]  ;;  %v2784_v45 = vor.u32 %v2783_v26, %v2782_v18 }
 0x283   :  { %v1880_v37 = vadd.f32 %v1879_v19, %v1832_v32  ;;  %v5019_v32 = vld [vmem:[%s6576_s7 + $0x20] sm:$0xff]   ;;  %v5025_v26 = vld [vmem:[%s6576_s7 + $0x50] sm:$0xff]  }
 0x284   :  { %v4793_v15 = vpop.f32.mrf.mxu1 }
 0x285   :  { %1884 = vst.msk [vmem:[#allocation2 + $0x78] sm:$0xff] %vm431_vm2, %v1880_v37  ;;  %v2786_v37 = vor.u32 %v2785_v46, %v2784_v45  ;;  %v2933_v15 = vld [vmem:[#allocation2 + $0x7] ss:$16 sm:$0xc] }
 0x288   :  { %v1890_v58 = vld [vmem:[#allocation2] ss:$16 sm:$0xc0]  ;;  %v2037_v42 = vld [vmem:[#allocation2 + $0x1] ss:$16 sm:$0xc0] }
 0x289   :  { %v1891_v54 = vor.u32 %v1890_v58, %v1889_v36  ;;  %v2038_v43 = vor.u32 %v2037_v42, %v2036_v39  ;;  %v2187_v51 = vld [vmem:[#allocation2 + $0x2] ss:$16 sm:$0xc0]  ;;  %v2337_v20 = vld [vmem:[#allocation2 + $0x3] ss:$16 sm:$0xc0]  ;;  %v2934_v36 = vor.u32 %v2933_v15, %v2932_v22 }
 0x28a   :  { %v2188_v63 = vor.u32 %v2187_v51, %v2186_v56  ;;  %v2338_v44 = vor.u32 %v2337_v20, %v2336_v7  ;;  %v2487_v9 = vld [vmem:[#allocation2 + $0x4] ss:$16 sm:$0xc0]  ;;  %v2637_v21 = vld [vmem:[#allocation2 + $0x5] ss:$16 sm:$0xc0] }
 0x28b   :  { %v1892_v49 = vpack.c.bf16 %v1891_v54, %v1891_v54  ;;  %v2039_v59 = vpack.c.bf16 %v2038_v43, %v2038_v43  ;;  %v2488_v12 = vor.u32 %v2487_v9, %v2486_v40  ;;  %v2638_v27 = vor.u32 %v2637_v21, %v2636_v13  ;;  %v2787_v10 = vld [vmem:[#allocation2 + $0x6] ss:$16 sm:$0xc0]  ;;  %v2937_v39 = vld [vmem:[#allocation2 + $0x7] ss:$16 sm:$0xc0] }
 0x28c   :  { %v2189_v0 = vpack.c.bf16 %v2188_v63, %v2188_v63  ;;  %v2339_v28 = vpack.c.bf16 %v2338_v44, %v2338_v44  ;;  %v2788_v6 = vor.u32 %v2787_v10, %v2786_v37  ;;  %v2936_v58 = vor.u32 %v2935_v33, %v2934_v36  ;;  %v3083_v43 = vld [vmem:[#allocation2 + $0x8] ss:$16 sm:$0xc]  ;;  %v3233_v56 = vld [vmem:[#allocation2 + $0x9] ss:$16 sm:$0xc] }
 0x28d   :  { %v1918_v8 = vsel %vm1916_vm3, %v1892_v49, 0  ;;  %v2065_v60 = vsel %vm1916_vm3, %v2039_v59, 0  ;;  %v2489_v2 = vpack.c.bf16 %v2488_v12, %v2488_v12  ;;  %v2639_v19 = vpack.c.bf16 %v2638_v27, %v2638_v27  ;;  %v3085_v49 = vld [vmem:[#allocation2 + $0x8] ss:$16 sm:$0x30] }
 0x28e   :  { %4795 = vmatpush3.bf16.msra.mxu0 %v1918_v8  ;;  %v2215_v23 = vsel %vm1916_vm3, %v2189_v0, 0  ;;  %v2365_v34 = vsel %vm1916_vm3, %v2339_v28, 0  ;;  %v2789_v3 = vpack.c.bf16 %v2788_v6, %v2788_v6  ;;  %v2938_v54 = vor.u32 %v2937_v39, %v2936_v58  ;;  %v3235_v63 = vld [vmem:[#allocation2 + $0x9] ss:$16 sm:$0x30] }
 0x28f   :  { %4806 = vmatprep.subr.bf16.mxu0 %v5160_v35  ;;  %v2515_v55 = vsel %vm1916_vm3, %v2489_v2, 0  ;;  %v2665_v29 = vsel %vm1916_vm3, %v2639_v19, 0  ;;  %v3084_v8 = vor.u32 %v3083_v43, %v3082_v53  ;;  %v3383_v7 = vld [vmem:[#allocation2 + $0xa] ss:$16 sm:$0xc]  ;;  %v5027_v43 = vld [vmem:[%s6576_s7 + $0x60] sm:$0xff]  }
 0x290   :  { %v2815_v42 = vsel %vm1916_vm3, %v2789_v3, 0  ;;  %v2939_v14 = vpack.c.bf16 %v2938_v54, %v2938_v54  ;;  %v3385_v44 = vld [vmem:[#allocation2 + $0xa] ss:$16 sm:$0x30] }
 0x291   :  { %4797 = vmatmul.mubr.msk.bf16.vlgmr.msra.gmra.mxu0 %vm1912_vm4, %v5015_v57  ;;  %v3087_v57 = vld [vmem:[#allocation2 + $0x8] ss:$16 sm:$0xc0]  ;;  %v3086_v59 = vor.u32 %v3085_v49, %v3084_v8  ;;  %v3533_v40 = vld [vmem:[#allocation2 + $0xb] ss:$16 sm:$0xc] }
 0x292   :  { %4807 = vmatpush3.bf16.msra.mxu0 %v2065_v60  ;;  %4808 = vmatprep.mubr.msk.bf16.mxu0 %vm5161_vm1, %v5160_v35  ;;  %v2965_v38 = vsel %vm1916_vm3, %v2939_v14, 0  ;;  %v3232_v60 = vld [vmem:[#allocation2 + $0x9] ss:$16 sm:$0x3] }
 0x293   :  { %4818 = vmatprep.subr.bf16.mxu0 %v5160_v35  ;;  %v3088_v51 = vor.u32 %v3087_v57, %v3086_v59  ;;  %v3234_v62 = vor.u32 %v3233_v56, %v3232_v60  ;;  %v3535_v12 = vld [vmem:[#allocation2 + $0xb] ss:$16 sm:$0x30]  ;;  %v3683_v13 = vld [vmem:[#allocation2 + $0xc] ss:$16 sm:$0xc] }
 0x294   :  { %v3685_v27 = vld [vmem:[#allocation2 + $0xc] ss:$16 sm:$0x30]  ;;  %v3833_v37 = vld [vmem:[#allocation2 + $0xd] ss:$16 sm:$0xc] }
 0x295   :  { %v3089_v61 = vpack.c.bf16 %v3088_v51, %v3088_v51  ;;  %v3236_v0 = vor.u32 %v3235_v63, %v3234_v62  ;;  %v3835_v6 = vld [vmem:[#allocation2 + $0xd] ss:$16 sm:$0x30]  ;;  %v3983_v58 = vld [vmem:[#allocation2 + $0xe] ss:$16 sm:$0xc] }
 0x296   :  { %v5026_v15 = vld [vmem:[%s6576_s7 + $0x58] sm:$0xff]   ;;  %v5028_v56 = vld [vmem:[%s6576_s7 + $0x68] sm:$0xff]  }
 0x297   :  { %v3115_v1 = vsel %vm1916_vm3, %v3089_v61, 0  ;;  %v3985_v54 = vld [vmem:[#allocation2 + $0xe] ss:$16 sm:$0x30] }
 0x298   :  { %v4133_v59 = vld [vmem:[#allocation2 + $0xf] ss:$16 sm:$0xc] }
 0x299   :  { %4809 = vmatmul.mubr.msk.bf16.vlgmr.msra.gmra.mxu0 %vm1912_vm4, %v5016_v31  ;;  %v3237_v31 = vld [vmem:[#allocation2 + $0x9] ss:$16 sm:$0xc0]  ;;  %v4135_v51 = vld [vmem:[#allocation2 + $0xf] ss:$16 sm:$0x30] }
 0x29a   :  { %4819 = vmatpush3.bf16.msra.mxu0 %v2215_v23  ;;  %4820 = vmatprep.mubr.msk.bf16.mxu0 %vm5161_vm1, %v5160_v35  ;;  %v3238_v20 = vor.u32 %v3237_v31, %v3236_v0  ;;  %v3382_v23 = vld [vmem:[#allocation2 + $0xa] ss:$16 sm:$0x3]  ;;  %v5029_v0 = vld [vmem:[%s6576_s7 + $0x70] sm:$0xff]  }
 0x29b   :  { %4830 = vmatprep.subr.bf16.mxu0 %v5160_v35  ;;  %v3384_v25 = vor.u32 %v3383_v7, %v3382_v23  ;;  %v5030_v7 = vld [vmem:[%s6576_s7 + $0x78] sm:$0xff]   ;;  %v1900_v23 = vpop.permute.xlu0 %1899 }
 0x29c   :  { %v3239_v4 = vpack.c.bf16 %v3238_v20, %v3238_v20 }
 0x29d   :  { %v3386_v28 = vor.u32 %v3385_v44, %v3384_v25 }
 0x29e   :  { %v3265_v52 = vsel %vm1916_vm3, %v3239_v4, 0 }
 0x2a1   :  { %4821 = vmatmul.mubr.msk.bf16.vlgmr.msra.gmra.mxu0 %vm1912_vm4, %v5017_v5  ;;  %v3387_v5 = vld [vmem:[#allocation2 + $0xa] ss:$16 sm:$0xc0] }
 0x2a2   :  { %4831 = vmatpush3.bf16.msra.mxu0 %v2365_v34  ;;  %4832 = vmatprep.mubr.msk.bf16.mxu0 %vm5161_vm1, %v5160_v35  ;;  %v3388_v9 = vor.u32 %v3387_v5, %v3386_v28  ;;  %v3532_v34 = vld [vmem:[#allocation2 + $0xb] ss:$16 sm:$0x3]  ;;  %v1905_v5 = vpop.permute.xlu1 %1904 }
 0x2a3   :  { %4842 = vmatprep.subr.bf16.mxu0 %v5160_v35  ;;  %v3534_v30 = vor.u32 %v3533_v40, %v3532_v34 }
 0x2a4   :  { %v3389_v24 = vpack.c.bf16 %v3388_v9, %v3388_v9 }
 0x2a5   :  { %v3536_v2 = vor.u32 %v3535_v12, %v3534_v30 }
 0x2a6   :  { %v3415_v17 = vsel %vm1916_vm3, %v3389_v24, 0 }
 0x2a9   :  { %4833 = vmatmul.mubr.msk.bf16.vlgmr.msra.gmra.mxu0 %vm1912_vm4, %v5018_v48  ;;  %v3537_v48 = vld [vmem:[#allocation2 + $0xb] ss:$16 sm:$0xc0] }
 0x2aa   :  { %4843 = vmatpush3.bf16.msra.mxu0 %v2515_v55  ;;  %4844 = vmatprep.mubr.msk.bf16.mxu0 %vm5161_vm1, %v5160_v35  ;;  %v3538_v21 = vor.u32 %v3537_v48, %v3536_v2  ;;  %v3682_v55 = vld [vmem:[#allocation2 + $0xc] ss:$16 sm:$0x3] }
 0x2ab   :  { %4854 = vmatprep.subr.bf16.mxu0 %v5160_v35  ;;  %v3684_v46 = vor.u32 %v3683_v13, %v3682_v55 }
 0x2ac   :  { %v3539_v18 = vpack.c.bf16 %v3538_v21, %v3538_v21 }
 0x2ad   :  { %v3686_v19 = vor.u32 %v3685_v27, %v3684_v46  ;;  %v2054_v27 = vpop.permute.xlu1 %2053 }
 0x2ae   :  { %v3565_v45 = vsel %vm1916_vm3, %v3539_v18, 0 }
 0x2b1   :  { %4845 = vmatmul.mubr.msk.bf16.vlgmr.msra.gmra.mxu0 %vm1912_vm4, %v5019_v32  ;;  %v3687_v32 = vld [vmem:[#allocation2 + $0xc] ss:$16 sm:$0xc0] }
 0x2b2   :  { %4855 = vmatpush3.bf16.msra.mxu0 %v2665_v29  ;;  %4856 = vmatprep.mubr.msk.bf16.mxu0 %vm5161_vm1, %v5160_v35  ;;  %v3688_v10 = vor.u32 %v3687_v32, %v3686_v19  ;;  %v3832_v29 = vld [vmem:[#allocation2 + $0xd] ss:$16 sm:$0x3] }
 0x2b3   :  { %4866 = vmatprep.subr.bf16.mxu0 %v5160_v35  ;;  %v3834_v33 = vor.u32 %v3833_v37, %v3832_v29 }
 0x2b4   :  { %v3689_v22 = vpack.c.bf16 %v3688_v10, %v3688_v10 }
 0x2b5   :  { %v3836_v3 = vor.u32 %v3835_v6, %v3834_v33 }
 0x2b6   :  { %v3715_v36 = vsel %vm1916_vm3, %v3689_v22, 0 }
 0x2b9   :  { %4857 = vmatmul.mubr.msk.bf16.vlgmr.msra.gmra.mxu0 %vm1912_vm4, %v5020_v50  ;;  %v3837_v50 = vld [vmem:[#allocation2 + $0xd] ss:$16 sm:$0xc0] }
 0x2ba   :  { %4867 = vmatpush3.bf16.msra.mxu0 %v2815_v42  ;;  %4868 = vmatprep.mubr.msk.bf16.mxu0 %vm5161_vm1, %v5160_v35  ;;  %v3838_v39 = vor.u32 %v3837_v50, %v3836_v3  ;;  %v3982_v42 = vld [vmem:[#allocation2 + $0xe] ss:$16 sm:$0x3] }
 0x2bb   :  { %4878 = vmatprep.subr.bf16.mxu0 %v5160_v35  ;;  %v3984_v49 = vor.u32 %v3983_v58, %v3982_v42  ;;  %v2204_v58 = vpop.permute.xlu1 %2203 }
 0x2bc   :  { %v3839_v53 = vpack.c.bf16 %v3838_v39, %v3838_v39 }
 0x2bd   :  { %v3986_v14 = vor.u32 %v3985_v54, %v3984_v49 }
 0x2be   :  { %v3865_v8 = vsel %vm1916_vm3, %v3839_v53, 0 }
 0x2c1   :  { %4869 = vmatmul.mubr.msk.bf16.vlgmr.msra.gmra.mxu0 %vm1912_vm4, %v5021_v16  ;;  %v3987_v16 = vld [vmem:[#allocation2 + $0xe] ss:$16 sm:$0xc0] }
 0x2c2   :  { %4879 = vmatpush3.bf16.msra.mxu0 %v2965_v38  ;;  %4880 = vmatprep.mubr.msk.bf16.mxu0 %vm5161_vm1, %v5160_v35  ;;  %v3988_v57 = vor.u32 %v3987_v16, %v3986_v14  ;;  %v4132_v38 = vld [vmem:[#allocation2 + $0xf] ss:$16 sm:$0x3] }
 0x2c3   :  { %4890 = vmatprep.subr.bf16.mxu0 %v5160_v35  ;;  %v4134_v63 = vor.u32 %v4133_v59, %v4132_v38 }
 0x2c4   :  { %v3989_v60 = vpack.c.bf16 %v3988_v57, %v3988_v57 }
 0x2c5   :  { %v4136_v61 = vor.u32 %v4135_v51, %v4134_v63 }
 0x2c6   :  { %v4015_v62 = vsel %vm1916_vm3, %v3989_v60, 0 }
 0x2c9   :  { %4881 = vmatmul.mubr.msk.bf16.vlgmr.msra.gmra.mxu0 %vm1912_vm4, %v5022_v41  ;;  %v4137_v41 = vld [vmem:[#allocation2 + $0xf] ss:$16 sm:$0xc0] }
 0x2ca   :  { %4891 = vmatpush3.bf16.msra.mxu0 %v3115_v1  ;;  %4892 = vmatprep.mubr.msk.bf16.mxu0 %vm5161_vm1, %v5160_v35  ;;  %v4138_v31 = vor.u32 %v4137_v41, %v4136_v61 }
 0x2cb   :  { %4902 = vmatprep.subr.bf16.mxu0 %v5160_v35 }
 0x2cc   :  { %v4139_v1 = vpack.c.bf16 %v4138_v31, %v4138_v31  ;;  %v2354_v31 = vpop.permute.xlu1 %2353 }
 0x2ce   :  { %v4165_v20 = vsel %vm1916_vm3, %v4139_v1, 0 }
 0x2d1   :  { %4893 = vmatmul.mubr.msk.bf16.vlgmr.msra.gmra.mxu0 %vm1912_vm4, %v5023_v11 }
 0x2d2   :  { %4903 = vmatpush3.bf16.msra.mxu0 %v3265_v52  ;;  %4904 = vmatprep.mubr.msk.bf16.mxu0 %vm5161_vm1, %v5160_v35 }
 0x2d3   :  { %4914 = vmatprep.subr.bf16.mxu0 %v5160_v35 }
 0x2d9   :  { %4905 = vmatmul.mubr.msk.bf16.vlgmr.msra.gmra.mxu0 %vm1912_vm4, %v5024_v47  ;;  %v2049_v47 = vpop.permute.xlu0 %2048 }
 0x2da   :  { %4915 = vmatpush3.bf16.msra.mxu0 %v3415_v17  ;;  %4916 = vmatprep.mubr.msk.bf16.mxu0 %vm5161_vm1, %v5160_v35 }
 0x2db   :  { %4926 = vmatprep.subr.bf16.mxu0 %v5160_v35 }
 0x2dd   :  { %v2199_v29 = vpop.permute.xlu0 %2198 }
 0x2e1   :  { %4917 = vmatmul.mubr.msk.bf16.vlgmr.msra.gmra.mxu0 %vm1912_vm4, %v5025_v26  ;;  %v2349_v57 = vpop.permute.xlu0 %2348 }
 0x2e2   :  { %4927 = vmatpush3.bf16.msra.mxu0 %v3565_v45  ;;  %4928 = vmatprep.mubr.msk.bf16.mxu0 %vm5161_vm1, %v5160_v35 }
 0x2e3   :  { %4938 = vmatprep.subr.bf16.mxu0 %v5160_v35 }
 0x2e9   :  { %4929 = vmatmul.mubr.msk.bf16.vlgmr.msra.gmra.mxu0 %vm1912_vm4, %v5026_v15 }
 0x2ea   :  { %4939 = vmatpush3.bf16.msra.mxu0 %v3715_v36  ;;  %4940 = vmatprep.mubr.msk.bf16.mxu0 %vm5161_vm1, %v5160_v35 }
 0x2eb   :  { %4950 = vmatprep.subr.bf16.mxu0 %v5160_v35 }
 0x2f1   :  { %4941 = vmatmul.mubr.msk.bf16.vlgmr.msra.gmra.mxu0 %vm1912_vm4, %v5027_v43 }
 0x2f2   :  { %4951 = vmatpush3.bf16.msra.mxu0 %v3865_v8  ;;  %4952 = vmatprep.mubr.msk.bf16.mxu0 %vm5161_vm1, %v5160_v35 }
 0x2f3   :  { %4962 = vmatprep.subr.bf16.mxu0 %v5160_v35 }
 0x2f9   :  { %4953 = vmatmul.mubr.msk.bf16.vlgmr.msra.gmra.mxu0 %vm1912_vm4, %v5028_v56 }
 0x2fa   :  { %4963 = vmatpush3.bf16.msra.mxu0 %v4015_v62  ;;  %4964 = vmatprep.mubr.msk.bf16.mxu0 %vm5161_vm1, %v5160_v35 }
 0x2fb   :  { %4974 = vmatprep.subr.bf16.mxu0 %v5160_v35 }
 0x301   :  { %4965 = vmatmul.mubr.msk.bf16.vlgmr.msra.gmra.mxu0 %vm1912_vm4, %v5029_v0 }
 0x302   :  { %4975 = vmatpush3.bf16.msra.mxu0 %v4165_v20  ;;  %4976 = vmatprep.mubr.msk.bf16.mxu0 %vm5161_vm1, %v5160_v35 }
 0x309   :  { %4977 = vmatmul.mubr.msk.bf16.vlgmr.msra.gmra.mxu0 %vm1912_vm4, %v5030_v7 }
 0x351   :  { %v1954_v44 = vpop.f32.mrf.mxu0 }
 0x352   :  { %v6177_v11 = vadd.f32 %v1954_v44, %v1900_v23 }
 0x353   :  { %v4798_v4 = vpop.f32.mrf.mxu0 }
 0x354   :  { %v1963_v25 = vmul.f32 0.044715, %v6177_v11 }
 0x355   :  { %v1957_v28 = vpop.f32.mrf.mxu0 }
 0x356   :  { %v1965_v52 = vmul.f32 %v1963_v25, %v6177_v11  ;;  %v6181_v9 = vadd.f32 %v1957_v28, %v1905_v5 }
 0x357   :  { %v4799_v40 = vpop.f32.mrf.mxu0 }
 0x358   :  { %v1967_v34 = vmul.f32 %v1965_v52, %v6177_v11  ;;  %v1964_v12 = vmul.f32 0.044715, %v6181_v9  ;;  %v2499_v40 = vpop.permute.xlu0 %2498 }
 0x359   :  { %v2101_v24 = vpop.f32.mrf.mxu0 }
 0x35a   :  { %v1969_v30 = vadd.f32 %v1967_v34, %v6177_v11  ;;  %v1966_v48 = vmul.f32 %v1964_v12, %v6181_v9  ;;  %v6187_v2 = vadd.f32 %v2101_v24, %v2049_v47  ;;  %v1961_v12 = vmul.f32 0.5, %v6177_v11 }
 0x35b   :  { %v4810_v17 = vpop.f32.mrf.mxu0  ;;  %v1962_v47 = vmul.f32 0.5, %v6181_v9 }
 0x35c   :  { %v1971_v21 = vmul.f32 0.7978846, %v1969_v30  ;;  %v1968_v13 = vmul.f32 %v1966_v48, %v6181_v9  ;;  %v2110_v55 = vmul.f32 0.044715, %v6187_v2 }
 0x35d   :  { %v2104_v26 = vpop.f32.mrf.mxu0 }
 0x35e   :  { %v1970_v18 = vadd.f32 %v1968_v13, %v6181_v9  ;;  %v2112_v46 = vmul.f32 %v2110_v55, %v6187_v2  ;;  %v6193_v32 = vadd.f32 %v2104_v26, %v2054_v27  ;;  %5095 = vtanh.f32 %v1971_v21 }
 0x35f   :  { %v4811_v19 = vpop.f32.mrf.mxu0 }
 0x360   :  { %v1972_v45 = vmul.f32 0.7978846, %v1970_v18  ;;  %v2114_v10 = vmul.f32 %v2112_v46, %v6187_v2  ;;  %v2111_v37 = vmul.f32 0.044715, %v6193_v32  ;;  %v2504_v46 = vpop.permute.xlu1 %2503 }
 0x361   :  { %v2251_v6 = vpop.f32.mrf.mxu0 }
 0x362   :  { %5097 = vtanh.f32 %v1972_v45  ;;  %v2116_v15 = vadd.f32 %v2114_v10, %v6187_v2  ;;  %v2113_v22 = vmul.f32 %v2111_v37, %v6193_v32  ;;  %v6199_v33 = vadd.f32 %v2251_v6, %v2199_v29  ;;  %v1980_v6 = vld [vmem:[%s6577_s9] sm:$0xf] }
 0x363   :  { %v4822_v50 = vpop.f32.mrf.mxu0 }
 0x364   :  { %v2118_v3 = vmul.f32 0.7978846, %v2116_v15  ;;  %v2115_v36 = vmul.f32 %v2113_v22, %v6193_v32  ;;  %v2260_v39 = vmul.f32 0.044715, %v6199_v33 }
 0x365   :  { %v2254_v42 = vpop.f32.mrf.mxu0 }
 0x366   :  { %v2117_v54 = vadd.f32 %v2115_v36, %v6193_v32  ;;  %v2262_v43 = vmul.f32 %v2260_v39, %v6199_v33  ;;  %v6205_v53 = vadd.f32 %v2254_v42, %v2204_v58  ;;  %5099 = vtanh.f32 %v2118_v3  ;;  %v2649_v39 = vpop.permute.xlu0 %2648 }
 0x367   :  { %v4823_v49 = vpop.f32.mrf.mxu0  ;;  %v2108_v42 = vmul.f32 0.5, %v6187_v2 }
 0x368   :  { %v2119_v16 = vmul.f32 0.7978846, %v2117_v54  ;;  %v2264_v14 = vmul.f32 %v2262_v43, %v6199_v33  ;;  %v2261_v8 = vmul.f32 0.044715, %v6205_v53  ;;  %v2109_v54 = vmul.f32 0.5, %v6193_v32 }
 0x369   :  { %v2401_v59 = vpop.f32.mrf.mxu0 }
 0x36a   :  { %5101 = vtanh.f32 %v2119_v16  ;;  %v2266_v38 = vadd.f32 %v2264_v14, %v6199_v33  ;;  %v2263_v51 = vmul.f32 %v2261_v8, %v6205_v53  ;;  %v6211_v56 = vadd.f32 %v2401_v59, %v2349_v57 }
 0x36b   :  { %v4834_v60 = vpop.f32.mrf.mxu0  ;;  %v5096_v63 = vpop.eup %5095 }
 0x36c   :  { %v2268_v41 = vmul.f32 0.7978846, %v2266_v38  ;;  %v2265_v61 = vmul.f32 %v2263_v51, %v6205_v53  ;;  %v2410_v62 = vmul.f32 0.044715, %v6211_v56  ;;  %v1975_v4 = vadd.f32 1.0, %v5096_v63  ;;  %v2654_v51 = vpop.permute.xlu1 %2653 }
 0x36d   :  { %v2404_v0 = vpop.f32.mrf.mxu0 }
 0x36e   :  { %v2267_v1 = vadd.f32 %v2265_v61, %v6205_v53  ;;  %v2412_v20 = vmul.f32 %v2410_v62, %v6211_v56  ;;  %v6217_v7 = vadd.f32 %v2404_v0, %v2354_v31  ;;  %5103 = vtanh.f32 %v2268_v41 }
 0x36f   :  { %v5098_v23 = vpop.eup %5097  ;;  %v4835_v44 = vpop.f32.mrf.mxu0  ;;  %v1977_v21 = vmul.f32 %v1975_v4, %v1961_v12 }
 0x370   :  { %v2269_v25 = vmul.f32 0.7978846, %v2267_v1  ;;  %v2414_v5 = vmul.f32 %v2412_v20, %v6211_v56  ;;  %v2411_v28 = vmul.f32 0.044715, %v6217_v7  ;;  %v1976_v52 = vadd.f32 1.0, %v5098_v23 }
 0x371   :  { %v2551_v34 = vpop.f32.mrf.mxu0  ;;  %v4426_v1 = vld [vmem:[%s6577_s9 + $0x4] sm:$0xf] }
 0x372   :  { %5105 = vtanh.f32 %v2269_v25  ;;  %v2416_v24 = vadd.f32 %v2414_v5, %v6211_v56  ;;  %v2413_v30 = vmul.f32 %v2411_v28, %v6217_v7  ;;  %v6225_v48 = vadd.f32 %v2551_v34, %v2499_v40  ;;  %v2799_v5 = vpop.permute.xlu0 %2798 }
 0x373   :  { %v4846_v17 = vpop.f32.mrf.mxu0  ;;  %v1978_v13 = vmul.f32 %v1976_v52, %v1962_v47  ;;  %v5100_v55 = vpop.eup %5099  ;;  %v2258_v52 = vmul.f32 0.5, %v6199_v33  ;;  %v2259_v40 = vmul.f32 0.5, %v6205_v53 }
 0x374   :  { %v2418_v27 = vmul.f32 0.7978846, %v2416_v24  ;;  %v2415_v26 = vmul.f32 %v2413_v30, %v6217_v7  ;;  %v2560_v18 = vmul.f32 0.044715, %v6225_v48  ;;  %v2122_v15 = vadd.f32 1.0, %v5100_v55  ;;  %v2804_v55 = vpop.permute.xlu1 %2803 }
 0x375   :  { %v2554_v11 = vpop.f32.mrf.mxu0  ;;  %v1979_v19 = vpack.c.bf16 %v1978_v13, %v1977_v21 }
 0x376   :  { %v2417_v9 = vadd.f32 %v2415_v26, %v6217_v7  ;;  %v2562_v45 = vmul.f32 %v2560_v18, %v6225_v48  ;;  %v6231_v10 = vadd.f32 %v2554_v11, %v2504_v46  ;;  %5107 = vtanh.f32 %v2418_v27 }
 0x377   :  { %v5102_v37 = vpop.eup %5101  ;;  %4801 = vmatpush3.bf16.msra.mxu1 %v1979_v19  ;;  %v4847_v29 = vpop.f32.mrf.mxu0  ;;  %v2124_v8 = vmul.f32 %v2122_v15, %v2108_v42 }
 0x378   :  { %v2419_v22 = vmul.f32 0.7978846, %v2417_v9  ;;  %v2564_v50 = vmul.f32 %v2562_v45, %v6225_v48  ;;  %v2561_v3 = vmul.f32 0.044715, %v6231_v10  ;;  %4812 = vmatprep.subr.bf16.mxu1 %v5160_v35  ;;  %v2123_v36 = vadd.f32 1.0, %v5102_v37 }
 0x379   :  { %v2701_v58 = vpop.f32.mrf.mxu0  ;;  %v4436_v45 = vld [vmem:[%s6577_s9 + $0x8] sm:$0xf] }
 0x37a   :  { %5109 = vtanh.f32 %v2419_v22  ;;  %v2566_v43 = vadd.f32 %v2564_v50, %v6225_v48  ;;  %v2563_v49 = vmul.f32 %v2561_v3, %v6231_v10  ;;  %4803 = vmatmul.mubr.msk.bf16.vlgmr.msra.gmra.mxu1 %vm318_vm0, %v1980_v6  ;;  %v6244_v16 = vadd.f32 %v2701_v58, %v2649_v39  ;;  %v2949_v50 = vpop.permute.xlu0 %2948 }
 0x37b   :  { %v4858_v14 = vpop.f32.mrf.mxu0  ;;  %v2125_v57 = vmul.f32 %v2123_v36, %v2109_v54  ;;  %4814 = vmatprep.mubr.msk.bf16.mxu1 %vm5161_vm1, %v5160_v35  ;;  %v5104_v59 = vpop.eup %5103  ;;  %v2408_v36 = vmul.f32 0.5, %v6211_v56  ;;  %v2409_v39 = vmul.f32 0.5, %v6217_v7 }
 0x37c   :  { %v2568_v38 = vmul.f32 0.7978846, %v2566_v43  ;;  %v2565_v2 = vmul.f32 %v2563_v49, %v6231_v10  ;;  %v2710_v32 = vmul.f32 0.044715, %v6244_v16  ;;  %v2272_v20 = vadd.f32 1.0, %v5104_v59  ;;  %v2954_v59 = vpop.permute.xlu1 %2953 }
 0x37d   :  { %v2704_v60 = vpop.f32.mrf.mxu0  ;;  %v2126_v63 = vpack.c.bf16 %v2125_v57, %v2124_v8 }
 0x37e   :  { %v2567_v41 = vadd.f32 %v2565_v2, %v6231_v10  ;;  %v2712_v61 = vmul.f32 %v2710_v32, %v6244_v16  ;;  %v6252_v62 = vadd.f32 %v2704_v60, %v2654_v51  ;;  %5111 = vtanh.f32 %v2568_v38 }
 0x37f   :  { %v5106_v31 = vpop.eup %5105  ;;  %4813 = vmatpush3.bf16.msra.mxu1 %v2126_v63  ;;  %v4859_v0 = vpop.f32.mrf.mxu0  ;;  %v2274_v30 = vmul.f32 %v2272_v20, %v2258_v52 }
 0x380   :  { %v2569_v23 = vmul.f32 0.7978846, %v2567_v41  ;;  %v2714_v44 = vmul.f32 %v2712_v61, %v6244_v16  ;;  %v2711_v4 = vmul.f32 0.044715, %v6252_v62  ;;  %4824 = vmatprep.subr.bf16.mxu1 %v5160_v35  ;;  %v2273_v25 = vadd.f32 1.0, %v5106_v31 }
 0x381   :  { %v2851_v28 = vpop.f32.mrf.mxu0  ;;  %v4446_v61 = vld [vmem:[%s6577_s9 + $0xc] sm:$0xf] }
 0x382   :  { %5113 = vtanh.f32 %v2569_v23  ;;  %v2716_v34 = vadd.f32 %v2714_v44, %v6244_v16  ;;  %v2713_v12 = vmul.f32 %v2711_v4, %v6252_v62  ;;  %4815 = vmatmul.mubr.msk.bf16.vlgmr.msra.gmra.mxu1 %vm318_vm0, %v4426_v1  ;;  %v6265_v47 = vadd.f32 %v2851_v28, %v2799_v5  ;;  %v3099_v44 = vpop.permute.xlu0 %3098 }
 0x383   :  { %v4870_v24 = vpop.f32.mrf.mxu0  ;;  %v2275_v17 = vmul.f32 %v2273_v25, %v2259_v40  ;;  %4826 = vmatprep.mubr.msk.bf16.mxu1 %vm5161_vm1, %v5160_v35  ;;  %v5108_v21 = vpop.eup %5107  ;;  %v2558_v25 = vmul.f32 0.5, %v6225_v48  ;;  %v2559_v5 = vmul.f32 0.5, %v6231_v10 }
 0x384   :  { %v2718_v13 = vmul.f32 0.7978846, %v2716_v34  ;;  %v2715_v33 = vmul.f32 %v2713_v12, %v6252_v62  ;;  %v2860_v53 = vmul.f32 0.044715, %v6265_v47  ;;  %v2422_v37 = vadd.f32 1.0, %v5108_v21  ;;  %v3104_v21 = vpop.permute.xlu1 %3103 }
 0x385   :  { %v2854_v27 = vpop.f32.mrf.mxu0  ;;  %v2276_v26 = vpack.c.bf16 %v2275_v17, %v2274_v30 }
 0x386   :  { %v2717_v18 = vadd.f32 %v2715_v33, %v6252_v62  ;;  %v2862_v46 = vmul.f32 %v2860_v53, %v6265_v47  ;;  %v6273_v11 = vadd.f32 %v2854_v27, %v2804_v55  ;;  %5115 = vtanh.f32 %v2718_v13 }
 0x387   :  { %v5110_v19 = vpop.eup %5109  ;;  %4825 = vmatpush3.bf16.msra.mxu1 %v2276_v26  ;;  %v4871_v9 = vpop.f32.mrf.mxu0  ;;  %v2424_v49 = vmul.f32 %v2422_v37, %v2408_v36 }
 0x388   :  { %v2719_v29 = vmul.f32 0.7978846, %v2717_v18  ;;  %v2864_v6 = vmul.f32 %v2862_v46, %v6265_v47  ;;  %v2861_v15 = vmul.f32 0.044715, %v6273_v11  ;;  %4836 = vmatprep.subr.bf16.mxu1 %v5160_v35  ;;  %v2423_v22 = vadd.f32 1.0, %v5110_v19 }
 0x389   :  { %v3001_v3 = vpop.f32.mrf.mxu0  ;;  %v4456_v46 = vld [vmem:[%s6577_s9 + $0x10] sm:$0xf] }
 0x38a   :  { %5117 = vtanh.f32 %v2719_v29  ;;  %v2866_v58 = vadd.f32 %v2864_v6, %v6265_v47  ;;  %v2863_v42 = vmul.f32 %v2861_v15, %v6273_v11  ;;  %4827 = vmatmul.mubr.msk.bf16.vlgmr.msra.gmra.mxu1 %vm318_vm0, %v4436_v45  ;;  %v6286_v54 = vadd.f32 %v3001_v3, %v2949_v50  ;;  %v3249_v6 = vpop.permute.xlu0 %3248 }
 0x38b   :  { %v4882_v43 = vpop.f32.mrf.mxu0  ;;  %v2425_v14 = vmul.f32 %v2423_v22, %v2409_v39  ;;  %4838 = vmatprep.mubr.msk.bf16.mxu1 %vm5161_vm1, %v5160_v35  ;;  %v5112_v8 = vpop.eup %5111  ;;  %v2708_v22 = vmul.f32 0.5, %v6244_v16  ;;  %v2709_v50 = vmul.f32 0.5, %v6252_v62 }
 0x38c   :  { %v2868_v57 = vmul.f32 0.7978846, %v2866_v58  ;;  %v2865_v56 = vmul.f32 %v2863_v42, %v6273_v11  ;;  %v3010_v7 = vmul.f32 0.044715, %v6286_v54  ;;  %v2572_v31 = vadd.f32 1.0, %v5112_v8  ;;  %v3254_v8 = vpop.permute.xlu1 %3253 }
 0x38d   :  { %v3004_v38 = vpop.f32.mrf.mxu0  ;;  %v2426_v2 = vpack.c.bf16 %v2425_v14, %v2424_v49 }
 0x38e   :  { %v2867_v32 = vadd.f32 %v2865_v56, %v6273_v11  ;;  %v3012_v51 = vmul.f32 %v3010_v7, %v6286_v54  ;;  %v6294_v60 = vadd.f32 %v3004_v38, %v2954_v59  ;;  %5119 = vtanh.f32 %v2868_v57 }
 0x38f   :  { %v5114_v63 = vpop.eup %5113  ;;  %4837 = vmatpush3.bf16.msra.mxu1 %v2426_v2  ;;  %v4883_v41 = vpop.f32.mrf.mxu0  ;;  %v2574_v12 = vmul.f32 %v2572_v31, %v2558_v25 }
 0x390   :  { %v2869_v0 = vmul.f32 0.7978846, %v2867_v32  ;;  %v3014_v1 = vmul.f32 %v3012_v51, %v6286_v54  ;;  %v3011_v20 = vmul.f32 0.044715, %v6294_v60  ;;  %4848 = vmatprep.subr.bf16.mxu1 %v5160_v35  ;;  %v2573_v23 = vadd.f32 1.0, %v5114_v63 }
 0x391   :  { %v3151_v4 = vpop.f32.mrf.mxu0  ;;  %v4466_v51 = vld [vmem:[%s6577_s9 + $0x14] sm:$0xf] }
 0x392   :  { %5121 = vtanh.f32 %v2869_v0  ;;  %v3016_v28 = vadd.f32 %v3014_v1, %v6286_v54  ;;  %v3013_v52 = vmul.f32 %v3011_v20, %v6294_v60  ;;  %4839 = vmatmul.mubr.msk.bf16.vlgmr.msra.gmra.mxu1 %vm318_vm0, %v4446_v61  ;;  %v6307_v40 = vadd.f32 %v3151_v4, %v3099_v44  ;;  %v3399_v1 = vpop.permute.xlu0 %3398 }
 0x393   :  { %v4894_v34 = vpop.f32.mrf.mxu0  ;;  %v2575_v24 = vmul.f32 %v2573_v23, %v2559_v5  ;;  %4850 = vmatprep.mubr.msk.bf16.mxu1 %vm5161_vm1, %v5160_v35  ;;  %v5116_v30 = vpop.eup %5115  ;;  %v2858_v23 = vmul.f32 0.5, %v6265_v47  ;;  %v2859_v44 = vmul.f32 0.5, %v6273_v11 }
 0x394   :  { %v3018_v17 = vmul.f32 0.7978846, %v3016_v28  ;;  %v3015_v48 = vmul.f32 %v3013_v52, %v6294_v60  ;;  %v3160_v10 = vmul.f32 0.044715, %v6307_v40  ;;  %v2722_v19 = vadd.f32 1.0, %v5116_v30  ;;  %v3404_v30 = vpop.permute.xlu1 %3403 }
 0x395   :  { %v3154_v13 = vpop.f32.mrf.mxu0  ;;  %v2576_v33 = vpack.c.bf16 %v2575_v24, %v2574_v12 }
 0x396   :  { %v3017_v53 = vadd.f32 %v3015_v48, %v6294_v60  ;;  %v3162_v55 = vmul.f32 %v3160_v10, %v6307_v40  ;;  %v6315_v27 = vadd.f32 %v3154_v13, %v3104_v21  ;;  %5123 = vtanh.f32 %v3018_v17 }
 0x397   :  { %v5118_v26 = vpop.eup %5117  ;;  %4849 = vmatpush3.bf16.msra.mxu1 %v2576_v33  ;;  %v4895_v18 = vpop.f32.mrf.mxu0  ;;  %v2724_v42 = vmul.f32 %v2722_v19, %v2708_v22 }
 0x398   :  { %v3019_v9 = vmul.f32 0.7978846, %v3017_v53  ;;  %v3164_v45 = vmul.f32 %v3162_v55, %v6307_v40  ;;  %v3161_v37 = vmul.f32 0.044715, %v6315_v27  ;;  %4860 = vmatprep.subr.bf16.mxu1 %v5160_v35  ;;  %v2723_v29 = vadd.f32 1.0, %v5118_v26 }
 0x399   :  { %v3301_v15 = vpop.f32.mrf.mxu0  ;;  %v4476_v55 = vld [vmem:[%s6577_s9 + $0x18] sm:$0xf] }
 0x39a   :  { %5125 = vtanh.f32 %v3019_v9  ;;  %v3166_v3 = vadd.f32 %v3164_v45, %v6307_v40  ;;  %v3163_v36 = vmul.f32 %v3161_v37, %v6315_v27  ;;  %4851 = vmatmul.mubr.msk.bf16.vlgmr.msra.gmra.mxu1 %vm318_vm0, %v4456_v46  ;;  %v6328_v39 = vadd.f32 %v3301_v15, %v3249_v6  ;;  %v3549_v45 = vpop.permute.xlu0 %3548 }
 0x39b   :  { %v4906_v58 = vpop.f32.mrf.mxu0  ;;  %v2725_v43 = vmul.f32 %v2723_v29, %v2709_v50  ;;  %4862 = vmatprep.mubr.msk.bf16.mxu1 %vm5161_vm1, %v5160_v35  ;;  %v5120_v49 = vpop.eup %5119  ;;  %v3008_v29 = vmul.f32 0.5, %v6286_v54  ;;  %v3009_v6 = vmul.f32 0.5, %v6294_v60 }
 0x39c   :  { %v3168_v14 = vmul.f32 0.7978846, %v3166_v3  ;;  %v3165_v16 = vmul.f32 %v3163_v36, %v6315_v27  ;;  %v3310_v62 = vmul.f32 0.044715, %v6328_v39  ;;  %v2872_v63 = vadd.f32 1.0, %v5120_v49  ;;  %v3554_v49 = vpop.permute.xlu1 %3553 }
 0x39d   :  { %v3304_v57 = vpop.f32.mrf.mxu0  ;;  %v2726_v56 = vpack.c.bf16 %v2725_v43, %v2724_v42 }
 0x39e   :  { %v3167_v7 = vadd.f32 %v3165_v16, %v6315_v27  ;;  %v3312_v59 = vmul.f32 %v3310_v62, %v6328_v39  ;;  %v6336_v38 = vadd.f32 %v3304_v57, %v3254_v8  ;;  %5127 = vtanh.f32 %v3168_v14 }
 0x39f   :  { %v5122_v2 = vpop.eup %5121  ;;  %4861 = vmatpush3.bf16.msra.mxu1 %v2726_v56  ;;  %v4907_v32 = vpop.f32.mrf.mxu0  ;;  %v2874_v52 = vmul.f32 %v2872_v63, %v2858_v23 }
 0x3a0   :  { %v3169_v41 = vmul.f32 0.7978846, %v3167_v7  ;;  %v3314_v61 = vmul.f32 %v3312_v59, %v6328_v39  ;;  %v3311_v31 = vmul.f32 0.044715, %v6336_v38  ;;  %4872 = vmatprep.subr.bf16.mxu1 %v5160_v35  ;;  %v2873_v0 = vadd.f32 1.0, %v5122_v2 }
 0x3a1   :  { %v3451_v20 = vpop.f32.mrf.mxu0  ;;  %v4486_v59 = vld [vmem:[%s6577_s9 + $0x1c] sm:$0xf] }
 0x3a2   :  { %5129 = vtanh.f32 %v3169_v41  ;;  %v3316_v4 = vadd.f32 %v3314_v61, %v6328_v39  ;;  %v3313_v25 = vmul.f32 %v3311_v31, %v6336_v38  ;;  %4863 = vmatmul.mubr.msk.bf16.vlgmr.msra.gmra.mxu1 %vm318_vm0, %v4466_v51  ;;  %v6349_v5 = vadd.f32 %v3451_v20, %v3399_v1  ;;  %v3699_v61 = vpop.permute.xlu0 %3698 }
 0x3a3   :  { %v4918_v28 = vpop.f32.mrf.mxu0  ;;  %v2875_v34 = vmul.f32 %v2873_v0, %v2859_v44  ;;  %4874 = vmatprep.mubr.msk.bf16.mxu1 %vm5161_vm1, %v5160_v35  ;;  %v5124_v12 = vpop.eup %5123  ;;  %v3158_v0 = vmul.f32 0.5, %v6307_v40  ;;  %v3159_v1 = vmul.f32 0.5, %v6315_v27 }
 0x3a4   :  { %v3318_v24 = vmul.f32 0.7978846, %v3316_v4  ;;  %v3315_v47 = vmul.f32 %v3313_v25, %v6336_v38  ;;  %v3460_v11 = vmul.f32 0.044715, %v6349_v5  ;;  %v3022_v26 = vadd.f32 1.0, %v5124_v12  ;;  %v3704_v12 = vpop.permute.xlu1 %3703 }
 0x3a5   :  { %v3454_v17 = vpop.f32.mrf.mxu0  ;;  %v2876_v48 = vpack.c.bf16 %v2875_v34, %v2874_v52 }
 0x3a6   :  { %v3317_v10 = vadd.f32 %v3315_v47, %v6336_v38  ;;  %v3462_v21 = vmul.f32 %v3460_v11, %v6349_v5  ;;  %v6357_v13 = vadd.f32 %v3454_v17, %v3404_v30  ;;  %5131 = vtanh.f32 %v3318_v24 }
 0x3a7   :  { %v5126_v33 = vpop.eup %5125  ;;  %4873 = vmatpush3.bf16.msra.mxu1 %v2876_v48  ;;  %v4919_v53 = vpop.f32.mrf.mxu0  ;;  %v3024_v36 = vmul.f32 %v3022_v26, %v3008_v29 }
 0x3a8   :  { %v3319_v18 = vmul.f32 0.7978846, %v3317_v10  ;;  %v3464_v46 = vmul.f32 %v3462_v21, %v6349_v5  ;;  %v3461_v19 = vmul.f32 0.044715, %v6357_v13  ;;  %4884 = vmatprep.subr.bf16.mxu1 %v5160_v35  ;;  %v3023_v9 = vadd.f32 1.0, %v5126_v33 }
 0x3a9   :  { %v3601_v37 = vpop.f32.mrf.mxu0  ;;  %v4496_v21 = vld [vmem:[%s6577_s9 + $0x20] sm:$0xf] }
 0x3aa   :  { %5133 = vtanh.f32 %v3319_v18  ;;  %v3466_v15 = vadd.f32 %v3464_v46, %v6349_v5  ;;  %v3463_v22 = vmul.f32 %v3461_v19, %v6357_v13  ;;  %4875 = vmatmul.mubr.msk.bf16.vlgmr.msra.gmra.mxu1 %vm318_vm0, %v4476_v55  ;;  %v6370_v50 = vadd.f32 %v3601_v37, %v3549_v45  ;;  %v3849_v46 = vpop.permute.xlu0 %3848 }
 0x3ab   :  { %v4930_v3 = vpop.f32.mrf.mxu0  ;;  %v3025_v58 = vmul.f32 %v3023_v9, %v3009_v6  ;;  %4886 = vmatprep.mubr.msk.bf16.mxu1 %vm5161_vm1, %v5160_v35  ;;  %v5128_v42 = vpop.eup %5127  ;;  %v3308_v9 = vmul.f32 0.5, %v6328_v39  ;;  %v3309_v45 = vmul.f32 0.5, %v6336_v38 }
 0x3ac   :  { %v3468_v43 = vmul.f32 0.7978846, %v3466_v15  ;;  %v3465_v54 = vmul.f32 %v3463_v22, %v6357_v13  ;;  %v3610_v60 = vmul.f32 0.044715, %v6370_v50  ;;  %v3172_v2 = vadd.f32 1.0, %v5128_v42  ;;  %v3854_v42 = vpop.permute.xlu1 %3853 }
 0x3ad   :  { %v3604_v14 = vpop.f32.mrf.mxu0  ;;  %v3026_v16 = vpack.c.bf16 %v3025_v58, %v3024_v36 }
 0x3ae   :  { %v3467_v62 = vadd.f32 %v3465_v54, %v6357_v13  ;;  %v3612_v8 = vmul.f32 %v3610_v60, %v6370_v50  ;;  %v6378_v57 = vadd.f32 %v3604_v14, %v3554_v49  ;;  %5135 = vtanh.f32 %v3468_v43 }
 0x3af   :  { %v5130_v56 = vpop.eup %5129  ;;  %4885 = vmatpush3.bf16.msra.mxu1 %v3026_v16  ;;  %v4931_v7 = vpop.f32.mrf.mxu0  ;;  %v3174_v25 = vmul.f32 %v3172_v2, %v3158_v0 }
 0x3b0   :  { %v3469_v32 = vmul.f32 0.7978846, %v3467_v62  ;;  %v3614_v51 = vmul.f32 %v3612_v8, %v6370_v50  ;;  %v3611_v63 = vmul.f32 0.044715, %v6378_v57  ;;  %4896 = vmatprep.subr.bf16.mxu1 %v5160_v35  ;;  %v3173_v41 = vadd.f32 1.0, %v5130_v56 }
 0x3b1   :  { %v3751_v31 = vpop.f32.mrf.mxu0  ;;  %v4506_v8 = vld [vmem:[%s6577_s9 + $0x24] sm:$0xf] }
 0x3b2   :  { %5137 = vtanh.f32 %v3469_v32  ;;  %v3616_v20 = vadd.f32 %v3614_v51, %v6370_v50  ;;  %v3613_v23 = vmul.f32 %v3611_v63, %v6378_v57  ;;  %4887 = vmatmul.mubr.msk.bf16.vlgmr.msra.gmra.mxu1 %vm318_vm0, %v4486_v59  ;;  %v6391_v44 = vadd.f32 %v3751_v31, %v3699_v61  ;;  %v3999_v51 = vpop.permute.xlu0 %3998 }
 0x3b3   :  { %v4942_v4 = vpop.f32.mrf.mxu0  ;;  %v3175_v28 = vmul.f32 %v3173_v41, %v3159_v1  ;;  %4898 = vmatprep.mubr.msk.bf16.mxu1 %vm5161_vm1, %v5160_v35  ;;  %v5132_v52 = vpop.eup %5131  ;;  %v3458_v41 = vmul.f32 0.5, %v6349_v5  ;;  %v3459_v61 = vmul.f32 0.5, %v6357_v13 }
 0x3b4   :  { %v3618_v34 = vmul.f32 0.7978846, %v3616_v20  ;;  %v3615_v40 = vmul.f32 %v3613_v23, %v6378_v57  ;;  %v3760_v27 = vmul.f32 0.044715, %v6391_v44  ;;  %v3322_v33 = vadd.f32 1.0, %v5132_v52  ;;  %v4004_v52 = vpop.permute.xlu1 %4003 }
 0x3b5   :  { %v3754_v24 = vpop.f32.mrf.mxu0  ;;  %v3176_v47 = vpack.c.bf16 %v3175_v28, %v3174_v25 }
 0x3b6   :  { %v3617_v11 = vadd.f32 %v3615_v40, %v6378_v57  ;;  %v3762_v30 = vmul.f32 %v3760_v27, %v6391_v44  ;;  %v6399_v17 = vadd.f32 %v3754_v24, %v3704_v12  ;;  %5139 = vtanh.f32 %v3618_v34 }
 0x3b7   :  { %v5134_v48 = vpop.eup %5133  ;;  %4897 = vmatpush3.bf16.msra.mxu1 %v3176_v47  ;;  %v4943_v10 = vpop.f32.mrf.mxu0  ;;  %v3324_v22 = vmul.f32 %v3322_v33, %v3308_v9 }
 0x3b8   :  { %v3619_v53 = vmul.f32 0.7978846, %v3617_v11  ;;  %v3764_v55 = vmul.f32 %v3762_v30, %v6391_v44  ;;  %v3761_v26 = vmul.f32 0.044715, %v6399_v17  ;;  %4908 = vmatprep.subr.bf16.mxu1 %v5160_v35  ;;  %v3323_v18 = vadd.f32 1.0, %v5134_v48 }
 0x3b9   :  { %v3901_v19 = vpop.f32.mrf.mxu0  ;;  %v4516_v30 = vld [vmem:[%s6577_s9 + $0x28] sm:$0xf] }
 0x3ba   :  { %5141 = vtanh.f32 %v3619_v53  ;;  %v3766_v37 = vadd.f32 %v3764_v55, %v6391_v44  ;;  %v3763_v29 = vmul.f32 %v3761_v26, %v6399_v17  ;;  %4899 = vmatmul.mubr.msk.bf16.vlgmr.msra.gmra.mxu1 %vm318_vm0, %v4496_v21  ;;  %v6412_v6 = vadd.f32 %v3901_v19, %v3849_v46  ;;  %v4149_v55 = vpop.permute.xlu0 %4148 }
 0x3bb   :  { %v4954_v15 = vpop.f32.mrf.mxu0  ;;  %v3325_v3 = vmul.f32 %v3323_v18, %v3309_v45  ;;  %4910 = vmatprep.mubr.msk.bf16.mxu1 %vm5161_vm1, %v5160_v35  ;;  %v5136_v36 = vpop.eup %5135  ;;  %v3608_v18 = vmul.f32 0.5, %v6370_v50  ;;  %v3609_v46 = vmul.f32 0.5, %v6378_v57 }
 0x3bc   :  { %v3768_v58 = vmul.f32 0.7978846, %v3766_v37  ;;  %v3765_v39 = vmul.f32 %v3763_v29, %v6399_v17  ;;  %v3910_v38 = vmul.f32 0.044715, %v6412_v6  ;;  %v3472_v56 = vadd.f32 1.0, %v5136_v36  ;;  %v4154_v36 = vpop.permute.xlu1 %4153 }
 0x3bd   :  { %v3904_v43 = vpop.f32.mrf.mxu0  ;;  %v3326_v54 = vpack.c.bf16 %v3325_v3, %v3324_v22 }
 0x3be   :  { %5143 = vtanh.f32 %v3768_v58  ;;  %v3767_v60 = vadd.f32 %v3765_v39, %v6399_v17  ;;  %v3912_v49 = vmul.f32 %v3910_v38, %v6412_v6  ;;  %v6420_v14 = vadd.f32 %v3904_v43, %v3854_v42 }
 0x3bf   :  { %v5138_v16 = vpop.eup %5137  ;;  %4909 = vmatpush3.bf16.msra.mxu1 %v3326_v54  ;;  %v4955_v62 = vpop.f32.mrf.mxu0  ;;  %v3474_v23 = vmul.f32 %v3472_v56, %v3458_v41 }
 0x3c0   :  { %v3769_v7 = vmul.f32 0.7978846, %v3767_v60  ;;  %v3914_v59 = vmul.f32 %v3912_v49, %v6412_v6  ;;  %v3911_v2 = vmul.f32 0.044715, %v6420_v14  ;;  %4920 = vmatprep.subr.bf16.mxu1 %v5160_v35  ;;  %v3473_v32 = vadd.f32 1.0, %v5138_v16 }
 0x3c1   :  { %v4051_v63 = vpop.f32.mrf.mxu0  ;;  %v4526_v16 = vld [vmem:[%s6577_s9 + $0x2c] sm:$0xf]  ;;  %v3758_v62 = vmul.f32 0.5, %v6391_v44 }
 0x3c2   :  { %5145 = vtanh.f32 %v3769_v7  ;;  %v3916_v31 = vadd.f32 %v3914_v59, %v6412_v6  ;;  %v3913_v0 = vmul.f32 %v3911_v2, %v6420_v14  ;;  %4911 = vmatmul.mubr.msk.bf16.vlgmr.msra.gmra.mxu1 %vm318_vm0, %v4506_v8  ;;  %v6433_v1 = vadd.f32 %v4051_v63, %v3999_v51 }
 0x3c3   :  { %v4966_v20 = vpop.f32.mrf.mxu0  ;;  %v3475_v4 = vmul.f32 %v3473_v32, %v3459_v61  ;;  %4922 = vmatprep.mubr.msk.bf16.mxu1 %vm5161_vm1, %v5160_v35  ;;  %v5140_v25 = vpop.eup %5139  ;;  %v3759_v8 = vmul.f32 0.5, %v6399_v17 }
 0x3c4   :  { %v3918_v28 = vmul.f32 0.7978846, %v3916_v31  ;;  %v3915_v5 = vmul.f32 %v3913_v0, %v6420_v14  ;;  %v4060_v13 = vmul.f32 0.044715, %v6433_v1  ;;  %v3622_v48 = vadd.f32 1.0, %v5140_v25 }
 0x3c5   :  { %v4054_v34 = vpop.f32.mrf.mxu0  ;;  %v3476_v40 = vpack.c.bf16 %v3475_v4, %v3474_v23  ;;  %v4536_v4 = vld [vmem:[%s6577_s9 + $0x30] sm:$0xf] }
 0x3c6   :  { %5147 = vtanh.f32 %v3918_v28  ;;  %v3917_v27 = vadd.f32 %v3915_v5, %v6420_v14  ;;  %v4062_v12 = vmul.f32 %v4060_v13, %v6433_v1  ;;  %v6441_v24 = vadd.f32 %v4054_v34, %v4004_v52 }
 0x3c7   :  { %v5142_v47 = vpop.eup %5141  ;;  %4921 = vmatpush3.bf16.msra.mxu1 %v3476_v40  ;;  %v4967_v11 = vpop.f32.mrf.mxu0  ;;  %v3624_v15 = vmul.f32 %v3622_v48, %v3608_v18  ;;  %v3908_v28 = vmul.f32 0.5, %v6412_v6  ;;  %v3909_v5 = vmul.f32 0.5, %v6420_v14  ;;  %v4546_v6 = vld [vmem:[%s6577_s9 + $0x34] sm:$0xf]  ;;  %v4058_v14 = vmul.f32 0.5, %v6433_v1 }
 0x3c8   :  { %v3919_v10 = vmul.f32 0.7978846, %v3917_v27  ;;  %v4064_v21 = vmul.f32 %v4062_v12, %v6433_v1  ;;  %v4061_v33 = vmul.f32 0.044715, %v6441_v24  ;;  %4932 = vmatprep.subr.bf16.mxu1 %v5160_v35  ;;  %v3623_v53 = vadd.f32 1.0, %v5142_v47 }
 0x3c9   :  { %v4201_v26 = vpop.f32.mrf.mxu0  ;;  %v4059_v11 = vmul.f32 0.5, %v6441_v24 }
 0x3ca   :  { %5149 = vtanh.f32 %v3919_v10  ;;  %v4066_v19 = vadd.f32 %v4064_v21, %v6433_v1  ;;  %v4063_v9 = vmul.f32 %v4061_v33, %v6441_v24  ;;  %4923 = vmatmul.mubr.msk.bf16.vlgmr.msra.gmra.mxu1 %vm318_vm0, %v4516_v30  ;;  %v6454_v45 = vadd.f32 %v4201_v26, %v4149_v55  ;;  %v4556_v26 = vld [vmem:[%s6577_s9 + $0x38] sm:$0xf] }
 0x3cb   :  { %v5144_v37 = vpop.eup %5143  ;;  %v4978_v29 = vpop.f32.mrf.mxu0  ;;  %v3625_v22 = vmul.f32 %v3623_v53, %v3609_v46  ;;  %4934 = vmatprep.mubr.msk.bf16.mxu1 %vm5161_vm1, %v5160_v35 }
 0x3cc   :  { %v4068_v3 = vmul.f32 0.7978846, %v4066_v19  ;;  %v4065_v50 = vmul.f32 %v4063_v9, %v6441_v24  ;;  %v4210_v57 = vmul.f32 0.044715, %v6454_v45  ;;  %v3772_v38 = vadd.f32 1.0, %v5144_v37  ;;  %v1985_v29 = vpop.permute.xlu0 %1984 }
 0x3cd   :  { %v4204_v58 = vpop.f32.mrf.mxu0  ;;  %v3626_v39 = vpack.c.bf16 %v3625_v22, %v3624_v15  ;;  %v4208_v1 = vmul.f32 0.5, %v6454_v45  ;;  %v4566_v37 = vld [vmem:[%s6577_s9 + $0x3c] sm:$0xf] }
 0x3ce   :  { %5151 = vtanh.f32 %v4068_v3  ;;  %v4067_v42 = vadd.f32 %v4065_v50, %v6441_v24  ;;  %v4212_v43 = vmul.f32 %v4210_v57, %v6454_v45  ;;  %v4205_v54 = vadd.f32 %v4204_v58, %v4154_v36 }
 0x3cf   :  { %v5146_v60 = vpop.eup %5145  ;;  %4933 = vmatpush3.bf16.msra.mxu1 %v3626_v39  ;;  %v4979_v49 = vpop.f32.mrf.mxu0  ;;  %v3774_v32 = vmul.f32 %v3772_v38, %v3758_v62 }
 0x3d0   :  { %v4069_v56 = vmul.f32 0.7978846, %v4067_v42  ;;  %v4214_v7 = vmul.f32 %v4212_v43, %v6454_v45  ;;  %v4211_v59 = vmul.f32 0.044715, %v4205_v54  ;;  %4944 = vmatprep.subr.bf16.mxu1 %v5160_v35  ;;  %v3773_v2 = vadd.f32 1.0, %v5146_v60  ;;  %v2284_v42 = vpop.permute.xlu0 %2283 }
 0x3d1   :  { %v4209_v24 = vmul.f32 0.5, %v4205_v54 }
 0x3d2   :  { %5153 = vtanh.f32 %v4069_v56  ;;  %v4216_v51 = vadd.f32 %v4214_v7, %v6454_v45  ;;  %v4213_v63 = vmul.f32 %v4211_v59, %v4205_v54  ;;  %4935 = vmatmul.mubr.msk.bf16.vlgmr.msra.gmra.mxu1 %vm318_vm0, %v4526_v16  ;;  %v3775_v41 = vmul.f32 %v3773_v2, %v3759_v8 }
 0x3d3   :  { %v5148_v61 = vpop.eup %5147  ;;  %4946 = vmatprep.mubr.msk.bf16.mxu1 %vm5161_vm1, %v5160_v35 }
 0x3d4   :  { %v4218_v44 = vmul.f32 0.7978846, %v4216_v51  ;;  %v4215_v17 = vmul.f32 %v4213_v63, %v4205_v54  ;;  %v3776_v31 = vpack.c.bf16 %v3775_v41, %v3774_v32  ;;  %v3922_v20 = vadd.f32 1.0, %v5148_v61  ;;  %v2584_v32 = vpop.permute.xlu0 %2583 }
 0x3d6   :  { %5155 = vtanh.f32 %v4218_v44  ;;  %v4217_v0 = vadd.f32 %v4215_v17, %v4205_v54  ;;  %4945 = vmatpush3.bf16.msra.mxu1 %v3776_v31  ;;  %v3924_v52 = vmul.f32 %v3922_v20, %v3908_v28 }
 0x3d7   :  { %v5150_v23 = vpop.eup %5149  ;;  %4956 = vmatprep.subr.bf16.mxu1 %v5160_v35 }
 0x3d8   :  { %v4219_v25 = vmul.f32 0.7978846, %v4217_v0  ;;  %v3923_v13 = vadd.f32 1.0, %v5150_v23 }
 0x3da   :  { %5157 = vtanh.f32 %v4219_v25  ;;  %4947 = vmatmul.mubr.msk.bf16.vlgmr.msra.gmra.mxu1 %vm318_vm0, %v4536_v4  ;;  %v3925_v34 = vmul.f32 %v3923_v13, %v3909_v5  ;;  %v2884_v25 = vpop.permute.xlu0 %2883 }
 0x3db   :  { %v5152_v40 = vpop.eup %5151  ;;  %4958 = vmatprep.mubr.msk.bf16.mxu1 %vm5161_vm1, %v5160_v35 }
 0x3dc   :  { %v3926_v27 = vpack.c.bf16 %v3925_v34, %v3924_v52  ;;  %v4072_v12 = vadd.f32 1.0, %v5152_v40 }
 0x3de   :  { %4957 = vmatpush3.bf16.msra.mxu1 %v3926_v27  ;;  %v4074_v48 = vmul.f32 %v4072_v12, %v4058_v14 }
 0x3df   :  { %v5154_v47 = vpop.eup %5153  ;;  %4968 = vmatprep.subr.bf16.mxu1 %v5160_v35 }
 0x3e0   :  { %v4073_v30 = vadd.f32 1.0, %v5154_v47 }
 0x3e2   :  { %4959 = vmatmul.mubr.msk.bf16.vlgmr.msra.gmra.mxu1 %vm318_vm0, %v4546_v6  ;;  %v4075_v10 = vmul.f32 %v4073_v30, %v4059_v11  ;;  %v3184_v11 = vpop.permute.xlu0 %3183 }
 0x3e3   :  { %v5156_v21 = vpop.eup %5155  ;;  %4970 = vmatprep.mubr.msk.bf16.mxu1 %vm5161_vm1, %v5160_v35 }
 0x3e4   :  { %v4076_v33 = vpack.c.bf16 %v4075_v10, %v4074_v48  ;;  %v4222_v53 = vadd.f32 1.0, %v5156_v21 }
 0x3e6   :  { %4969 = vmatpush3.bf16.msra.mxu1 %v4076_v33  ;;  %v4224_v46 = vmul.f32 %v4222_v53, %v4208_v1 }
 0x3e7   :  { %v5158_v55 = vpop.eup %5157  ;;  %4980 = vmatprep.subr.bf16.mxu1 %v5160_v35 }
 0x3e8   :  { %v4223_v18 = vadd.f32 1.0, %v5158_v55 }
 0x3ea   :  { %4971 = vmatmul.mubr.msk.bf16.vlgmr.msra.gmra.mxu1 %vm318_vm0, %v4556_v26  ;;  %v4225_v19 = vmul.f32 %v4223_v18, %v4209_v24 }
 0x3eb   :  { %4982 = vmatprep.mubr.msk.bf16.mxu1 %vm5161_vm1, %v5160_v35  ;;  %v2134_v35 = vpop.permute.xlu1 %2133 }
 0x3ec   :  { %v4226_v9 = vpack.c.bf16 %v4225_v19, %v4224_v46  ;;  %v3484_v46 = vpop.permute.xlu0 %3483 }
 0x3ee   :  { %4981 = vmatpush3.bf16.msra.mxu1 %v4226_v9 }
 0x3ef   :  { %v2434_v62 = vpop.permute.xlu1 %2433 }
 0x3f2   :  { %4983 = vmatmul.mubr.msk.bf16.vlgmr.msra.gmra.mxu1 %vm318_vm0, %v4566_v37 }
 0x3f3   :  { %v2734_v17 = vpop.permute.xlu1 %2733 }
 0x3f7   :  { %v3034_v40 = vpop.permute.xlu1 %3033 }
 0x3fb   :  { %v3334_v53 = vpop.permute.xlu1 %3333 }
 0x43a   :  { %v2024_v15 = vpop.f32.mrf.mxu1 }
 0x43b   :  { %v2025_v45 = vadd.f32 %v2024_v15, %v1985_v29 }
 0x43c   :  { %v4804_v22 = vpop.f32.mrf.mxu1 }
 0x43d   :  { %2030 = vst.msk [vmem:[%s6578_s11] sm:$0xff] %vm431_vm2, %v2025_v45  ;;  %v3634_v45 = vpop.permute.xlu1 %3633 }
 0x43e   :  { %v2027_v3 = vpop.f32.mrf.mxu1 }
 0x440   :  { %v4805_v50 = vpop.f32.mrf.mxu1 }
 0x442   :  { %v2173_v57 = vpop.f32.mrf.mxu1 }
 0x443   :  { %v2174_v36 = vadd.f32 %v2173_v57, %v2134_v35 }
 0x444   :  { %v4816_v58 = vpop.f32.mrf.mxu1 }
 0x445   :  { %4429 = vst.msk [vmem:[%s6578_s11 + $0x8] sm:$0xff] %vm431_vm2, %v2174_v36  ;;  %v3784_v36 = vpop.permute.xlu0 %3783 }
 0x446   :  { %v2176_v39 = vpop.f32.mrf.mxu1 }
 0x448   :  { %v4817_v38 = vpop.f32.mrf.mxu1 }
 0x44a   :  { %v2323_v43 = vpop.f32.mrf.mxu1 }
 0x44b   :  { %v2324_v54 = vadd.f32 %v2323_v43, %v2284_v42 }
 0x44c   :  { %v4828_v60 = vpop.f32.mrf.mxu1 }
 0x44d   :  { %4439 = vst.msk [vmem:[%s6578_s11 + $0x10] sm:$0xff] %vm431_vm2, %v2324_v54  ;;  %v3934_v54 = vpop.permute.xlu1 %3933 }
 0x44e   :  { %v2326_v49 = vpop.f32.mrf.mxu1 }
 0x450   :  { %v4829_v16 = vpop.f32.mrf.mxu1 }
 0x452   :  { %v2473_v8 = vpop.f32.mrf.mxu1 }
 0x453   :  { %v2474_v56 = vadd.f32 %v2473_v8, %v2434_v62 }
 0x454   :  { %v4840_v7 = vpop.f32.mrf.mxu1 }
 0x455   :  { %4449 = vst.msk [vmem:[%s6578_s11 + $0x18] sm:$0xff] %vm431_vm2, %v2474_v56  ;;  %v4084_v56 = vpop.permute.xlu0 %4083 }
 0x456   :  { %v2476_v59 = vpop.f32.mrf.mxu1 }
 0x458   :  { %v4841_v2 = vpop.f32.mrf.mxu1 }
 0x45a   :  { %v2623_v51 = vpop.f32.mrf.mxu1 }
 0x45b   :  { %v2624_v63 = vadd.f32 %v2623_v51, %v2584_v32 }
 0x45c   :  { %v4852_v41 = vpop.f32.mrf.mxu1 }
 0x45d   :  { %4459 = vst.msk [vmem:[%s6578_s11 + $0x20] sm:$0xff] %vm431_vm2, %v2624_v63  ;;  %v4234_v63 = vpop.permute.xlu1 %4233 }
 0x45e   :  { %v2626_v61 = vpop.f32.mrf.mxu1 }
 0x460   :  { %v4853_v44 = vpop.f32.mrf.mxu1 }
 0x462   :  { %v2773_v31 = vpop.f32.mrf.mxu1 }
 0x463   :  { %v2774_v0 = vadd.f32 %v2773_v31, %v2734_v17 }
 0x464   :  { %v4864_v20 = vpop.f32.mrf.mxu1 }
 0x465   :  { %4469 = vst.msk [vmem:[%s6578_s11 + $0x28] sm:$0xff] %vm431_vm2, %v2774_v0 }
 0x466   :  { %v2776_v23 = vpop.f32.mrf.mxu1 }
 0x468   :  { %v4865_v4 = vpop.f32.mrf.mxu1 }
 0x46a   :  { %v2923_v28 = vpop.f32.mrf.mxu1 }
 0x46b   :  { %v2924_v5 = vadd.f32 %v2923_v28, %v2884_v25 }
 0x46c   :  { %v4876_v13 = vpop.f32.mrf.mxu1 }
 0x46d   :  { %4479 = vst.msk [vmem:[%s6578_s11 + $0x30] sm:$0xff] %vm431_vm2, %v2924_v5 }
 0x46e   :  { %v2926_v52 = vpop.f32.mrf.mxu1 }
 0x470   :  { %v4877_v34 = vpop.f32.mrf.mxu1 }
 0x472   :  { %v3073_v27 = vpop.f32.mrf.mxu1 }
 0x473   :  { %v3074_v12 = vadd.f32 %v3073_v27, %v3034_v40 }
 0x474   :  { %v4888_v47 = vpop.f32.mrf.mxu1 }
 0x475   :  { %4489 = vst.msk [vmem:[%s6578_s11 + $0x38] sm:$0xff] %vm431_vm2, %v3074_v12 }
 0x476   :  { %v3076_v6 = vpop.f32.mrf.mxu1 }
 0x478   :  { %v4889_v14 = vpop.f32.mrf.mxu1 }
 0x47a   :  { %v3223_v30 = vpop.f32.mrf.mxu1 }
 0x47b   :  { %v3224_v48 = vadd.f32 %v3223_v30, %v3184_v11 }
 0x47c   :  { %v4900_v10 = vpop.f32.mrf.mxu1 }
 0x47d   :  { %4499 = vst.msk [vmem:[%s6578_s11 + $0x40] sm:$0xff] %vm431_vm2, %v3224_v48 }
 0x47e   :  { %v3226_v21 = vpop.f32.mrf.mxu1 }
 0x480   :  { %v4901_v33 = vpop.f32.mrf.mxu1 }
 0x482   :  { %v3373_v55 = vpop.f32.mrf.mxu1 }
 0x483   :  { %v3374_v26 = vadd.f32 %v3373_v55, %v3334_v53 }
 0x484   :  { %v4912_v1 = vpop.f32.mrf.mxu1 }
 0x485   :  { %4509 = vst.msk [vmem:[%s6578_s11 + $0x48] sm:$0xff] %vm431_vm2, %v3374_v26 }
 0x486   :  { %v3376_v24 = vpop.f32.mrf.mxu1 }
 0x488   :  { %v4913_v18 = vpop.f32.mrf.mxu1 }
 0x48a   :  { %v3523_v19 = vpop.f32.mrf.mxu1 }
 0x48b   :  { %v3524_v9 = vadd.f32 %v3523_v19, %v3484_v46 }
 0x48c   :  { %v4924_v37 = vpop.f32.mrf.mxu1 }
 0x48d   :  { %4519 = vst.msk [vmem:[%s6578_s11 + $0x50] sm:$0xff] %vm431_vm2, %v3524_v9 }
 0x48e   :  { %v3526_v29 = vpop.f32.mrf.mxu1 }
 0x490   :  { %v4925_v15 = vpop.f32.mrf.mxu1 }
 0x492   :  { %v3673_v22 = vpop.f32.mrf.mxu1 }
 0x493   :  { %v3674_v3 = vadd.f32 %v3673_v22, %v3634_v45 }
 0x494   :  { %v4936_v50 = vpop.f32.mrf.mxu1 }
 0x495   :  { %4529 = vst.msk [vmem:[%s6578_s11 + $0x58] sm:$0xff] %vm431_vm2, %v3674_v3 }
 0x496   :  { %v3676_v35 = vpop.f32.mrf.mxu1 }
 0x498   :  { %v4937_v57 = vpop.f32.mrf.mxu1 }
 0x49a   :  { %v3823_v58 = vpop.f32.mrf.mxu1 }
 0x49b   :  { %v3824_v39 = vadd.f32 %v3823_v58, %v3784_v36 }
 0x49c   :  { %v4948_v38 = vpop.f32.mrf.mxu1 }
 0x49d   :  { %4539 = vst.msk [vmem:[%s6578_s11 + $0x60] sm:$0xff] %vm431_vm2, %v3824_v39 }
 0x49e   :  { %v3826_v42 = vpop.f32.mrf.mxu1 }
 0x4a0   :  { %v4949_v43 = vpop.f32.mrf.mxu1 }
 0x4a2   :  { %v3973_v60 = vpop.f32.mrf.mxu1 }
 0x4a3   :  { %v3974_v49 = vadd.f32 %v3973_v60, %v3934_v54 }
 0x4a4   :  { %v4960_v16 = vpop.f32.mrf.mxu1 }
 0x4a5   :  { %4549 = vst.msk [vmem:[%s6578_s11 + $0x68] sm:$0xff] %vm431_vm2, %v3974_v49 }
 0x4a6   :  { %v3976_v62 = vpop.f32.mrf.mxu1 }
 0x4a8   :  { %v4961_v8 = vpop.f32.mrf.mxu1 }
 0x4aa   :  { %v4123_v7 = vpop.f32.mrf.mxu1 }
 0x4ab   :  { %v4124_v59 = vadd.f32 %v4123_v7, %v4084_v56 }
 0x4ac   :  { %v4972_v2 = vpop.f32.mrf.mxu1 }
 0x4ad   :  { %4559 = vst.msk [vmem:[%s6578_s11 + $0x70] sm:$0xff] %vm431_vm2, %v4124_v59 }
 0x4ae   :  { %v4126_v32 = vpop.f32.mrf.mxu1 }
 0x4b0   :  { %v4973_v51 = vpop.f32.mrf.mxu1 }
 0x4b2   :  { %v4273_v41 = vpop.f32.mrf.mxu1 }
 0x4b3   :  { %v4274_v61 = vadd.f32 %v4273_v41, %v4234_v63 }
 0x4b4   :  { %v4984_v44 = vpop.f32.mrf.mxu1 }
 0x4b5   :  { %4569 = vst.msk [vmem:[%s6578_s11 + $0x78] sm:$0xff] %vm431_vm2, %v4274_v61 }
 0x4b6   :  { %v4276_v17 = vpop.f32.mrf.mxu1 }
 0x4b8   :  { %v4985_v31 = vpop.f32.mrf.mxu1 }

</bundles_post_ra>
